<compile_context>
chip_gen: v6e
topology: v6e:2x2x1
jax: 0.10.0
libtpu: 0.0.40
codegen_flags: <defaults>
</compile_context>

<pallas_src>
import functools
import math

import jax
import jax.numpy as jnp
from jax import lax
from jax.experimental import pallas as pl
from jax.experimental.pallas import tpu as pltpu


_ACT_DT = jnp.bfloat16            # inter-kernel activation / weight storage dtype


# ----------------------------------------------------------------------------
# activations (usable inside kernels)
# ----------------------------------------------------------------------------
def _gelu(x):
    return jax.nn.gelu(x, approximate=True)


def _relu(x):
    return jnp.maximum(x, 0.0)


def _lrelu(x):
    return jnp.where(x >= 0, x, 0.2 * x)


def _sigmoid(x):
    return jax.nn.sigmoid(x)


_ACTS = {None: lambda x: x, "gelu": _gelu, "relu": _relu,
         "lrelu": _lrelu, "sigmoid": _sigmoid}


def _f_add(a, b):
    return a + b


# ----------------------------------------------------------------------------
# compiler params
# ----------------------------------------------------------------------------
@functools.lru_cache(maxsize=None)
def _vmem_limit_bytes():
    """Generation-aware scoped-VMEM limit (leaves headroom on v7x's 64 MiB)."""
    cap = 128 * 1024 * 1024
    try:
        info_fn = getattr(pltpu, "get_tpu_info", None)
        if info_fn is not None:
            cap = int(getattr(info_fn(), "vmem_capacity_bytes", cap))
    except Exception:
        pass
    return int(min(cap * 3 // 4, 100 * 1024 * 1024))


def _cparams(n_parallel=1):
    return pltpu.CompilerParams(
        dimension_semantics=("parallel",) * n_parallel,
        vmem_limit_bytes=_vmem_limit_bytes())


def _full_spec(shape):
    n = len(shape)
    return pl.BlockSpec(shape, lambda *_: (0,) * n)


# ----------------------------------------------------------------------------
# Pallas kernels
# ----------------------------------------------------------------------------
def _conv_kernel(*refs, KH, KW, pad, act, Hout, Wout):
    """Dense KHxKW conv (stride 1) on one batch element, NHWC.

    In-kernel zero padding (halo scratch) + single im2col matmul with
    K = KH*KW*Cin (im2col matrix assembled in a VMEM scratch).
    """
    f32, bf16 = jnp.float32, jnp.bfloat16
    x_ref, w_ref, b_ref, o_ref = refs[:4]
    scratch = refs[4:]
    x = x_ref[0]                                   # (H, W, Cin) bf16
    H, W, Cin = x.shape
    si = 0
    if pad > 0:
        pad_ref = scratch[si]
        si += 1
        Hp, Wp = H + 2 * pad, W + 2 * pad
        zr = jnp.zeros((pad, Wp, Cin), pad_ref.dtype)
        zc = jnp.zeros((Hp, pad, Cin), pad_ref.dtype)
        pad_ref[0:pad, :, :] = zr                  # re-zero only the halo
        pad_ref[Hp - pad:Hp, :, :] = zr
        pad_ref[:, 0:pad, :] = zc
        pad_ref[:, Wp - pad:Wp, :] = zc
        pad_ref[pad:pad + H, pad:pad + W, :] = x.astype(pad_ref.dtype)
        xp = pad_ref[...]
    else:
        xp = x
    Cout = w_ref.shape[-1]
    if KH == 1 and KW == 1:
        lhs = xp.reshape(Hout * Wout, Cin).astype(bf16)
    else:
        im_ref = scratch[si]                       # (Hout, Wout, KH*KW*Cin) bf16
        for kh in range(KH):
            for kw in range(KW):
                j = kh * KW + kw
                im_ref[:, :, j * Cin:(j + 1) * Cin] = \
                    xp[kh:kh + Hout, kw:kw + Wout, :].astype(im_ref.dtype)
        lhs = im_ref[...].reshape(Hout * Wout, KH * KW * Cin)
    y = jnp.dot(lhs, w_ref[...], preferred_element_type=f32) + b_ref[...].astype(f32)
    o_ref[0] = _ACTS[act](y).reshape(Hout, Wout, Cout).astype(o_ref.dtype)


def _block_kernel(*refs, H, W, C, with_distill, add_residual):
    """Whole `Block` (+ Susi0 per-stage distill + residual + GELU) fused.

    Per stage, the BSConvU pointwise, the Block distill 1x1 and (stage 1) the
    Susi0 stage-distill 1x1 are ONE merged dot (weights pre-concatenated along
    N at prepare time); the 3x3 depthwise runs as a valid conv over a
    zero-halo bf16 VMEM scratch holding the running residual.
    """
    f32, bf16 = jnp.float32, jnp.bfloat16
    Hp, Wp = H + 2, W + 2
    dc = C // 2
    (x_ref, s1w, s1b, dw1w, dw1b,
     s2w, s2b, dw2w, dw2b,
     s3w, s3b, dw3w, dw3b,
     pw4, dw4w, dw4b, c5w, c5b) = refs[:18]
    if with_distill:
        d_ref, r_ref, pad_ref = refs[18], refs[19], refs[20]
    else:
        d_ref = None
        r_ref, pad_ref = refs[18], refs[19]

    pdt = pad_ref.dtype
    zr = jnp.zeros((1, Wp, C), pdt)
    zc = jnp.zeros((Hp, 1, C), pdt)
    pad_ref[0:1, :, :] = zr                        # re-zero only the 1-px halo
    pad_ref[Hp - 1:Hp, :, :] = zr
    pad_ref[:, 0:1, :] = zc
    pad_ref[:, Wp - 1:Wp, :] = zc

    x_in = x_ref[0].astype(f32)                    # (H, W, C)
    pad_ref[1:H + 1, 1:W + 1, :] = x_in.astype(pdt)

    def dw3x3(tpad, w_r, b_r):                     # depthwise 3x3 valid conv, f32
        acc = jnp.zeros((H, W, C), f32)
        for a in range(3):
            for b in range(3):
                acc = acc + tpad[a:a + H, b:b + W, :] * \
                    w_r[a, b, :].reshape(1, 1, C)
        return acc + b_r[...].reshape(1, 1, C)

    def stage(wm, bm, dww, dwb, r_prev):
        flat = pad_ref[...].reshape(Hp * Wp, C)    # bf16
        y = jnp.dot(flat, wm[...], preferred_element_type=f32) + bm[...]
        d = _gelu(y[:, C:C + dc])                  # Block distill branch
        extra = y[:, C + dc:] if wm.shape[-1] > C + dc else None
        t = y[:, :C].reshape(Hp, Wp, C)            # BSConvU pointwise (no bias)
        r = dw3x3(t, dww, dwb)
        if r_prev is not None:
            r = r + r_prev
        r = _gelu(r)
        pad_ref[1:H + 1, 1:W + 1, :] = r.astype(pdt)
        return d, extra, r

    d1, sd, r1 = stage(s1w, s1b, dw1w, dw1b, x_in)
    d2, _, r2 = stage(s2w, s2b, dw2w, dw2b, r1)
    d3, _, r3 = stage(s3w, s3b, dw3w, dw3b, r2)

    # stage 4: BSConvU only, no distill, no residual
    flat = pad_ref[...].reshape(Hp * Wp, C)
    t4 = jnp.dot(flat, pw4[...], preferred_element_type=f32).reshape(Hp, Wp, C)
    r4 = _gelu(dw3x3(t4, dw4w, dw4b))
    pad_ref[1:H + 1, 1:W + 1, :] = r4.astype(pdt)
    r4flat = pad_ref[...].reshape(Hp * Wp, C)

    # c5(concat([d1, d2, d3, r4])) as accumulated row-sliced dots (no concat).
    out = (jnp.dot(d1.astype(bf16), c5w[0:dc, :], preferred_element_type=f32)
           + jnp.dot(d2.astype(bf16), c5w[dc:2 * dc, :], preferred_element_type=f32)
           + jnp.dot(d3.astype(bf16), c5w[2 * dc:3 * dc, :], preferred_element_type=f32)
           + jnp.dot(r4flat, c5w[3 * dc:3 * dc + C, :], preferred_element_type=f32)
           + c5b[...])
    out3 = out.reshape(Hp, Wp, C)[1:H + 1, 1:W + 1, :]
    if add_residual:
        out3 = out3 + x_in
    r_ref[0] = _gelu(out3).astype(r_ref.dtype)

    if with_distill:
        sd3 = _gelu(sd).reshape(Hp, Wp, dc)
        d_ref[0] = sd3[1:H + 1, 1:W + 1, :].astype(d_ref.dtype)


def _mconv1x1_kernel(*refs, n_in, splits, act):
    """Fused `conv1x1(concat(xs, axis=C))` as accumulated per-input dots."""
    f32, bf16 = jnp.float32, jnp.bfloat16
    w_ref, b_ref, o_ref = refs[n_in], refs[n_in + 1], refs[n_in + 2]
    H, W = refs[0].shape[1], refs[0].shape[2]
    Cout = w_ref.shape[-1]
    acc = jnp.zeros((H * W, Cout), f32) + b_ref[...].astype(f32)
    off = 0
    for i in range(n_in):
        ci = splits[i]
        xi = refs[i][0].reshape(H * W, ci).astype(bf16)
        acc = acc + jnp.dot(xi, w_ref[off:off + ci, :], preferred_element_type=f32)
        off += ci
    o_ref[0] = _ACTS[act](acc).reshape(H, W, Cout).astype(o_ref.dtype)


def _esa_tail_kernel(x_ref, c3_ref, cf_ref, w_ref, b_ref, o_ref):
    """Fused ESA tail: x * sigmoid(conv4(c3 + cf))."""
    f32, bf16 = jnp.float32, jnp.bfloat16
    x = x_ref[0].astype(f32)                       # (H, W, C)
    s = c3_ref[0].astype(f32) + cf_ref[0].astype(f32)
    H, W, C = x.shape
    fd = s.shape[-1]
    m = jax.nn.sigmoid(
        jnp.dot(s.reshape(H * W, fd).astype(bf16), w_ref[...],
                preferred_element_type=f32) + b_ref[...].astype(f32))
    o_ref[0] = (x * m.reshape(H, W, C)).astype(o_ref.dtype)


def _cca_kernel(*refs, with_residual):
    """CCALayer: (channel std + mean) -> 1x1 -> relu -> 1x1 -> sigmoid -> scale
    (+ optional fused residual add)."""
    f32 = jnp.float32
    if with_residual:
        x_ref, res_ref, w1, b1, w2, b2, o_ref = refs
    else:
        x_ref, w1, b1, w2, b2, o_ref = refs
        res_ref = None
    x = x_ref[0].astype(f32)                       # (H, W, C)
    H, W, C = x.shape
    n = float(H * W)
    xf = x.reshape(H * W, C)
    mean = jnp.sum(xf, axis=0, keepdims=True) / n
    var = jnp.sum((xf - mean) ** 2, axis=0, keepdims=True) / n
    y = jnp.sqrt(var) + mean                       # contrast + avg pool
    h = jnp.maximum(jnp.dot(y, w1[...], preferred_element_type=f32) + b1[...], 0.0)
    s = jax.nn.sigmoid(jnp.dot(h, w2[...], preferred_element_type=f32) + b2[...])
    out = x * s.reshape(1, 1, C)
    if with_residual:
        out = out + res_ref[0].astype(f32)
    o_ref[0] = out.astype(o_ref.dtype)


def _elt_kernel(*refs, fn):
    n = len(refs) - 1
    ins = [r[...].astype(jnp.float32) for r in refs[:n]]
    refs[n][...] = fn(*ins).astype(refs[n].dtype)


# ----------------------------------------------------------------------------
# cached pallas_call builders (each unique config compiles exactly once)
# ----------------------------------------------------------------------------
@functools.lru_cache(maxsize=None)
def _build_conv(B, H, W, Cin, KH, KW, Cout, pad, act, odt):
    Hout, Wout = H + 2 * pad - KH + 1, W + 2 * pad - KW + 1
    kern = functools.partial(_conv_kernel, KH=KH, KW=KW, pad=pad, act=act,
                             Hout=Hout, Wout=Wout)
    scratch = []
    if pad > 0:
        scratch.append(pltpu.VMEM((H + 2 * pad, W + 2 * pad, Cin), _ACT_DT))
    if not (KH == 1 and KW == 1):
        scratch.append(pltpu.VMEM((Hout, Wout, KH * KW * Cin), _ACT_DT))
    return jax.jit(pl.pallas_call(
        kern,
        out_shape=jax.ShapeDtypeStruct((B, Hout, Wout, Cout), odt),
        grid=(B,),
        in_specs=[pl.BlockSpec((1, H, W, Cin), lambda b: (b, 0, 0, 0)),
                  _full_spec((KH * KW * Cin, Cout)),
                  _full_spec((1, Cout))],
        out_specs=pl.BlockSpec((1, Hout, Wout, Cout), lambda b: (b, 0, 0, 0)),
        scratch_shapes=scratch,
        compiler_params=_cparams(1),
    ))


@functools.lru_cache(maxsize=None)
def _build_block(B, H, W, C, with_distill, add_residual, odt):
    Hp, Wp = H + 2, W + 2
    dc = C // 2
    kern = functools.partial(_block_kernel, H=H, W=W, C=C,
                             with_distill=with_distill,
                             add_residual=add_residual)
    n1 = C + (2 * dc if with_distill else dc)
    in_specs = [pl.BlockSpec((1, H, W, C), lambda b: (b, 0, 0, 0)),
                _full_spec((C, n1)), _full_spec((1, n1)),
                _full_spec((3, 3, C)), _full_spec((1, C)),
                _full_spec((C, C + dc)), _full_spec((1, C + dc)),
                _full_spec((3, 3, C)), _full_spec((1, C)),
                _full_spec((C, C + dc)), _full_spec((1, C + dc)),
                _full_spec((3, 3, C)), _full_spec((1, C)),
                _full_spec((C, C)),
                _full_spec((3, 3, C)), _full_spec((1, C)),
                _full_spec((3 * dc + C, C)), _full_spec((1, C))]
    if with_distill:
        out_shape = (jax.ShapeDtypeStruct((B, H, W, dc), odt),
                     jax.ShapeDtypeStruct((B, H, W, C), odt))
        out_specs = (pl.BlockSpec((1, H, W, dc), lambda b: (b, 0, 0, 0)),
                     pl.BlockSpec((1, H, W, C), lambda b: (b, 0, 0, 0)))
    else:
        out_shape = jax.ShapeDtypeStruct((B, H, W, C), odt)
        out_specs = pl.BlockSpec((1, H, W, C), lambda b: (b, 0, 0, 0))
    return jax.jit(pl.pallas_call(
        kern,
        out_shape=out_shape,
        grid=(B,),
        in_specs=in_specs,
        out_specs=out_specs,
        scratch_shapes=[pltpu.VMEM((Hp, Wp, C), _ACT_DT)],
        compiler_params=_cparams(1),
    ))


@functools.lru_cache(maxsize=None)
def _build_mconv1x1(B, H, W, splits, Cout, act, odt):
    n_in = len(splits)
    Ktot = sum(splits)
    kern = functools.partial(_mconv1x1_kernel, n_in=n_in, splits=splits, act=act)
    in_specs = [pl.BlockSpec((1, H, W, ci), lambda b: (b, 0, 0, 0)) for ci in splits]
    in_specs += [_full_spec((Ktot, Cout)), _full_spec((1, Cout))]
    return jax.jit(pl.pallas_call(
        kern,
        out_shape=jax.ShapeDtypeStruct((B, H, W, Cout), odt),
        grid=(B,),
        in_specs=in_specs,
        out_specs=pl.BlockSpec((1, H, W, Cout), lambda b: (b, 0, 0, 0)),
        compiler_params=_cparams(1),
    ))


@functools.lru_cache(maxsize=None)
def _build_esa_tail(B, H, W, C, Fc, odt):
    return jax.jit(pl.pallas_call(
        _esa_tail_kernel,
        out_shape=jax.ShapeDtypeStruct((B, H, W, C), odt),
        grid=(B,),
        in_specs=[pl.BlockSpec((1, H, W, C), lambda b: (b, 0, 0, 0)),
                  pl.BlockSpec((1, H, W, Fc), lambda b: (b, 0, 0, 0)),
                  pl.BlockSpec((1, H, W, Fc), lambda b: (b, 0, 0, 0)),
                  _full_spec((Fc, C)), _full_spec((1, C))],
        out_specs=pl.BlockSpec((1, H, W, C), lambda b: (b, 0, 0, 0)),
        compiler_params=_cparams(1),
    ))


@functools.lru_cache(maxsize=None)
def _build_cca(B, H, W, C, Cr, with_res, odt):
    kern = functools.partial(_cca_kernel, with_residual=with_res)
    in_specs = [pl.BlockSpec((1, H, W, C), lambda b: (b, 0, 0, 0))]
    if with_res:
        in_specs.append(pl.BlockSpec((1, H, W, C), lambda b: (b, 0, 0, 0)))
    in_specs += [_full_spec((C, Cr)), _full_spec((1, Cr)),
                 _full_spec((Cr, C)), _full_spec((1, C))]
    return jax.jit(pl.pallas_call(
        kern,
        out_shape=jax.ShapeDtypeStruct((B, H, W, C), odt),
        grid=(B,),
        in_specs=in_specs,
        out_specs=pl.BlockSpec((1, H, W, C), lambda b: (b, 0, 0, 0)),
        compiler_params=_cparams(1),
    ))


@functools.lru_cache(maxsize=None)
def _build_elt(fn, n_in, rows, lane, rb, odt_name):
    kern = functools.partial(_elt_kernel, fn=fn)
    return jax.jit(pl.pallas_call(
        kern,
        out_shape=jax.ShapeDtypeStruct((rows, lane), jnp.dtype(odt_name)),
        grid=(rows // rb,),
        in_specs=[pl.BlockSpec((rb, lane), lambda i: (i, 0)) for _ in range(n_in)],
        out_specs=pl.BlockSpec((rb, lane), lambda i: (i, 0)),
        compiler_params=_cparams(1),
    ))


# ----------------------------------------------------------------------------
# op wrappers
# ----------------------------------------------------------------------------
def conv2d(x, p, *, padding=0, stride=1, act=None):
    """Dense conv on NHWC.  p = {'w': (KH*KW*Cin, Cout) bf16, 'b': (1, Cout) f32}."""
    w, b = p["w"], p["b"]
    B, H, W, Cin = x.shape
    k2 = w.shape[0] // Cin
    K = 1 if k2 == 1 else int(round(math.sqrt(k2)))
    Cout = w.shape[-1]
    x = x.astype(_ACT_DT)
    out = _build_conv(B, H, W, Cin, K, K, Cout, padding, act, _ACT_DT)(x, w, b)
    if stride > 1:
        # TODO(synk): compute only the strided rows/cols inside the kernel.
        out = out[:, ::stride, ::stride, :]
    return out


def block_apply(pp, x, add_residual=True):
    """Fused Block forward (prepared per-stage params).  Returns
    (stage_distill, gelu(block(x)+x)) when the stage-distill weights are fused
    in, else gelu(block(x))."""
    B, H, W, C = x.shape
    dc = C // 2
    with_distill = pp["s1_w"].shape[-1] == C + 2 * dc
    fn = _build_block(B, H, W, C, with_distill, add_residual, _ACT_DT)
    args = [x.astype(_ACT_DT),
            pp["s1_w"], pp["s1_b"], pp["dw1_w"], pp["dw1_b"],
            pp["s2_w"], pp["s2_b"], pp["dw2_w"], pp["dw2_b"],
            pp["s3_w"], pp["s3_b"], pp["dw3_w"], pp["dw3_b"],
            pp["pw4"], pp["dw4_w"], pp["dw4_b"],
            pp["c5_w"], pp["c5_b"]]
    return fn(*args)


def mconv1x1(xs, p, act=None):
    """Fused 1x1 conv over a channel-concat of `xs` (no HBM concat)."""
    B, H, W, _ = xs[0].shape
    splits = tuple(int(x.shape[-1]) for x in xs)
    Cout = p["w"].shape[-1]
    fn = _build_mconv1x1(B, H, W, splits, Cout, act, _ACT_DT)
    return fn(*[x.astype(_ACT_DT) for x in xs], p["w"], p["b"])


def esa_tail(p_conv4, x, c3, cf):
    B, H, W, C = x.shape
    Fc = c3.shape[-1]
    fn = _build_esa_tail(B, H, W, C, Fc, _ACT_DT)
    return fn(x.astype(_ACT_DT), c3.astype(_ACT_DT), cf.astype(_ACT_DT),
              p_conv4["w"], p_conv4["b"])


def cca_apply(pp, x, residual=None):
    B, H, W, C = x.shape
    Cr = pp["w1"].shape[1]
    fn = _build_cca(B, H, W, C, Cr, residual is not None, _ACT_DT)
    args = [x.astype(_ACT_DT)]
    if residual is not None:
        args.append(residual.astype(_ACT_DT))
    args += [pp["w1"], pp["b1"], pp["w2"], pp["b2"]]
    return fn(*args)


def eltwise(fn, *xs, out_dtype=None):
    """Fused elementwise op on a lane-dense (rows, L) slab, row-tiled grid."""
    shape = xs[0].shape
    if out_dtype is None:
        out_dtype = xs[0].dtype
    n = 1
    for s in shape:
        n *= int(s)
    if n % 128 == 0:
        lane = 128
        while n % (lane * 2) == 0 and lane < 2048:
            lane *= 2
        rows = n // lane
    else:
        lane, rows = n, 1
    rb = rows
    if rows >= 1024:
        for cand in (512, 256, 128, 64, 32, 16, 8):
            if rows % cand == 0:
                rb = cand
                break
    xs2 = [jnp.reshape(x, (rows, lane)) for x in xs]
    out = _build_elt(fn, len(xs), rows, lane, rb, jnp.dtype(out_dtype).name)(*xs2)
    return out.reshape(shape)


def esa_apply(pp, x):
    B, H, W, C = x.shape
    c1_ = conv2d(x, pp["conv1"])                                  # 1x1 nc->f
    c1 = conv2d(c1_, pp["conv2"], padding=0, stride=2)            # 3x3 s2 valid
    neg_inf = jnp.asarray(-jnp.inf, dtype=c1.dtype)
    v_max = lax.reduce_window(c1, neg_inf, lax.max,
                              (1, 7, 7, 1), (1, 3, 3, 1), "VALID")
    v_range = conv2d(v_max, pp["conv_max"], padding=1, act="relu")
    c3 = conv2d(v_range, pp["conv3"], padding=1, act="relu")
    c3 = conv2d(c3, pp["conv3_"], padding=1)
    c3 = jax.image.resize(c3, (B, H, W, c3.shape[-1]), method="bilinear")
    cf = conv2d(c1_, pp["conv_f"])                                # 1x1
    # fused: m = sigmoid(conv4(c3 + cf)); return x * m
    return esa_tail(pp["conv4"], x, c3, cf)


def susi0_apply(pp, x):
    ds = []
    r = x
    for st in pp["stages"]:
        d, r = block_apply(st, r, add_residual=True)
        ds.append(d)
    r = block_apply(pp["final"], r, add_residual=False)           # gelu(block(r))
    out = mconv1x1(ds + [r], pp["c5"])                            # fused concat+1x1
    out = esa_apply(pp["esa"], out)
    return cca_apply(pp["cca"], out, residual=x)                  # fused + input


def hlfa_apply(p, x_nchw, nc, scale):
    x = jnp.transpose(x_nchw, (0, 2, 3, 1)).astype(jnp.float32)   # -> NHWC
    B, H, W, c = x.shape
    # channel replication (torch: cat([x]*ceil(nc//c))) folded into the begin
    # conv weights at prepare time:  conv(cat([x]*r), W) == conv(x, sum_g W_g)
    x_ = conv2d(x, p["begin"], padding=1, act="gelu")

    fea1 = conv2d(susi0_apply(p["feature"], x_), p["v1"])
    fea2 = conv2d(susi0_apply(p["feature"], fea1), p["v2"])
    fea3 = conv2d(susi0_apply(p["feature"], fea2), p["v3"])

    out = mconv1x1([fea3, fea2, fea1], p["merge"])                # fused concat+1x1
    out = esa_apply(p["esa"], out)
    out = cca_apply(p["cca"], out)

    def up_nearest(t, s):
        return jnp.repeat(jnp.repeat(t, s, axis=1), s, axis=2)

    if scale in (2, 3):
        fea = conv2d(up_nearest(out, scale), p["upconv1"], padding=1)
        fea = conv2d(fea, p["HRconv1"], padding=1, act="lrelu")
    elif scale == 4:
        fea = conv2d(up_nearest(out, 2), p["upconv1"], padding=1)
        fea = conv2d(fea, p["HRconv1"], padding=1, act="lrelu")
        fea = conv2d(up_nearest(fea, 2), p["upconv2"], padding=1)
        fea = conv2d(fea, p["HRconv2"], padding=1, act="lrelu")
    else:
        raise ValueError("scale must be 2, 3 or 4")

    out = conv2d(fea, p["conv_last"], padding=1)
    ILR = jax.image.resize(x, (B, H * scale, W * scale, c), method="bilinear")
    out = eltwise(_f_add, out, ILR, out_dtype=jnp.float32)
    return jnp.transpose(out, (0, 3, 1, 2))                       # -> NCHW


# ----------------------------------------------------------------------------
# deterministic parameter init (synthetic f32 weights, shapes from __init__)
# ----------------------------------------------------------------------------
class ParamGen:
    def __init__(self, seed=0):
        self._key = jax.random.PRNGKey(seed)

    def _next(self):
        self._key, k = jax.random.split(self._key)
        return k

    def conv(self, k, cin, cout):
        w = jax.random.normal(self._next(), (k, k, cin, cout),
                              jnp.float32) / math.sqrt(k * k * cin)
        b = jax.random.normal(self._next(), (1, cout), jnp.float32) * 0.01
        return {"w": w, "b": b}

    def dense(self, cin, cout):
        w = jax.random.normal(self._next(), (cin, cout),
                              jnp.float32) / math.sqrt(cin)
        b = jax.random.normal(self._next(), (1, cout), jnp.float32) * 0.01
        return {"w": w, "b": b}

    def bsconv(self, cin, cout, k=3):
        pw = jax.random.normal(self._next(), (cin, cout),
                               jnp.float32) / math.sqrt(cin)
        dw_w = jax.random.normal(self._next(), (k, k, cout),
                                 jnp.float32) / math.sqrt(k * k)
        dw_b = jax.random.normal(self._next(), (1, cout), jnp.float32) * 0.01
        return {"pw": pw, "dw_w": dw_w, "dw_b": dw_b}


def init_block(pg, nc):
    dc = nc // 2
    # NOTE: r-branch convs emit nc channels (see header TODO re: f).
    return {"c1_d": pg.dense(nc, dc), "c2_d": pg.dense(nc, dc),
            "c3_d": pg.dense(nc, dc),
            "c1_r": pg.bsconv(nc, nc), "c2_r": pg.bsconv(nc, nc),
            "c3_r": pg.bsconv(nc, nc), "c4": pg.bsconv(nc, nc),
            "c5": pg.dense(3 * dc + nc, nc)}


def init_esa(pg, nc):
    f = nc // 4
    return {"conv1": pg.conv(1, nc, f), "conv_f": pg.conv(1, f, f),
            "conv_max": pg.conv(3, f, f), "conv2": pg.conv(3, f, f),
            "conv3": pg.conv(3, f, f), "conv3_": pg.conv(3, f, f),
            "conv4": pg.conv(1, f, nc)}


def init_cca(pg, nc, reduction=16):
    cr = max(1, nc // reduction)
    return {"w1": jax.random.normal(pg._next(), (nc, cr), jnp.float32) / math.sqrt(nc),
            "b1": jax.random.normal(pg._next(), (1, cr), jnp.float32) * 0.01,
            "w2": jax.random.normal(pg._next(), (cr, nc), jnp.float32) / math.sqrt(cr),
            "b2": jax.random.normal(pg._next(), (1, nc), jnp.float32) * 0.01}


def init_susi0(pg, nc):
    dc = nc // 2
    return {"c1_d": pg.dense(nc, dc), "c2_d": pg.dense(nc, dc),
            "c3_d": pg.dense(nc, dc), "c4_d": pg.dense(nc, dc),
            "c5_d": pg.dense(nc, dc), "c6_d": pg.dense(nc, dc),
            "c1_r": init_block(pg, nc), "c2_r": init_block(pg, nc),
            "c3_r": init_block(pg, nc), "c4": init_block(pg, nc),
            "c5": pg.conv(1, 6 * dc + nc, nc),
            "esa": init_esa(pg, nc), "cca": init_cca(pg, nc)}


def init_hlfa(pg, nc, scale):
    p = {"begin": pg.conv(3, 63, nc),
         "feature": init_susi0(pg, nc),
         "v1": pg.conv(1, nc, nc), "v2": pg.conv(1, nc, nc),
         "v3": pg.conv(1, nc, nc),
         "merge": pg.conv(1, 3 * nc, nc),
         "esa": init_esa(pg, nc), "cca": init_cca(pg, nc),
         "upconv1": pg.conv(3, nc, nc // 2),
         "HRconv1": pg.conv(3, nc // 2, nc // 2),
         "conv_last": pg.conv(3, nc // 2, 3)}
    if scale == 4:
        p["upconv2"] = pg.conv(3, nc // 2, nc // 2)
        p["HRconv2"] = pg.conv(3, nc // 2, nc // 2)
    return p


# ----------------------------------------------------------------------------
# one-time parameter preparation (bf16 casts, im2col weight reshapes,
# per-stage merged block weights, begin-conv replication fold)
# ----------------------------------------------------------------------------
def _prep_conv(p):
    w, b = p["w"], p["b"]
    KH, KW, Cin, Cout = w.shape
    return {"w": w.reshape(KH * KW * Cin, Cout).astype(_ACT_DT),
            "b": b.astype(jnp.float32)}


def _prep_begin(p, c_in):
    w, b = p["w"], p["b"]                     # (3, 3, 63, nc)
    KH, KW, Cin63, Cout = w.shape
    reps = Cin63 // c_in                      # matches torch ceil(nc // c) replicas
    w_fold = w.reshape(KH, KW, reps, c_in, Cout).sum(axis=2)
    return {"w": w_fold.reshape(KH * KW * c_in, Cout).astype(_ACT_DT),
            "b": b.astype(jnp.float32)}


def _prep_block_stage(pb, sd=None):
    C = pb["c1_r"]["pw"].shape[0]
    zeros_b = jnp.zeros((1, C), jnp.float32)

    def merged(pw, d, extra=None):
        ws = [pw, d["w"]] + ([extra["w"]] if extra is not None else [])
        bs = [zeros_b, d["b"]] + ([extra["b"]] if extra is not None else [])
        return (jnp.concatenate(ws, axis=1).astype(_ACT_DT),
                jnp.concatenate(bs, axis=1).astype(jnp.float32))

    s1w, s1b = merged(pb["c1_r"]["pw"], pb["c1_d"], sd)
    s2w, s2b = merged(pb["c2_r"]["pw"], pb["c2_d"])
    s3w, s3b = merged(pb["c3_r"]["pw"], pb["c3_d"])
    return {"s1_w": s1w, "s1_b": s1b,
            "dw1_w": pb["c1_r"]["dw_w"].astype(jnp.float32),
            "dw1_b": pb["c1_r"]["dw_b"].astype(jnp.float32),
            "s2_w": s2w, "s2_b": s2b,
            "dw2_w": pb["c2_r"]["dw_w"].astype(jnp.float32),
            "dw2_b": pb["c2_r"]["dw_b"].astype(jnp.float32),
            "s3_w": s3w, "s3_b": s3b,
            "dw3_w": pb["c3_r"]["dw_w"].astype(jnp.float32),
            "dw3_b": pb["c3_r"]["dw_b"].astype(jnp.float32),
            "pw4": pb["c4"]["pw"].astype(_ACT_DT),
            "dw4_w": pb["c4"]["dw_w"].astype(jnp.float32),
            "dw4_b": pb["c4"]["dw_b"].astype(jnp.float32),
            "c5_w": pb["c5"]["w"].astype(_ACT_DT),
            "c5_b": pb["c5"]["b"].astype(jnp.float32)}


def _prep_esa(pe):
    return {k: _prep_conv(pe[k]) for k in
            ("conv1", "conv_f", "conv_max", "conv2", "conv3", "conv3_", "conv4")}


def _prep_cca(pc):
    return {k: pc[k].astype(jnp.float32) for k in ("w1", "b1", "w2", "b2")}


def _prep_susi0(ps):
    stages = [_prep_block_stage(ps["c1_r"], ps["c1_d"]),
              _prep_block_stage(ps["c2_r"], ps["c2_d"]),
              _prep_block_stage(ps["c3_r"], ps["c3_d"]),
              _prep_block_stage(ps["c1_r"], ps["c4_d"]),   # weight reuse (ref.)
              _prep_block_stage(ps["c2_r"], ps["c5_d"]),
              _prep_block_stage(ps["c3_r"], ps["c6_d"])]
    return {"stages": stages,
            "final": _prep_block_stage(ps["c4"], None),
            "c5": _prep_conv(ps["c5"]),
            "esa": _prep_esa(ps["esa"]),
            "cca": _prep_cca(ps["cca"])}


def prepare_params(p, in_channels=3):
    out = {"begin": _prep_begin(p["begin"], in_channels),
           "feature": _prep_susi0(p["feature"]),
           "v1": _prep_conv(p["v1"]), "v2": _prep_conv(p["v2"]),
           "v3": _prep_conv(p["v3"]),
           "merge": _prep_conv(p["merge"]),
           "esa": _prep_esa(p["esa"]), "cca": _prep_cca(p["cca"]),
           "upconv1": _prep_conv(p["upconv1"]),
           "HRconv1": _prep_conv(p["HRconv1"]),
           "conv_last": _prep_conv(p["conv_last"])}
    if "upconv2" in p:
        out["upconv2"] = _prep_conv(p["upconv2"])
        out["HRconv2"] = _prep_conv(p["HRconv2"])
    return out


# ----------------------------------------------------------------------------
if __name__ == "__main__":
    NC, SCALE, ALPHA = 64, 2, 0.5      # ALPHA unused in forward (as in torch)
    pg = ParamGen(seed=0)
    raw_params = init_hlfa(pg, NC, SCALE)
    params = prepare_params(raw_params, in_channels=3)

    key = jax.random.PRNGKey(0)
    x = jax.random.normal(key, (2, 3, 16, 16), jnp.float32)   # NCHW like torch

    out = hlfa_apply(params, x, NC, SCALE)
    out = jax.block_until_ready(out)
    assert out.shape == (2, 3, 16 * SCALE, 16 * SCALE), out.shape
    assert bool(jnp.all(jnp.isfinite(out)))
    print("KERNEL_OK")
</pallas_src>

<mosaic_0001>
module attributes {stable_mosaic.version = 11 : i64} {
  func.func @_conv_kernel(%arg0: i32, %arg1: memref<1x16x16x3xbf16, #tpu.memory_space<vmem>>, %arg2: memref<27x64xbf16, #tpu.memory_space<vmem>>, %arg3: memref<1x64xf32, #tpu.memory_space<vmem>>, %arg4: memref<1x16x16x64xbf16, #tpu.memory_space<vmem>>, %arg5: memref<18x18x3xbf16, #tpu.memory_space<vmem>>, %arg6: memref<16x16x27xbf16, #tpu.memory_space<vmem>>) attributes {dimension_semantics = [#tpu.dimension_semantics<parallel>], iteration_bounds = array<i64: 2>, scalar_prefetch = 0 : i64, scratch_operands = 2 : i64, tpu.core_type = #tpu.core_type<tc>, window_params = [{transform_indices = @transform_0, window_bounds = array<i64: 1, 16, 16, 3>}, {pipeline_mode = #tpu.pipeline_mode<synchronous>, transform_indices = @transform_1, window_bounds = array<i64: 27, 64>}, {pipeline_mode = #tpu.pipeline_mode<synchronous>, transform_indices = @transform_2, window_bounds = array<i64: 1, 64>}, {transform_indices = @transform_3, window_bounds = array<i64: 1, 16, 16, 64>}]} {
    %c0 = arith.constant 0 : index
    %c0_0 = arith.constant 0 : index
    %c0_1 = arith.constant 0 : index
    %c0_2 = arith.constant 0 : index
    %0 = vector.load %arg1[%c0, %c0_0, %c0_1, %c0_2] : memref<1x16x16x3xbf16, #tpu.memory_space<vmem>>, vector<1x16x16x3xbf16>
    %1 = vector.shape_cast %0 : vector<1x16x16x3xbf16> to vector<16x16x3xbf16>
    %cst = arith.constant 0.000000e+00 : bf16
    %2 = vector.broadcast %cst : bf16 to vector<1x18x3xbf16>
    %cst_3 = arith.constant 0.000000e+00 : bf16
    %3 = vector.broadcast %cst_3 : bf16 to vector<18x1x3xbf16>
    %c0_4 = arith.constant 0 : index
    %c0_5 = arith.constant 0 : index
    %c0_6 = arith.constant 0 : index
    %4 = vector.load %arg5[%c0_4, %c0_5, %c0_6] : memref<18x18x3xbf16, #tpu.memory_space<vmem>>, vector<1x18x3xbf16>
    tpu.vector_store %arg5[%c0_4, %c0_5, %c0_6], %2 {strides = array<i32>} : memref<18x18x3xbf16, #tpu.memory_space<vmem>>, vector<1x18x3xbf16>,
    %c17 = arith.constant 17 : index
    %c0_7 = arith.constant 0 : index
    %c0_8 = arith.constant 0 : index
    %5 = vector.load %arg5[%c17, %c0_7, %c0_8] : memref<18x18x3xbf16, #tpu.memory_space<vmem>>, vector<1x18x3xbf16>
    tpu.vector_store %arg5[%c17, %c0_7, %c0_8], %2 {strides = array<i32>} : memref<18x18x3xbf16, #tpu.memory_space<vmem>>, vector<1x18x3xbf16>,
    %c0_9 = arith.constant 0 : index
    %c0_10 = arith.constant 0 : index
    %c0_11 = arith.constant 0 : index
    %6 = vector.load %arg5[%c0_9, %c0_10, %c0_11] : memref<18x18x3xbf16, #tpu.memory_space<vmem>>, vector<18x1x3xbf16>
    tpu.vector_store %arg5[%c0_9, %c0_10, %c0_11], %3 {strides = array<i32>} : memref<18x18x3xbf16, #tpu.memory_space<vmem>>, vector<18x1x3xbf16>,
    %c0_12 = arith.constant 0 : index
    %c17_13 = arith.constant 17 : index
    %c0_14 = arith.constant 0 : index
    %7 = vector.load %arg5[%c0_12, %c17_13, %c0_14] : memref<18x18x3xbf16, #tpu.memory_space<vmem>>, vector<18x1x3xbf16>
    tpu.vector_store %arg5[%c0_12, %c17_13, %c0_14], %3 {strides = array<i32>} : memref<18x18x3xbf16, #tpu.memory_space<vmem>>, vector<18x1x3xbf16>,
    %c1 = arith.constant 1 : index
    %c1_15 = arith.constant 1 : index
    %c0_16 = arith.constant 0 : index
    %8 = vector.load %arg5[%c1, %c1_15, %c0_16] : memref<18x18x3xbf16, #tpu.memory_space<vmem>>, vector<16x16x3xbf16>
    tpu.vector_store %arg5[%c1, %c1_15, %c0_16], %1 {strides = array<i32>} : memref<18x18x3xbf16, #tpu.memory_space<vmem>>, vector<16x16x3xbf16>,
    %c0_17 = arith.constant 0 : index
    %c0_18 = arith.constant 0 : index
    %c0_19 = arith.constant 0 : index
    %9 = vector.load %arg5[%c0_17, %c0_18, %c0_19] : memref<18x18x3xbf16, #tpu.memory_space<vmem>>, vector<18x18x3xbf16>
    %10 = vector.extract_strided_slice %9 {offsets = [0, 0, 0], sizes = [16, 16, 3], strides = [1, 1, 1]} : vector<18x18x3xbf16> to vector<16x16x3xbf16>
    %c0_20 = arith.constant 0 : index
    %c0_21 = arith.constant 0 : index
    %c0_22 = arith.constant 0 : index
    %11 = vector.load %arg6[%c0_20, %c0_21, %c0_22] : memref<16x16x27xbf16, #tpu.memory_space<vmem>>, vector<16x16x3xbf16>
    tpu.vector_store %arg6[%c0_20, %c0_21, %c0_22], %10 {strides = array<i32>} : memref<16x16x27xbf16, #tpu.memory_space<vmem>>, vector<16x16x3xbf16>,
    %12 = vector.extract_strided_slice %9 {offsets = [0, 1, 0], sizes = [16, 16, 3], strides = [1, 1, 1]} : vector<18x18x3xbf16> to vector<16x16x3xbf16>
    %c0_23 = arith.constant 0 : index
    %c0_24 = arith.constant 0 : index
    %c3 = arith.constant 3 : index
    %13 = vector.load %arg6[%c0_23, %c0_24, %c3] : memref<16x16x27xbf16, #tpu.memory_space<vmem>>, vector<16x16x3xbf16>
    tpu.vector_store %arg6[%c0_23, %c0_24, %c3], %12 {strides = array<i32>} : memref<16x16x27xbf16, #tpu.memory_space<vmem>>, vector<16x16x3xbf16>,
    %14 = vector.extract_strided_slice %9 {offsets = [0, 2, 0], sizes = [16, 16, 3], strides = [1, 1, 1]} : vector<18x18x3xbf16> to vector<16x16x3xbf16>
    %c0_25 = arith.constant 0 : index
    %c0_26 = arith.constant 0 : index
    %c6 = arith.constant 6 : index
    %15 = vector.load %arg6[%c0_25, %c0_26, %c6] : memref<16x16x27xbf16, #tpu.memory_space<vmem>>, vector<16x16x3xbf16>
    tpu.vector_store %arg6[%c0_25, %c0_26, %c6], %14 {strides = array<i32>} : memref<16x16x27xbf16, #tpu.memory_space<vmem>>, vector<16x16x3xbf16>,
    %16 = vector.extract_strided_slice %9 {offsets = [1, 0, 0], sizes = [16, 16, 3], strides = [1, 1, 1]} : vector<18x18x3xbf16> to vector<16x16x3xbf16>
    %c0_27 = arith.constant 0 : index
    %c0_28 = arith.constant 0 : index
    %c9 = arith.constant 9 : index
    %17 = vector.load %arg6[%c0_27, %c0_28, %c9] : memref<16x16x27xbf16, #tpu.memory_space<vmem>>, vector<16x16x3xbf16>
    tpu.vector_store %arg6[%c0_27, %c0_28, %c9], %16 {strides = array<i32>} : memref<16x16x27xbf16, #tpu.memory_space<vmem>>, vector<16x16x3xbf16>,
    %18 = vector.extract_strided_slice %9 {offsets = [1, 1, 0], sizes = [16, 16, 3], strides = [1, 1, 1]} : vector<18x18x3xbf16> to vector<16x16x3xbf16>
    %c0_29 = arith.constant 0 : index
    %c0_30 = arith.constant 0 : index
    %c12 = arith.constant 12 : index
    %19 = vector.load %arg6[%c0_29, %c0_30, %c12] : memref<16x16x27xbf16, #tpu.memory_space<vmem>>, vector<16x16x3xbf16>
    tpu.vector_store %arg6[%c0_29, %c0_30, %c12], %18 {strides = array<i32>} : memref<16x16x27xbf16, #tpu.memory_space<vmem>>, vector<16x16x3xbf16>,
    %20 = vector.extract_strided_slice %9 {offsets = [1, 2, 0], sizes = [16, 16, 3], strides = [1, 1, 1]} : vector<18x18x3xbf16> to vector<16x16x3xbf16>
    %c0_31 = arith.constant 0 : index
    %c0_32 = arith.constant 0 : index
    %c15 = arith.constant 15 : index
    %21 = vector.load %arg6[%c0_31, %c0_32, %c15] : memref<16x16x27xbf16, #tpu.memory_space<vmem>>, vector<16x16x3xbf16>
    tpu.vector_store %arg6[%c0_31, %c0_32, %c15], %20 {strides = array<i32>} : memref<16x16x27xbf16, #tpu.memory_space<vmem>>, vector<16x16x3xbf16>,
    %22 = vector.extract_strided_slice %9 {offsets = [2, 0, 0], sizes = [16, 16, 3], strides = [1, 1, 1]} : vector<18x18x3xbf16> to vector<16x16x3xbf16>
    %c0_33 = arith.constant 0 : index
    %c0_34 = arith.constant 0 : index
    %c18 = arith.constant 18 : index
    %23 = vector.load %arg6[%c0_33, %c0_34, %c18] : memref<16x16x27xbf16, #tpu.memory_space<vmem>>, vector<16x16x3xbf16>
    tpu.vector_store %arg6[%c0_33, %c0_34, %c18], %22 {strides = array<i32>} : memref<16x16x27xbf16, #tpu.memory_space<vmem>>, vector<16x16x3xbf16>,
    %24 = vector.extract_strided_slice %9 {offsets = [2, 1, 0], sizes = [16, 16, 3], strides = [1, 1, 1]} : vector<18x18x3xbf16> to vector<16x16x3xbf16>
    %c0_35 = arith.constant 0 : index
    %c0_36 = arith.constant 0 : index
    %c21 = arith.constant 21 : index
    %25 = vector.load %arg6[%c0_35, %c0_36, %c21] : memref<16x16x27xbf16, #tpu.memory_space<vmem>>, vector<16x16x3xbf16>
    tpu.vector_store %arg6[%c0_35, %c0_36, %c21], %24 {strides = array<i32>} : memref<16x16x27xbf16, #tpu.memory_space<vmem>>, vector<16x16x3xbf16>,
    %26 = vector.extract_strided_slice %9 {offsets = [2, 2, 0], sizes = [16, 16, 3], strides = [1, 1, 1]} : vector<18x18x3xbf16> to vector<16x16x3xbf16>
    %c0_37 = arith.constant 0 : index
    %c0_38 = arith.constant 0 : index
    %c24 = arith.constant 24 : index
    %27 = vector.load %arg6[%c0_37, %c0_38, %c24] : memref<16x16x27xbf16, #tpu.memory_space<vmem>>, vector<16x16x3xbf16>
    tpu.vector_store %arg6[%c0_37, %c0_38, %c24], %26 {strides = array<i32>} : memref<16x16x27xbf16, #tpu.memory_space<vmem>>, vector<16x16x3xbf16>,
    %c0_39 = arith.constant 0 : index
    %c0_40 = arith.constant 0 : index
    %c0_41 = arith.constant 0 : index
    %28 = vector.load %arg6[%c0_39, %c0_40, %c0_41] : memref<16x16x27xbf16, #tpu.memory_space<vmem>>, vector<16x16x27xbf16>
    %29 = vector.shape_cast %28 : vector<16x16x27xbf16> to vector<256x27xbf16>
    %c0_42 = arith.constant 0 : index
    %c0_43 = arith.constant 0 : index
    %30 = vector.load %arg2[%c0_42, %c0_43] : memref<27x64xbf16, #tpu.memory_space<vmem>>, vector<27x64xbf16>
    %cst_44 = arith.constant dense<0.000000e+00> : vector<256x64xf32>
    %31 = tpu.matmul %29, %30, %cst_44 {dimension_numbers = #tpu.dot_dimension_numbers<[1], [0], [0], [1], [0, 0, 1, 1], [], []>} : vector<256x27xbf16>, vector<27x64xbf16>, vector<256x64xf32> -> vector<256x64xf32>
    %c0_45 = arith.constant 0 : index
    %c0_46 = arith.constant 0 : index
    %32 = vector.load %arg3[%c0_45, %c0_46] : memref<1x64xf32, #tpu.memory_space<vmem>>, vector<1x64xf32>
    %33 = vector.broadcast %32 : vector<1x64xf32> to vector<256x64xf32>
    %34 = arith.addf %31, %33 : vector<256x64xf32>
    %35 = arith.mulf %34, %34 : vector<256x64xf32>
    %36 = arith.mulf %34, %35 : vector<256x64xf32>
    %cst_47 = arith.constant 4.471500e-02 : f32
    %37 = vector.broadcast %cst_47 : f32 to vector<256x64xf32>
    %38 = arith.mulf %37, %36 : vector<256x64xf32>
    %39 = arith.addf %34, %38 : vector<256x64xf32>
    %cst_48 = arith.constant 0.797884583 : f32
    %40 = vector.broadcast %cst_48 : f32 to vector<256x64xf32>
    %41 = arith.mulf %40, %39 : vector<256x64xf32>
    %42 = math.tanh %41 : vector<256x64xf32>
    %cst_49 = arith.constant 1.000000e+00 : f32
    %43 = vector.broadcast %cst_49 : f32 to vector<256x64xf32>
    %44 = arith.addf %43, %42 : vector<256x64xf32>
    %cst_50 = arith.constant 5.000000e-01 : f32
    %45 = vector.broadcast %cst_50 : f32 to vector<256x64xf32>
    %46 = arith.mulf %45, %44 : vector<256x64xf32>
    %47 = arith.mulf %34, %46 : vector<256x64xf32>
    %48 = vector.shape_cast %47 : vector<256x64xf32> to vector<16x16x64xf32>
    %49 = arith.truncf %48 : vector<16x16x64xf32> to vector<16x16x64xbf16>
    %c0_51 = arith.constant 0 : index
    %c0_52 = arith.constant 0 : index
    %c0_53 = arith.constant 0 : index
    %c0_54 = arith.constant 0 : index
    %50 = vector.load %arg4[%c0_51, %c0_52, %c0_53, %c0_54] : memref<1x16x16x64xbf16, #tpu.memory_space<vmem>>, vector<1x16x16x64xbf16>
    %51 = vector.shape_cast %50 : vector<1x16x16x64xbf16> to vector<16x16x64xbf16>
    %52 = vector.shape_cast %49 : vector<16x16x64xbf16> to vector<1x16x16x64xbf16>
    tpu.vector_store %arg4[%c0_51, %c0_52, %c0_53, %c0_54], %52 {strides = array<i32>} : memref<1x16x16x64xbf16, #tpu.memory_space<vmem>>, vector<1x16x16x64xbf16>,
    return
  }
  func.func @transform_0(%arg0: i32) -> (i32, i32, i32, i32) {
    %c0_i32 = arith.constant 0 : i32
    %c0_i32_0 = arith.constant 0 : i32
    %c0_i32_1 = arith.constant 0 : i32
    %c0_i32_2 = arith.constant 0 : i32
    return %arg0, %c0_i32, %c0_i32_0, %c0_i32_1 : i32, i32, i32, i32
  }
  func.func @transform_1(%arg0: i32) -> (i32, i32) {
    %c0_i32 = arith.constant 0 : i32
    %c0_i32_0 = arith.constant 0 : i32
    %c0_i32_1 = arith.constant 0 : i32
    return %c0_i32, %c0_i32_0 : i32, i32
  }
  func.func @transform_2(%arg0: i32) -> (i32, i32) {
    %c0_i32 = arith.constant 0 : i32
    %c0_i32_0 = arith.constant 0 : i32
    %c0_i32_1 = arith.constant 0 : i32
    return %c0_i32, %c0_i32_0 : i32, i32
  }
  func.func @transform_3(%arg0: i32) -> (i32, i32, i32, i32) {
    %c0_i32 = arith.constant 0 : i32
    %c0_i32_0 = arith.constant 0 : i32
    %c0_i32_1 = arith.constant 0 : i32
    %c0_i32_2 = arith.constant 0 : i32
    return %arg0, %c0_i32, %c0_i32_0, %c0_i32_1 : i32, i32, i32, i32
  }
}

</mosaic_0001>

<bundles_post_ra>
// kernel: tpu_custom_call.1
= control target key start
LH: loop header
LB: loop body
LE: loop exit
PB: predicated region body
PF: predicated region fallthrough
CT: control target
= control target key end

     0   :  { %8 = vsyncpa [#allocation5], 0  ;;  %s5899_s0 = inlined_call_operand.vmem [shape: bf16[2,16,16,3], index: 0, kind: input, shape index: {}]   ;;  %s5900_s1 = inlined_call_operand.vmem [shape: bf16[27,64], index: 1, kind: input, shape index: {}]   ;;  %s5901_s2 = inlined_call_operand.vmem [shape: f32[1,64], index: 2, kind: input, shape index: {}]   ;;  %s5902_s3 = inlined_call_operand.hbm [shape: bf16[2,16,16,64], index: 3, kind: output, shape index: {}]  }
   0x1   :  { %10 = vsyncpa [#allocation5 + $0x1], 0  ;;  %s3796_s12 = smov 0   ;;  %s3798_s13 = smov 0  }
   0x2   :  { %s3800_s14 = smov 0   ;;  %s3802_s15 = smov 0  }
   0x3 LB: > { %s3817_s16 = sadd.s32 4294967295, %s3761_s15   ;;  %s3373_s17 = sadd.s32 4294967294, %s3761_s15   ;;  %s3761_s15 = sphi %s3802_s15, %s6085_s15   ;;  %s3757_s14 = sphi %s3800_s14, %s6084_s14   ;;  %s3753_s13 = sphi %s3798_s13, %s6083_s13   ;;  %s3749_s12 = sphi %s3796_s12, %s6082_s12  }
   0x4   : > { %s3821_s18 = sadd.s32 1, %s3761_s15   ;;  %s91_s19 = sadd.s32 1, %s3757_s14 }
   0x5   : > { %s88_s20 = ssub.s32 %s3761_s15, %s3821_s18  ;;  %p101_p0 = scmp.ne.s32.totalorder %s3757_s14, %s3753_s13 }
   0x6   : > { %p89_p1 = scmp.eq.s32.totalorder %s88_s20, 0  ;;  %p102_p2 = scmp.eq.s32.totalorder %s3817_s16, 1 }
   0x7   : > { %p107_p3 = scmp.ne.s32.totalorder %s3753_s13, %s3749_s12  ;;  %p108_p4 = scmp.eq.s32.totalorder %s3373_s17, 1 }
   0x8   : > { %s3832_s21 = scalar_select %p89_p1, %s3757_s14, %s91_s19  }
   0x9   : > { %p3834_p5 = por %p102_p2, %p101_p0  ;;  %p3838_p6 = por %p108_p4, %p107_p3 }
   0xa   : > { %p3376_p7 = scmp.ge.s32.totalorder %s3761_s15, 1  ;;  %p140_p8 = scmp.lt.s32.totalorder %s3761_s15, 3 }
   0xc   : > { %p141_p9 = pnand %p3376_p7, %p140_p8 }
   0xe   : > { %144 = sbr.rel (%p141_p9) target bundleno = 1011 (0x3f3), region = 32 }
  0x13   : > { %vm202_vm0 = vcmask 19456   ;;  %vm205_vm1 = vcmask 16384   ;;  %vm212_vm2 = vsmask.f32 256  ;;  %v3763_v0 = vmov 0   ;;  %p164_p10 = scmp.lt.s32.totalorder %s3817_s16, 1 }
  0x14   : > { %204 = vst.msk [vmem:[#allocation2 + $0x4] sm:$0xf] %vm202_vm0, %v3763_v0  ;;  %vm3846_vm3 = vmand %vm205_vm1, %vm212_vm2  ;;  %v5986_v1 = vmov 0  ;;  %vm268_vm4 = vsmask.f32 7938  ;;  %v5989_v2 = vmov 0 }
  0x15   : > { %206 = vst.msk [vmem:[#allocation2 + $0x8] sm:$0x1] %vm205_vm1, %v3763_v0  ;;  %v5987_v1 = vsel %vm3846_vm3, 4294967295, %v5986_v1  ;;  %210 = vst.msk [vmem:[#allocation2 + $0xd4] sm:$0x1] %vm205_vm1, %v3763_v0  ;;  %s165_s24 = scalar_select %p164_p10, %s3817_s16, 1 }
  0x16   : > { %5988 = vst [vmem:[#allocation7_spill] sm:$0xff] %v5987_v1  ;;  %203 = vst.msk [vmem:[#allocation2] sm:$0xf] %vm202_vm0, %v3763_v0  ;;  %v217_v3 = vld [vmem:[#allocation2 + $0xc] sm:$0x1]  ;;  %v5992_v39 = vmov 0 }
  0x17   : > { %208 = vst.msk [vmem:[#allocation2 + $0xcc] sm:$0xf] %vm202_vm0, %v3763_v0  ;;  %209 = vst.msk [vmem:[#allocation2 + $0xd0] sm:$0xf] %vm202_vm0, %v3763_v0  ;;  %v218_v4 = vsel %vm3846_vm3, 0, %v217_v3  ;;  %s3470_s25 = sshll.u32 %s165_s24, 7 }
  0x18   : > { %vm3854_vm5 = vmand %vm205_vm1, %vm268_vm4  ;;  %v220_v5 = vld [vmem:[#allocation2 + $0x18] sm:$0x1]  ;;  %v273_v6 = vld [vmem:[#allocation2 + $0x14] sm:$0x1]  ;;  %219 = vst [vmem:[#allocation2 + $0xc] sm:$0x1] %v218_v4  ;;  %s3875_s28 = scalar_lea.vmem %s5899_s0, %s3470_s25 }
  0x19   : > { %v5990_v2 = vsel %vm3854_vm5, 4294967295, %v5989_v2  ;;  %v221_v7 = vsel %vm3846_vm3, 0, %v220_v5  ;;  %v274_v8 = vsel %vm3854_vm5, 0, %v273_v6  ;;  %v223_v9 = vld [vmem:[#allocation2 + $0x24] sm:$0x1]  ;;  %vm3899_vm9 = vmand %vm202_vm0, %vm268_vm4  ;;  %v5995_v45 = vmov 0 }
  0x1a   : > { %5991 = vst [vmem:[#allocation8_spill] sm:$0xff] %v5990_v2  ;;  %222 = vst [vmem:[#allocation2 + $0x18] sm:$0x1] %v221_v7  ;;  %v224_v10 = vsel %vm3846_vm3, 0, %v223_v9  ;;  %v276_v11 = vld [vmem:[#allocation2 + $0x20] sm:$0x1] }
  0x1b   : > { %275 = vst [vmem:[#allocation2 + $0x14] sm:$0x1] %v274_v8  ;;  %v226_v12 = vld [vmem:[#allocation2 + $0x30] sm:$0x1]  ;;  %225 = vst [vmem:[#allocation2 + $0x24] sm:$0x1] %v224_v10 }
  0x1c   : > { %v277_v13 = vsel %vm3854_vm5, 0, %v276_v11  ;;  %v227_v14 = vsel %vm3846_vm3, 0, %v226_v12  ;;  %v279_v15 = vld [vmem:[#allocation2 + $0x2c] sm:$0x1]  ;;  %vm324_vm6 = vsmask.f32 4368 }
  0x1d   : > { %278 = vst [vmem:[#allocation2 + $0x20] sm:$0x1] %v277_v13  ;;  %228 = vst [vmem:[#allocation2 + $0x30] sm:$0x1] %v227_v14  ;;  %v280_v16 = vsel %vm3854_vm5, 0, %v279_v15  ;;  %v5993_v39 = vsel %vm3899_vm9, 4294967295, %v5992_v39 }
  0x1e   : > { %v229_v17 = vld [vmem:[#allocation2 + $0x3c] sm:$0x1]  ;;  %v270_v18 = vld [vmem:[#allocation2 + $0x8] sm:$0x1]  ;;  %v3879_v19 = vld [vmem:[#allocation2 + $0x4] sm:$0xf] }
  0x1f   : > { %vm847_vm7 = vsmask.f32 3328  ;;  %vm848_vm8 = vsmask.f32 7440  ;;  %v214_v20 = vld [vmem:[#allocation2] sm:$0x1]  ;;  %vm3906_vm10 = vmor %vm212_vm2, %vm324_vm6 }
  0x20   : > { %281 = vst [vmem:[#allocation2 + $0x2c] sm:$0x1] %v280_v16  ;;  %v271_v21 = vsel %vm3854_vm5, 0, %v270_v18  ;;  %v860_v22 = vshll.u32 %v3879_v19, 16  ;;  %v864_v23 = vshrl.u32 %v3879_v19, 16  ;;  %v215_v24 = vsel %vm3846_vm3, 0, %v214_v20  ;;  %vm3930_vm11 = vmor %vm847_vm7, %vm848_vm8 }
  0x21   : > { %816 = vst.msk [vmem:[#allocation3 + $0x4] sm:$0xf] %vm202_vm0, %v3879_v19  ;;  %v170_v25 = vld [vmem:[%s3875_s28] sm:$0xf]  ;;  %272 = vst [vmem:[#allocation2 + $0x8] sm:$0x1] %v271_v21 }
  0x22   : > { %216 = vst [vmem:[#allocation2] sm:$0x1] %v215_v24  ;;  %v171_v26 = vld [vmem:[%s3875_s28 + $0x4] sm:$0xf]  ;;  %v327_v27 = vshrl.u32 %v170_v25, 16  ;;  %v330_v28 = vshll.u32 %v170_v25, 16 }
  0x23   : > { %v172_v29 = vld [vmem:[%s3875_s28 + $0x8] sm:$0xf]  ;;  %v3892_v30 = vrot.slane %v860_v22, 5  ;;  %v866_v31 = vrot.slane %v864_v23, 4  ;;  %v335_v32 = vshrl.u32 %v171_v26, 16  ;;  %v338_v33 = vshll.u32 %v171_v26, 16 }
  0x24   : > { %v329_v34 = vrot.slane %v327_v27, 7  ;;  %v173_v35 = vld [vmem:[%s3875_s28 + $0xc] sm:$0xf]  ;;  %v344_v36 = vshrl.u32 %v172_v29, 16  ;;  %v347_v37 = vshll.u32 %v172_v29, 16  ;;  %v230_v38 = vsel %vm3846_vm3, 0, %v229_v17 }
  0x25   : > { %5994 = vst [vmem:[#allocation9_spill] sm:$0xff] %v5993_v39  ;;  %v867_v40 = vor.u32 %v866_v31, %v3892_v30  ;;  %v337_v41 = vrot.slane %v335_v32, 7  ;;  %v649_v42 = vld [vmem:[#allocation2 + $0xc] sm:$0xf]  ;;  %v352_v43 = vshrl.u32 %v173_v35, 16  ;;  %v355_v44 = vshll.u32 %v173_v35, 16 }
  0x26   : > { %231 = vst [vmem:[#allocation2 + $0x3c] sm:$0x1] %v230_v38  ;;  %v5996_v45 = vsel %vm3906_vm10, 4294967295, %v5995_v45  ;;  %v332_v46 = vor.u32 %v330_v28, %v329_v34  ;;  %v333_v47 = vrot.slane %v329_v34, 4  ;;  %v346_v48 = vrot.slane %v344_v36, 7  ;;  %s3764_s29 = smov 3  }
  0x27   : > { %5997 = vst [vmem:[#allocation10_spill] sm:$0xff] %v5996_v45  ;;  %v653_v49 = vld [vmem:[#allocation2 + $0x14] sm:$0x1]  ;;  %v174_v50 = vld [vmem:[%s3875_s28 + $0x10] sm:$0xf]  ;;  %v868_v51 = vrot.slane %v867_v40, 4  ;;  %v340_v52 = vor.u32 %v338_v33, %v337_v41 }
  0x28   : > { %v354_v53 = vrot.slane %v352_v43, 7  ;;  %v656_v54 = vld [vmem:[#allocation2 + $0x18] sm:$0xf]  ;;  %v342_v55 = vrot.slane %v337_v41, 4  ;;  %v650_v56 = vsel %vm3899_vm9, %v332_v46, %v649_v42  ;;  %v349_v57 = vor.u32 %v347_v37, %v346_v48  ;;  %v175_v59 = vld [vmem:[%s3875_s28 + $0x14] sm:$0xf] }
  0x29   : > { %v350_v58 = vrot.slane %v346_v48, 4  ;;  %v361_v60 = vshrl.u32 %v174_v50, 16  ;;  %v763_v61 = vld [vmem:[#allocation2 + $0x8] sm:$0x1]  ;;  %v3914_v62 = vld [vmem:[#allocation2] sm:$0xf]  ;;  %v341_v63 = vsel %vm3906_vm10, %v333_v47, %v340_v52 }
  0x2a   : > { %651 = vst [vmem:[#allocation2 + $0xc] sm:$0xf] %v650_v56  ;;  %v357_v0 = vor.u32 %v355_v44, %v354_v53  ;;  %v654_v3 = vsel %vm3846_vm3, %v342_v55, %v653_v49  ;;  %v364_v4 = vshll.u32 %v174_v50, 16  ;;  %v870_v5 = vshll.u32 %v763_v61, 16  ;;  %815 = vst.msk [vmem:[#allocation3] sm:$0xf] %vm202_vm0, %v3914_v62 }
  0x2b   : > { %v851_v6 = vshrl.u32 %v3914_v62, 16  ;;  %v854_v7 = vshll.u32 %v3914_v62, 16  ;;  %652 = vst.msk [vmem:[#allocation2 + $0x10] sm:$0xf] %vm202_vm0, %v341_v63  ;;  %v657_v8 = vsel %vm3899_vm9, %v349_v57, %v656_v54  ;;  %655 = vst [vmem:[#allocation2 + $0x14] sm:$0x1] %v654_v3 }
  0x2c   : > { %v663_v9 = vld [vmem:[#allocation2 + $0x24] sm:$0xf]  ;;  %v176_v10 = vld [vmem:[%s3875_s28 + $0x18] sm:$0xf]  ;;  %v5998_v11 = vmov 0  ;;  %v358_v12 = vsel %vm3906_vm10, %v350_v58, %v357_v0  ;;  %v363_v13 = vrot.slane %v361_v60, 7 }
  0x2d   : > { %v5999_v11 = vsel %vm3930_vm11, 4294967295, %v5998_v11  ;;  %658 = vst [vmem:[#allocation2 + $0x18] sm:$0xf] %v657_v8  ;;  %v369_v14 = vshrl.u32 %v175_v59, 16  ;;  %v372_v15 = vshll.u32 %v175_v59, 16  ;;  %v872_v17 = vrot.slane %v870_v5, 5 }
  0x2e   : > { %6000 = vst [vmem:[#allocation11_spill] sm:$0xff] %v5999_v11  ;;  %v660_v16 = vld [vmem:[#allocation2 + $0x20] sm:$0x1]  ;;  %v853_v18 = vrot.slane %v851_v6, 4  ;;  %v856_v20 = vrot.slane %v854_v7, 5  ;;  %v359_v21 = vrot.slane %v354_v53, 4  ;;  %v366_v23 = vor.u32 %v364_v4, %v363_v13 }
  0x2f   : > { %659 = vst.msk [vmem:[#allocation2 + $0x1c] sm:$0xf] %vm202_vm0, %v358_v12  ;;  %v3938_v22 = vld [vmem:[%s3875_s28 + $0x1c] sm:$0xf]  ;;  %v367_v24 = vrot.slane %v363_v13, 4  ;;  %v3940_v25 = vrot.slane %v369_v14, 7  ;;  %v873_v27 = vsel %vm3930_vm11, %v868_v51, %v872_v17 }
  0x30   : > { %v378_v26 = vshrl.u32 %v176_v10, 16  ;;  %v857_v28 = vor.u32 %v856_v20, %v853_v18  ;;  %v661_v29 = vsel %vm3846_vm3, %v359_v21, %v660_v16  ;;  %v381_v31 = vshll.u32 %v176_v10, 16  ;;  %v3947_v32 = vld [vmem:[%s3875_s28 + $0x20] sm:$0xf]  ;;  %1236 = vrot.lane.b32.xlu0 %v873_v27, %s3764_s29  ;;  %s3765_s30 = smov 6   ;;  %s3766_s4 = smov 9  }
  0x31   : > { %v374_v33 = vor.u32 %v372_v15, %v3940_v25  ;;  %v664_v34 = vsel %vm3899_vm9, %v366_v23, %v663_v9  ;;  %662 = vst [vmem:[#allocation2 + $0x20] sm:$0x1] %v661_v29  ;;  %v386_v36 = vshrl.u32 %v3938_v22, 16  ;;  %v3956_v38 = vld [vmem:[#allocation2 + $0xc] sm:$0xf]  ;;  %v389_v40 = vshll.u32 %v3938_v22, 16 }
  0x32   : > { %v3953_v35 = vrot.slane %v378_v26, 7  ;;  %v858_v37 = vrot.slane %v857_v28, 4  ;;  %665 = vst [vmem:[#allocation2 + $0x24] sm:$0xf] %v664_v34  ;;  %v376_v41 = vrot.slane %v3940_v25, 4  ;;  %v395_v42 = vshrl.u32 %v3947_v32, 16 }
  0x33   : > { %v3961_v43 = vld [vmem:[#allocation2 + $0x10] sm:$0xf]  ;;  %v875_v44 = vshrl.u32 %v3956_v38, 16  ;;  %v878_v46 = vshll.u32 %v3956_v38, 16  ;;  %817 = vst.msk [vmem:[#allocation3 + $0x8] sm:$0xf] %vm202_vm0, %v3956_v38  ;;  %v375_v48 = vsel %vm3906_vm10, %v367_v24, %v374_v33 }
  0x34   : > { %v766_v47 = vld [vmem:[#allocation2 + $0x14] sm:$0x1]  ;;  %v383_v49 = vor.u32 %v381_v31, %v3953_v35  ;;  %v863_v50 = vsel %vm3930_vm11, %v858_v37, %v3892_v30  ;;  %v884_v51 = vshll.u32 %v3961_v43, 16  ;;  %818 = vst.msk [vmem:[#allocation3 + $0xc] sm:$0xf] %vm202_vm0, %v3961_v43  ;;  %v888_v53 = vshrl.u32 %v3961_v43, 16 }
  0x35   : > { %v3976_v52 = vld [vmem:[#allocation2 + $0x18] sm:$0xf]  ;;  %v894_v54 = vshll.u32 %v766_v47, 16  ;;  %666 = vst.msk [vmem:[#allocation2 + $0x28] sm:$0xf] %vm202_vm0, %v375_v48  ;;  %1234 = vrot.lane.b32.xlu0 %v863_v50, %s3764_s29  ;;  %v877_v55 = vrot.slane %v875_v44, 4 }
  0x36   : > { %v880_v56 = vrot.slane %v878_v46, 5  ;;  %v3981_v57 = vld [vmem:[#allocation2 + $0x1c] sm:$0xf]  ;;  %v899_v30 = vshrl.u32 %v3976_v52, 16  ;;  %v902_v58 = vshll.u32 %v3976_v52, 16  ;;  %v886_v59 = vrot.slane %v884_v51, 5 }
  0x37   : > { %819 = vst.msk [vmem:[#allocation3 + $0x10] sm:$0xf] %vm202_vm0, %v3976_v52  ;;  %v908_v60 = vshll.u32 %v3981_v57, 16  ;;  %820 = vst.msk [vmem:[#allocation3 + $0x14] sm:$0xf] %vm202_vm0, %v3981_v57  ;;  %v890_v61 = vrot.slane %v888_v53, 4 }
  0x38   : > { %v896_v63 = vrot.slane %v894_v54, 5  ;;  %v881_v0 = vor.u32 %v880_v56, %v877_v55  ;;  %v901_v3 = vrot.slane %v899_v30, 4  ;;  %v904_v4 = vrot.slane %v902_v58, 5  ;;  %v769_v8 = vld [vmem:[#allocation2 + $0x20] sm:$0x1]  ;;  %s3767_s5 = smov 12  }
  0x39   : > { %v912_v5 = vshrl.u32 %v3981_v57, 16  ;;  %v910_v6 = vrot.slane %v908_v60, 5  ;;  %v891_v7 = vor.u32 %v890_v61, %v886_v59  ;;  %v384_v9 = vrot.slane %v3953_v35, 4  ;;  %v3994_v14 = vld [vmem:[#allocation2 + $0x24] sm:$0xf]  ;;  %s3768_s6 = smov 15  }
  0x3a   : > { %v3992_v10 = vrot.slane %v386_v36, 7  ;;  %v882_v12 = vrot.slane %v881_v0, 4  ;;  %v905_v13 = vor.u32 %v904_v4, %v901_v3  ;;  %v918_v16 = vshll.u32 %v769_v8, 16  ;;  %821 = vst.msk [vmem:[#allocation3 + $0x18] sm:$0xf] %vm202_vm0, %v3994_v14  ;;  %s3769_s7 = smov 18  }
  0x3b   : > { %v914_v15 = vrot.slane %v912_v5, 4  ;;  %v892_v17 = vrot.slane %v891_v7, 4  ;;  %v923_v18 = vshrl.u32 %v3994_v14, 16  ;;  %v926_v20 = vshll.u32 %v3994_v14, 16  ;;  %v670_v22 = vld [vmem:[#allocation2 + $0x30] sm:$0xf] }
  0x3c   : > { %v391_v21 = vor.u32 %v389_v40, %v3992_v10  ;;  %v4003_v23 = vsel %vm3930_vm11, %v882_v12, %v886_v59  ;;  %v906_v24 = vrot.slane %v905_v13, 4  ;;  %v4005_v26 = vld [vmem:[#allocation2 + $0x28] sm:$0xf]  ;;  %v920_v28 = vrot.slane %v918_v16, 5  ;;  %v667_v29 = vld [vmem:[#allocation2 + $0x2c] sm:$0x1] }
  0x3d   : > { %6001 = vst [vmem:[#allocation12_spill] sm:$0xff] %v4003_v23  ;;  %v915_v27 = vor.u32 %v914_v15, %v910_v6  ;;  %1238 = vrot.lane.b32.xlu1 %v4003_v23, %s3764_s29  ;;  %v4011_v31 = vsel %vm3930_vm11, %v892_v17, %v896_v63  ;;  %v925_v33 = vrot.slane %v923_v18, 4  ;;  %v928_v34 = vrot.slane %v926_v20, 5  ;;  %822 = vst.msk [vmem:[#allocation3 + $0x1c] sm:$0xf] %vm202_vm0, %v4005_v26  ;;  %s3770_s8 = smov 21  }
  0x3e   : > { %v932_v35 = vshll.u32 %v4005_v26, 16  ;;  %v179_v36 = vld [vmem:[%s3875_s28 + $0x24] sm:$0xf]  ;;  %v4019_v37 = vsel %vm3930_vm11, %v906_v24, %v910_v6  ;;  %v392_v44 = vsel %vm3906_vm10, %v384_v9, %v391_v21  ;;  %v671_v46 = vsel %vm3899_vm9, %v383_v49, %v670_v22  ;;  %v282_v47 = vld [vmem:[#allocation2 + $0x38] sm:$0x1]  ;;  %s3771_s9 = smov 24  }
  0x3f   : > { %6002 = vst [vmem:[#allocation13_spill] sm:$0xff] %v4019_v37  ;;  %v916_v40 = vrot.slane %v915_v27, 4  ;;  %1242 = vrot.lane.b32.xlu0 %v4019_v37, %s3764_s29  ;;  %v929_v48 = vor.u32 %v928_v34, %v925_v33  ;;  %672 = vst [vmem:[#allocation2 + $0x30] sm:$0xf] %v671_v46  ;;  %v668_v51 = vsel %vm3846_vm3, %v376_v41, %v667_v29  ;;  %v936_v53 = vshrl.u32 %v4005_v26, 16  ;;  %s161_s25 = sand.u32 1, %s3753_s13  }
  0x40   : > { %v934_v50 = vrot.slane %v932_v35, 5  ;;  %673 = vst.msk [vmem:[#allocation2 + $0x34] sm:$0xf] %vm202_vm0, %v392_v44  ;;  %v677_v54 = vld [vmem:[#allocation2 + $0x3c] sm:$0xf]  ;;  %v397_v56 = vrot.slane %v395_v42, 7 }
  0x41   : > { %v180_v55 = vld [vmem:[%s3875_s28 + $0x28] sm:$0xf]  ;;  %v4036_v49 = vsel %vm3930_vm11, %v916_v40, %v920_v28  ;;  %669 = vst [vmem:[#allocation2 + $0x2c] sm:$0x1] %v668_v51  ;;  %v398_v30 = vshll.u32 %v3947_v32, 16  ;;  %v403_v58 = vshrl.u32 %v179_v36, 16  ;;  %1240 = vrot.lane.b32.xlu1 %v4011_v31, %s3764_s29 }
  0x42   : > { %6003 = vst [vmem:[#allocation14_spill] sm:$0xff] %v4036_v49  ;;  %v232_v25 = vld [vmem:[#allocation2 + $0x48] sm:$0x1]  ;;  %v930_v41 = vrot.slane %v929_v48, 4  ;;  %v938_v59 = vrot.slane %v936_v53, 4  ;;  %v406_v60 = vshll.u32 %v179_v36, 16 }
  0x43   : > { %v283_v61 = vsel %vm3854_vm5, 0, %v282_v47  ;;  %v181_v63 = vld [vmem:[%s3875_s28 + $0x2c] sm:$0xf]  ;;  %v400_v0 = vor.u32 %v398_v30, %v397_v56  ;;  %v401_v3 = vrot.slane %v397_v56, 4  ;;  %v4046_v4 = vrot.slane %v403_v58, 7  ;;  %s3377_s26 = sshll.u32 %s161_s25, 7 }
  0x44   : > { %284 = vst [vmem:[#allocation2 + $0x38] sm:$0x1] %v283_v61  ;;  %v393_v42 = vrot.slane %v3992_v10, 4  ;;  %v285_v32 = vld [vmem:[#allocation2 + $0x44] sm:$0x1]  ;;  %v4051_v5 = vsel %vm3930_vm11, %v930_v41, %v934_v50  ;;  %v939_v6 = vor.u32 %v938_v59, %v934_v50  ;;  %v233_v7 = vsel %vm3846_vm3, 0, %v232_v25 }
  0x45   : > { %6004 = vst [vmem:[#allocation15_spill] sm:$0xff] %v4051_v5  ;;  %v412_v8 = vshrl.u32 %v180_v55, 16  ;;  %1246 = vrot.lane.b32.xlu0 %v4051_v5, %s3764_s29  ;;  %v408_v9 = vor.u32 %v406_v60, %v4046_v4  ;;  %v678_v12 = vsel %vm3899_vm9, %v400_v0, %v677_v54  ;;  %234 = vst [vmem:[#allocation2 + $0x48] sm:$0x1] %v233_v7  ;;  %v415_v10 = vshll.u32 %v180_v55, 16  ;;  %s5571_s27 = scalar_lea.vmem [#allocation4], %s3377_s26 }
  0x46   : > { %v420_v13 = vshrl.u32 %v181_v63, 16  ;;  %1244 = vrot.lane.b32.xlu1 %v4036_v49, %s3764_s29  ;;  %v940_v15 = vrot.slane %v939_v6, 4  ;;  %679 = vst [vmem:[#allocation2 + $0x3c] sm:$0xf] %v678_v12  ;;  %v423_v17 = vshll.u32 %v181_v63, 16  ;;  %v286_v18 = vsel %vm3854_vm5, 0, %v285_v32 }
  0x47   : > { %v414_v16 = vrot.slane %v412_v8, 7  ;;  %v235_v20 = vld [vmem:[#allocation2 + $0x54] sm:$0x1]  ;;  %v4064_v21 = vld [vmem:[#allocation2 + $0x30] sm:$0xf]  ;;  %v409_v24 = vsel %vm3906_vm10, %v401_v3, %v408_v9  ;;  %v410_v28 = vrot.slane %v4046_v4, 4 }
  0x48   : > { %v4066_v22 = vld [vmem:[#allocation2 + $0x34] sm:$0xf]  ;;  %v4070_v27 = vrot.slane %v420_v13, 7  ;;  %287 = vst [vmem:[#allocation2 + $0x44] sm:$0x1] %v286_v18  ;;  %v947_v29 = vshrl.u32 %v4064_v21, 16 }
  0x49   : > { %v950_v33 = vshll.u32 %v4064_v21, 16  ;;  %v956_v34 = vshll.u32 %v4066_v22, 16  ;;  %823 = vst.msk [vmem:[#allocation3 + $0x20] sm:$0xf] %vm202_vm0, %v4064_v21  ;;  %824 = vst.msk [vmem:[#allocation3 + $0x24] sm:$0xf] %vm202_vm0, %v4066_v22  ;;  %v417_v44 = vor.u32 %v415_v10, %v414_v16 }
  0x4a   : > { %v772_v35 = vld [vmem:[#allocation2 + $0x2c] sm:$0x1]  ;;  %680 = vst.msk [vmem:[#allocation2 + $0x40] sm:$0xf] %vm202_vm0, %v409_v24  ;;  %v960_v36 = vshrl.u32 %v4066_v22, 16  ;;  %v418_v46 = vrot.slane %v414_v16, 4  ;;  %v425_v47 = vor.u32 %v423_v17, %v4070_v27 }
  0x4b   : > { %v942_v40 = vshll.u32 %v772_v35, 16  ;;  %v182_v48 = vld [vmem:[%s3875_s28 + $0x30] sm:$0xf]  ;;  %v183_v50 = vld [vmem:[%s3875_s28 + $0x34] sm:$0xf]  ;;  %v949_v51 = vrot.slane %v947_v29, 4 }
  0x4c   : > { %v952_v53 = vrot.slane %v950_v33, 5  ;;  %v958_v54 = vrot.slane %v956_v34, 5  ;;  %v674_v55 = vld [vmem:[#allocation2 + $0x38] sm:$0x1]  ;;  %v962_v56 = vrot.slane %v960_v36, 4  ;;  %v426_v25 = vsel %vm3906_vm10, %v418_v46, %v425_v47 }
  0x4d   : > { %v944_v30 = vrot.slane %v942_v40, 5  ;;  %v675_v58 = vsel %vm3846_vm3, %v393_v42, %v674_v55  ;;  %v236_v41 = vsel %vm3846_vm3, 0, %v235_v20  ;;  %v684_v61 = vld [vmem:[#allocation2 + $0x48] sm:$0xf]  ;;  %687 = vst.msk [vmem:[#allocation2 + $0x4c] sm:$0xf] %vm202_vm0, %v426_v25 }
  0x4e   : > { %v953_v59 = vor.u32 %v952_v53, %v949_v51  ;;  %676 = vst [vmem:[#allocation2 + $0x38] sm:$0x1] %v675_v58  ;;  %v963_v60 = vor.u32 %v962_v56, %v958_v54  ;;  %237 = vst [vmem:[#allocation2 + $0x54] sm:$0x1] %v236_v41  ;;  %v429_v63 = vshrl.u32 %v182_v48, 16  ;;  %v432_v0 = vshll.u32 %v182_v48, 16 }
  0x4f   : > { %v288_v3 = vld [vmem:[#allocation2 + $0x50] sm:$0x1]  ;;  %v4094_v4 = vsel %vm3930_vm11, %v940_v15, %v944_v30  ;;  %v4096_v42 = vld [vmem:[#allocation2 + $0x3c] sm:$0xf]  ;;  %v685_v32 = vsel %vm3899_vm9, %v417_v44, %v684_v61  ;;  %v437_v6 = vshrl.u32 %v183_v50, 16  ;;  %v440_v7 = vshll.u32 %v183_v50, 16 }
  0x50   : > { %6005 = vst [vmem:[#allocation16_spill] sm:$0xff] %v4094_v4  ;;  %v238_v8 = vld [vmem:[#allocation2 + $0x60] sm:$0x1]  ;;  %v954_v9 = vrot.slane %v953_v59, 4  ;;  %1248 = vrot.lane.b32.xlu1 %v4094_v4, %s3764_s29  ;;  %v971_v12 = vshrl.u32 %v4096_v42, 16  ;;  %v974_v10 = vshll.u32 %v4096_v42, 16 }
  0x51   : > { %825 = vst.msk [vmem:[#allocation3 + $0x28] sm:$0xf] %vm202_vm0, %v4096_v42  ;;  %v964_v13 = vrot.slane %v963_v60, 4  ;;  %686 = vst [vmem:[#allocation2 + $0x48] sm:$0xf] %v685_v32  ;;  %v431_v18 = vrot.slane %v429_v63, 7 }
  0x52   : > { %v681_v15 = vld [vmem:[#allocation2 + $0x44] sm:$0x1]  ;;  %v4106_v16 = vld [vmem:[#allocation2 + $0x40] sm:$0xf]  ;;  %v4110_v20 = vrot.slane %v437_v6, 7  ;;  %v289_v24 = vsel %vm3854_vm5, 0, %v288_v3  ;;  %v4116_v29 = vsel %vm3930_vm11, %v954_v9, %v958_v54 }
  0x53   : > { %v682_v17 = vsel %vm3846_vm3, %v410_v28, %v681_v15  ;;  %6006 = vst [vmem:[#allocation17_spill] sm:$0xff] %v4116_v29  ;;  %v973_v33 = vrot.slane %v971_v12, 4  ;;  %v976_v34 = vrot.slane %v974_v10, 5  ;;  %v980_v35 = vshll.u32 %v4106_v16, 16  ;;  %826 = vst.msk [vmem:[#allocation3 + $0x2c] sm:$0xf] %vm202_vm0, %v4106_v16  ;;  %1250 = vrot.lane.b32.xlu0 %v4116_v29, %s3764_s29 }
  0x54   : > { %683 = vst [vmem:[#allocation2 + $0x44] sm:$0x1] %v682_v17  ;;  %290 = vst [vmem:[#allocation2 + $0x50] sm:$0x1] %v289_v24  ;;  %v184_v28 = vld [vmem:[%s3875_s28 + $0x38] sm:$0xf]  ;;  %v434_v40 = vor.u32 %v432_v0, %v431_v18  ;;  %v442_v46 = vor.u32 %v440_v7, %v4110_v20 }
  0x55   : > { %v984_v36 = vshrl.u32 %v4106_v16, 16  ;;  %v435_v44 = vrot.slane %v431_v18, 4  ;;  %v977_v47 = vor.u32 %v976_v34, %v973_v33  ;;  %v982_v48 = vrot.slane %v980_v35, 5  ;;  %v775_v53 = vld [vmem:[#allocation2 + $0x38] sm:$0x1] }
  0x56   : > { %v427_v50 = vrot.slane %v4070_v27, 4  ;;  %v239_v51 = vsel %vm3846_vm3, 0, %v238_v8  ;;  %v4129_v54 = vld [vmem:[#allocation2 + $0x4c] sm:$0xf]  ;;  %v446_v30 = vshrl.u32 %v184_v28, 16  ;;  %v966_v25 = vshll.u32 %v775_v53, 16 }
  0x57   : > { %v986_v55 = vrot.slane %v984_v36, 4  ;;  %v443_v56 = vsel %vm3906_vm10, %v435_v44, %v442_v46  ;;  %240 = vst [vmem:[#allocation2 + $0x60] sm:$0x1] %v239_v51  ;;  %v978_v58 = vrot.slane %v977_v47, 4  ;;  %v1004_v41 = vshll.u32 %v4129_v54, 16 }
  0x58   : > { %828 = vst.msk [vmem:[#allocation3 + $0x34] sm:$0xf] %vm202_vm0, %v4129_v54  ;;  %v691_v27 = vld [vmem:[#allocation2 + $0x54] sm:$0xf]  ;;  %694 = vst.msk [vmem:[#allocation2 + $0x58] sm:$0xf] %vm202_vm0, %v443_v56 }
  0x59   : > { %v1008_v59 = vshrl.u32 %v4129_v54, 16  ;;  %v4138_v60 = vld [vmem:[#allocation2 + $0x48] sm:$0xf]  ;;  %v987_v61 = vor.u32 %v986_v55, %v982_v48  ;;  %v692_v63 = vsel %vm3899_vm9, %v434_v40, %v691_v27  ;;  %v185_v0 = vld [vmem:[%s3875_s28 + $0x3c] sm:$0xf]  ;;  %v448_v3 = vrot.slane %v446_v30, 7 }
  0x5a   : > { %v449_v32 = vshll.u32 %v184_v28, 16  ;;  %v4145_v6 = vsel %vm3930_vm11, %v978_v58, %v982_v48  ;;  %v968_v7 = vrot.slane %v966_v25, 5  ;;  %v995_v8 = vshrl.u32 %v4138_v60, 16  ;;  %827 = vst.msk [vmem:[#allocation3 + $0x30] sm:$0xf] %vm202_vm0, %v4138_v60 }
  0x5b   : > { %6007 = vst [vmem:[#allocation18_spill] sm:$0xff] %v4145_v6  ;;  %v998_v9 = vshll.u32 %v4138_v60, 16  ;;  %693 = vst [vmem:[#allocation2 + $0x54] sm:$0xf] %v692_v63  ;;  %v291_v12 = vld [vmem:[#allocation2 + $0x5c] sm:$0x1]  ;;  %1254 = vrot.lane.b32.xlu0 %v4145_v6, %s3764_s29 }
  0x5c   : > { %v1006_v10 = vrot.slane %v1004_v41, 5  ;;  %v778_v15 = vld [vmem:[#allocation2 + $0x44] sm:$0x1]  ;;  %v988_v17 = vrot.slane %v987_v61, 4  ;;  %v688_v18 = vld [vmem:[#allocation2 + $0x50] sm:$0x1]  ;;  %v451_v24 = vor.u32 %v449_v32, %v448_v3  ;;  %v4155_v33 = vsel %vm3930_vm11, %v964_v13, %v968_v7 }
  0x5d   : > { %6008 = vst [vmem:[#allocation19_spill] sm:$0xff] %v4155_v33  ;;  %v997_v34 = vrot.slane %v995_v8, 4  ;;  %v1000_v35 = vrot.slane %v998_v9, 5  ;;  %v990_v28 = vshll.u32 %v778_v15, 16  ;;  %v186_v36 = vld [vmem:[%s3875_s28 + $0x40] sm:$0xf]  ;;  %1252 = vrot.lane.b32.xlu1 %v4155_v33, %s3764_s29  ;;  %v689_v40 = vsel %vm3846_vm3, %v427_v50, %v688_v18 }
  0x5e   : > { %v1010_v44 = vrot.slane %v1008_v59, 4  ;;  %v452_v46 = vrot.slane %v448_v3, 4  ;;  %v454_v47 = vshrl.u32 %v185_v0, 16  ;;  %v241_v48 = vld [vmem:[#allocation2 + $0x6c] sm:$0x1]  ;;  %v457_v13 = vshll.u32 %v185_v0, 16 }
  0x5f   : > { %v1001_v51 = vor.u32 %v1000_v35, %v997_v34  ;;  %v992_v53 = vrot.slane %v990_v28, 5  ;;  %690 = vst [vmem:[#allocation2 + $0x50] sm:$0x1] %v689_v40  ;;  %v698_v55 = vld [vmem:[#allocation2 + $0x60] sm:$0xf]  ;;  %v292_v56 = vsel %vm3854_vm5, 0, %v291_v12 }
  0x60   : > { %v4164_v30 = vld [vmem:[#allocation2 + $0x58] sm:$0xf]  ;;  %v1011_v58 = vor.u32 %v1010_v44, %v1006_v10  ;;  %v4166_v25 = vrot.slane %v454_v47, 7  ;;  %v699_v50 = vsel %vm3899_vm9, %v451_v24, %v698_v55  ;;  %293 = vst [vmem:[#allocation2 + $0x5c] sm:$0x1] %v292_v56  ;;  %v444_v41 = vrot.slane %v4110_v20, 4 }
  0x61   : > { %v1002_v27 = vrot.slane %v1001_v51, 4  ;;  %v4173_v59 = vsel %vm3930_vm11, %v988_v17, %v992_v53  ;;  %v1028_v61 = vshll.u32 %v4164_v30, 16  ;;  %830 = vst.msk [vmem:[#allocation3 + $0x3c] sm:$0xf] %vm202_vm0, %v4164_v30  ;;  %700 = vst [vmem:[#allocation2 + $0x60] sm:$0xf] %v699_v50 }
  0x62   : > { %6009 = vst [vmem:[#allocation20_spill] sm:$0xff] %v4173_v59  ;;  %v1032_v63 = vshrl.u32 %v4164_v30, 16  ;;  %v187_v0 = vld [vmem:[%s3875_s28 + $0x44] sm:$0xf]  ;;  %1256 = vrot.lane.b32.xlu1 %v4173_v59, %s3764_s29  ;;  %v4182_v3 = vld [vmem:[#allocation2 + $0x54] sm:$0xf]  ;;  %v459_v32 = vor.u32 %v457_v13, %v4166_v25 }
  0x63   : > { %v1012_v20 = vrot.slane %v1011_v58, 4  ;;  %v242_v7 = vsel %vm3846_vm3, 0, %v241_v48  ;;  %v463_v8 = vshrl.u32 %v186_v36, 16  ;;  %v4189_v9 = vsel %vm3930_vm11, %v1002_v27, %v1006_v10  ;;  %829 = vst.msk [vmem:[#allocation3 + $0x38] sm:$0xf] %vm202_vm0, %v4182_v3 }
  0x64   : > { %6010 = vst [vmem:[#allocation21_spill] sm:$0xff] %v4189_v9  ;;  %v1019_v12 = vshrl.u32 %v4182_v3, 16  ;;  %v1022_v15 = vshll.u32 %v4182_v3, 16  ;;  %v1030_v17 = vrot.slane %v1028_v61, 5  ;;  %243 = vst [vmem:[#allocation2 + $0x6c] sm:$0x1] %v242_v7  ;;  %1258 = vrot.lane.b32.xlu0 %v4189_v9, %s3764_s29  ;;  %v460_v24 = vsel %vm3906_vm10, %v452_v46, %v459_v32 }
  0x65   : > { %v294_v18 = vld [vmem:[#allocation2 + $0x68] sm:$0x1]  ;;  %v1034_v34 = vrot.slane %v1032_v63, 4  ;;  %v465_v10 = vrot.slane %v463_v8, 7  ;;  %v466_v35 = vshll.u32 %v186_v36, 16  ;;  %v471_v47 = vshrl.u32 %v187_v0, 16 }
  0x66   : > { %v188_v28 = vld [vmem:[%s3875_s28 + $0x48] sm:$0xf]  ;;  %v1021_v40 = vrot.slane %v1019_v12, 4  ;;  %v1024_v44 = vrot.slane %v1022_v15, 5  ;;  %701 = vst.msk [vmem:[#allocation2 + $0x64] sm:$0xf] %vm202_vm0, %v460_v24 }
  0x67   : > { %v474_v48 = vshll.u32 %v187_v0, 16  ;;  %v244_v51 = vld [vmem:[#allocation2 + $0x78] sm:$0x1]  ;;  %v4201_v53 = vld [vmem:[#allocation2 + $0x50] sm:$0x1]  ;;  %v1035_v13 = vor.u32 %v1034_v34, %v1030_v17  ;;  %v468_v55 = vor.u32 %v466_v35, %v465_v10  ;;  %v469_v56 = vrot.slane %v465_v10, 4 }
  0x68   : > { %v295_v46 = vsel %vm3854_vm5, 0, %v294_v18  ;;  %v189_v58 = vld [vmem:[%s3875_s28 + $0x4c] sm:$0xf]  ;;  %v1025_v50 = vor.u32 %v1024_v44, %v1021_v40  ;;  %v1014_v36 = vshll.u32 %v4201_v53, 16  ;;  %v695_v27 = vld [vmem:[#allocation2 + $0x5c] sm:$0x1] }
  0x69   : > { %v4207_v61 = vrot.slane %v471_v47, 7  ;;  %296 = vst [vmem:[#allocation2 + $0x68] sm:$0x1] %v295_v46  ;;  %v461_v63 = vrot.slane %v4166_v25, 4  ;;  %v4210_v0 = vld [vmem:[#allocation2 + $0x60] sm:$0xf]  ;;  %v696_v32 = vsel %vm3846_vm3, %v444_v41, %v695_v27 }
  0x6a   : > { %v4214_v7 = vrot.slane %v1035_v13, 4  ;;  %v245_v8 = vsel %vm3846_vm3, 0, %v244_v51  ;;  %v480_v12 = vshrl.u32 %v188_v28, 16  ;;  %v1026_v15 = vrot.slane %v1025_v50, 4  ;;  %831 = vst.msk [vmem:[#allocation3 + $0x40] sm:$0xf] %vm202_vm0, %v4210_v0 }
  0x6b   : > { %v1016_v18 = vrot.slane %v1014_v36, 5  ;;  %v1043_v24 = vshrl.u32 %v4210_v0, 16  ;;  %v1046_v34 = vshll.u32 %v4210_v0, 16  ;;  %697 = vst [vmem:[#allocation2 + $0x5c] sm:$0x1] %v696_v32  ;;  %v476_v41 = vor.u32 %v474_v48, %v4207_v61 }
  0x6c   : > { %246 = vst [vmem:[#allocation2 + $0x78] sm:$0x1] %v245_v8  ;;  %v297_v25 = vld [vmem:[#allocation2 + $0x74] sm:$0x1]  ;;  %v705_v10 = vld [vmem:[#allocation2 + $0x6c] sm:$0xf]  ;;  %v4225_v47 = vsel %vm3930_vm11, %v1026_v15, %v1030_v17 }
  0x6d   : > { %v482_v35 = vrot.slane %v480_v12, 7  ;;  %v483_v40 = vshll.u32 %v188_v28, 16  ;;  %v488_v44 = vshrl.u32 %v189_v58, 16  ;;  %6011 = vst [vmem:[#allocation22_spill] sm:$0xff] %v4225_v47  ;;  %v4229_v51 = vsel %vm3930_vm11, %v1012_v20, %v1016_v18  ;;  %v190_v50 = vld [vmem:[%s3875_s28 + $0x50] sm:$0xf]  ;;  %1262 = vrot.lane.b32.xlu0 %v4225_v47, %s3764_s29 }
  0x6e   : > { %6012 = vst [vmem:[#allocation23_spill] sm:$0xff] %v4229_v51  ;;  %v1045_v13 = vrot.slane %v1043_v24, 4  ;;  %v1048_v46 = vrot.slane %v1046_v34, 5  ;;  %v247_v36 = vld [vmem:[#allocation2 + $0x84] sm:$0x1]  ;;  %1260 = vrot.lane.b32.xlu1 %v4229_v51, %s3764_s29  ;;  %v477_v17 = vsel %vm3906_vm10, %v469_v56, %v476_v41  ;;  %v706_v20 = vsel %vm3899_vm9, %v468_v55, %v705_v10 }
  0x6f   : > { %v4236_v28 = vld [vmem:[#allocation2 + $0x64] sm:$0xf]  ;;  %v485_v48 = vor.u32 %v483_v40, %v482_v35  ;;  %v486_v27 = vrot.slane %v482_v35, 4  ;;  %707 = vst [vmem:[#allocation2 + $0x6c] sm:$0xf] %v706_v20  ;;  %v4247_v15 = vrot.slane %v488_v44, 7 }
  0x70   : > { %v1049_v32 = vor.u32 %v1048_v46, %v1045_v13  ;;  %v1052_v8 = vshll.u32 %v4236_v28, 16  ;;  %832 = vst.msk [vmem:[#allocation3 + $0x44] sm:$0xf] %vm202_vm0, %v4236_v28  ;;  %708 = vst.msk [vmem:[#allocation2 + $0x70] sm:$0xf] %vm202_vm0, %v477_v17  ;;  %v1056_v12 = vshrl.u32 %v4236_v28, 16 }
  0x71   : > { %v191_v18 = vld [vmem:[%s3875_s28 + $0x54] sm:$0xf]  ;;  %v702_v56 = vld [vmem:[#allocation2 + $0x68] sm:$0x1]  ;;  %v491_v24 = vshll.u32 %v189_v58, 16  ;;  %v298_v55 = vsel %vm3854_vm5, 0, %v297_v25 }
  0x72   : > { %v478_v34 = vrot.slane %v4207_v61, 4  ;;  %v248_v41 = vsel %vm3846_vm3, 0, %v247_v36  ;;  %v300_v10 = vld [vmem:[#allocation2 + $0x80] sm:$0x1]  ;;  %v1050_v35 = vrot.slane %v1049_v32, 4  ;;  %v1054_v40 = vrot.slane %v1052_v8, 5 }
  0x73   : > { %v703_v13 = vsel %vm3846_vm3, %v461_v63, %v702_v56  ;;  %v1058_v46 = vrot.slane %v1056_v12, 4  ;;  %299 = vst [vmem:[#allocation2 + $0x74] sm:$0x1] %v298_v55  ;;  %249 = vst [vmem:[#allocation2 + $0x84] sm:$0x1] %v248_v41  ;;  %v493_v58 = vor.u32 %v491_v24, %v4247_v15  ;;  %v497_v17 = vshrl.u32 %v190_v50, 16 }
  0x74   : > { %v4257_v44 = vld [vmem:[#allocation2 + $0x5c] sm:$0x1]  ;;  %704 = vst [vmem:[#allocation2 + $0x68] sm:$0x1] %v703_v13  ;;  %v712_v25 = vld [vmem:[#allocation2 + $0x78] sm:$0xf]  ;;  %v4262_v36 = vsel %vm3930_vm11, %v1050_v35, %v1054_v40 }
  0x75   : > { %v500_v61 = vshll.u32 %v190_v50, 16  ;;  %6013 = vst [vmem:[#allocation24_spill] sm:$0xff] %v4262_v36  ;;  %v1038_v20 = vshll.u32 %v4257_v44, 16  ;;  %v1059_v32 = vor.u32 %v1058_v46, %v1054_v40  ;;  %v713_v63 = vsel %vm3899_vm9, %v485_v48, %v712_v25  ;;  %1266 = vrot.lane.b32.xlu0 %v4262_v36, %s3764_s29  ;;  %v250_v35 = vld [vmem:[#allocation2 + $0x90] sm:$0x1] }
  0x76   : > { %v494_v8 = vsel %vm3906_vm10, %v486_v27, %v493_v58  ;;  %714 = vst [vmem:[#allocation2 + $0x78] sm:$0xf] %v713_v63  ;;  %v499_v12 = vrot.slane %v497_v17, 7  ;;  %v505_v50 = vshrl.u32 %v191_v18, 16  ;;  %v508_v56 = vshll.u32 %v191_v18, 16 }
  0x77   : > { %v1040_v24 = vrot.slane %v1038_v20, 5  ;;  %v1060_v55 = vrot.slane %v1059_v32, 4  ;;  %715 = vst.msk [vmem:[#allocation2 + $0x7c] sm:$0xf] %vm202_vm0, %v494_v8  ;;  %v301_v41 = vsel %vm3854_vm5, 0, %v300_v10  ;;  %v495_v48 = vrot.slane %v4247_v15, 4 }
  0x78   : > { %v4275_v40 = vld [vmem:[#allocation2 + $0x6c] sm:$0xf]  ;;  %v4277_v13 = vld [vmem:[#allocation2 + $0x70] sm:$0xf]  ;;  %v502_v27 = vor.u32 %v500_v61, %v499_v12  ;;  %v503_v46 = vrot.slane %v499_v12, 4  ;;  %v4279_v58 = vrot.slane %v505_v50, 7 }
  0x79   : > { %302 = vst [vmem:[#allocation2 + $0x80] sm:$0x1] %v301_v41  ;;  %v192_v18 = vld [vmem:[%s3875_s28 + $0x58] sm:$0xf]  ;;  %v4285_v25 = vsel %vm3930_vm11, %v4214_v7, %v1040_v24  ;;  %v1067_v10 = vshrl.u32 %v4275_v40, 16  ;;  %v1070_v15 = vshll.u32 %v4275_v40, 16 }
  0x7a   : > { %6014 = vst [vmem:[#allocation25_spill] sm:$0xff] %v4285_v25  ;;  %v1076_v17 = vshll.u32 %v4277_v13, 16  ;;  %833 = vst.msk [vmem:[#allocation3 + $0x48] sm:$0xf] %vm202_vm0, %v4275_v40  ;;  %v4295_v61 = vld [vmem:[%s3875_s28 + $0x5c] sm:$0xf]  ;;  %1264 = vrot.lane.b32.xlu1 %v4285_v25, %s3764_s29  ;;  %v510_v32 = vor.u32 %v508_v56, %v4279_v58 }
  0x7b   : > { %834 = vst.msk [vmem:[#allocation3 + $0x4c] sm:$0xf] %vm202_vm0, %v4277_v13  ;;  %v709_v20 = vld [vmem:[#allocation2 + $0x74] sm:$0x1]  ;;  %v1080_v7 = vshrl.u32 %v4277_v13, 16  ;;  %v251_v8 = vsel %vm3846_vm3, 0, %v250_v35 }
  0x7c   : > { %v719_v63 = vld [vmem:[#allocation2 + $0x84] sm:$0xf]  ;;  %v1069_v12 = vrot.slane %v1067_v10, 4  ;;  %v1072_v50 = vrot.slane %v1070_v15, 5  ;;  %v1078_v24 = vrot.slane %v1076_v17, 5  ;;  %v710_v36 = vsel %vm3846_vm3, %v478_v34, %v709_v20 }
  0x7d   : > { %v4303_v41 = vld [vmem:[#allocation2 + $0x68] sm:$0x1]  ;;  %252 = vst [vmem:[#allocation2 + $0x90] sm:$0x1] %v251_v8  ;;  %711 = vst [vmem:[#allocation2 + $0x74] sm:$0x1] %v710_v36  ;;  %v511_v56 = vsel %vm3906_vm10, %v503_v46, %v510_v32  ;;  %v720_v51 = vsel %vm3899_vm9, %v502_v27, %v719_v63 }
  0x7e   : > { %v1062_v25 = vshll.u32 %v4303_v41, 16  ;;  %v1082_v47 = vrot.slane %v1080_v7, 4  ;;  %v1073_v35 = vor.u32 %v1072_v50, %v1069_v12  ;;  %v4312_v10 = vld [vmem:[#allocation2 + $0x78] sm:$0xf]  ;;  %721 = vst [vmem:[#allocation2 + $0x84] sm:$0xf] %v720_v51 }
  0x7f   : > { %722 = vst.msk [vmem:[#allocation2 + $0x88] sm:$0xf] %vm202_vm0, %v511_v56  ;;  %v514_v15 = vshrl.u32 %v192_v18, 16  ;;  %v517_v17 = vshll.u32 %v192_v18, 16  ;;  %v522_v34 = vshrl.u32 %v4295_v61, 16  ;;  %v1091_v36 = vshrl.u32 %v4312_v10, 16 }
  0x80   : > { %v1064_v20 = vrot.slane %v1062_v25, 5  ;;  %v4316_v8 = vld [vmem:[#allocation2 + $0x7c] sm:$0xf]  ;;  %v1094_v46 = vshll.u32 %v4312_v10, 16  ;;  %835 = vst.msk [vmem:[#allocation3 + $0x50] sm:$0xf] %vm202_vm0, %v4312_v10  ;;  %v1083_v27 = vor.u32 %v1082_v47, %v1078_v24 }
  0x81   : > { %v1074_v7 = vrot.slane %v1073_v35, 4  ;;  %v1100_v51 = vshll.u32 %v4316_v8, 16  ;;  %836 = vst.msk [vmem:[#allocation3 + $0x54] sm:$0xf] %vm202_vm0, %v4316_v8  ;;  %v716_v18 = vld [vmem:[#allocation2 + $0x80] sm:$0x1] }
  0x82   : > { %v1104_v32 = vshrl.u32 %v4316_v8, 16  ;;  %v516_v25 = vrot.slane %v514_v15, 7  ;;  %v4328_v63 = vsel %vm3930_vm11, %v1060_v55, %v1064_v20  ;;  %v1093_v12 = vrot.slane %v1091_v36, 4  ;;  %v303_v9 = vld [vmem:[#allocation2 + $0x8c] sm:$0x1] }
  0x83   : > { %6015 = vst [vmem:[#allocation26_spill] sm:$0xff] %v4328_v63  ;;  %v1096_v50 = vrot.slane %v1094_v46, 5  ;;  %v1084_v56 = vrot.slane %v1083_v27, 4  ;;  %v4332_v47 = vsel %vm3930_vm11, %v1074_v7, %v1078_v24  ;;  %1268 = vrot.lane.b32.xlu1 %v4328_v63, %s3764_s29  ;;  %v1102_v35 = vrot.slane %v1100_v51, 5  ;;  %v253_v24 = vld [vmem:[#allocation2 + $0x9c] sm:$0x1] }
  0x84   : > { %6016 = vst [vmem:[#allocation27_spill] sm:$0xff] %v4332_v47  ;;  %v717_v6 = vsel %vm3846_vm3, %v495_v48, %v716_v18  ;;  %v1106_v15 = vrot.slane %v1104_v32, 4  ;;  %1270 = vrot.lane.b32.xlu0 %v4332_v47, %s3764_s29  ;;  %v519_v20 = vor.u32 %v517_v17, %v516_v25  ;;  %v520_v36 = vrot.slane %v516_v25, 4  ;;  %v726_v27 = vld [vmem:[#allocation2 + $0x90] sm:$0xf] }
  0x85   : > { %v1097_v55 = vor.u32 %v1096_v50, %v1093_v12  ;;  %718 = vst [vmem:[#allocation2 + $0x80] sm:$0x1] %v717_v6  ;;  %v4340_v46 = vrot.slane %v522_v34, 7  ;;  %v4342_v7 = vld [vmem:[#allocation2 + $0x74] sm:$0x1]  ;;  %v525_v51 = vshll.u32 %v4295_v61, 16 }
  0x86   : > { %v1107_v59 = vor.u32 %v1106_v15, %v1102_v35  ;;  %v304_v48 = vsel %vm3854_vm5, 0, %v303_v9  ;;  %v512_v18 = vrot.slane %v4279_v58, 4  ;;  %v1086_v6 = vshll.u32 %v4342_v7, 16  ;;  %v4349_v17 = vld [vmem:[#allocation2 + $0x84] sm:$0xf] }
  0x87   : > { %v1098_v32 = vrot.slane %v1097_v55, 4  ;;  %v4351_v34 = vld [vmem:[#allocation2 + $0x88] sm:$0xf]  ;;  %v727_v25 = vsel %vm3899_vm9, %v519_v20, %v726_v27  ;;  %305 = vst [vmem:[#allocation2 + $0x8c] sm:$0x1] %v304_v48  ;;  %v1115_v61 = vshrl.u32 %v4349_v17, 16  ;;  %v527_v20 = vor.u32 %v525_v51, %v4340_v46 }
  0x88   : > { %v1118_v12 = vshll.u32 %v4349_v17, 16  ;;  %v1124_v9 = vshll.u32 %v4351_v34, 16  ;;  %837 = vst.msk [vmem:[#allocation3 + $0x58] sm:$0xf] %vm202_vm0, %v4349_v17  ;;  %838 = vst.msk [vmem:[#allocation3 + $0x5c] sm:$0xf] %vm202_vm0, %v4351_v34 }
  0x89   : > { %v1108_v58 = vrot.slane %v1107_v59, 4  ;;  %728 = vst [vmem:[#allocation2 + $0x90] sm:$0xf] %v727_v25  ;;  %v194_v50 = vld [vmem:[%s3875_s28 + $0x60] sm:$0xf]  ;;  %v4365_v15 = vsel %vm3930_vm11, %v1098_v32, %v1102_v35  ;;  %v1088_v55 = vrot.slane %v1086_v6, 5  ;;  %v528_v51 = vsel %vm3906_vm10, %v520_v36, %v527_v20 }
  0x8a   : > { %6017 = vst [vmem:[#allocation28_spill] sm:$0xff] %v4365_v15  ;;  %v1128_v27 = vshrl.u32 %v4351_v34, 16  ;;  %v195_v48 = vld [vmem:[%s3875_s28 + $0x64] sm:$0xf]  ;;  %1274 = vrot.lane.b32.xlu0 %v4365_v15, %s3764_s29  ;;  %v1117_v63 = vrot.slane %v1115_v61, 4  ;;  %v1120_v29 = vrot.slane %v1118_v12, 5 }
  0x8b   : > { %v1126_v33 = vrot.slane %v1124_v9, 5  ;;  %v254_v59 = vsel %vm3846_vm3, 0, %v253_v24  ;;  %v306_v25 = vld [vmem:[#allocation2 + $0x98] sm:$0x1]  ;;  %v4376_v35 = vsel %vm3930_vm11, %v1084_v56, %v1088_v55  ;;  %v531_v6 = vshrl.u32 %v194_v50, 16 }
  0x8c   : > { %v1130_v32 = vrot.slane %v1128_v27, 4  ;;  %255 = vst [vmem:[#allocation2 + $0x9c] sm:$0x1] %v254_v59  ;;  %v256_v5 = vld [vmem:[#allocation2 + $0xa8] sm:$0x1]  ;;  %1272 = vrot.lane.b32.xlu1 %v4376_v35, %s3764_s29  ;;  %v1121_v61 = vor.u32 %v1120_v29, %v1117_v63  ;;  %v534_v24 = vshll.u32 %v194_v50, 16 }
  0x8d   : > { %v4382_v12 = vld [vmem:[#allocation2 + $0x80] sm:$0x1]  ;;  %729 = vst.msk [vmem:[#allocation2 + $0x94] sm:$0xf] %vm202_vm0, %v528_v51  ;;  %v539_v9 = vshrl.u32 %v195_v48, 16  ;;  %v542_v56 = vshll.u32 %v195_v48, 16 }
  0x8e   : > { %v1110_v55 = vshll.u32 %v4382_v12, 16  ;;  %v1131_v36 = vor.u32 %v1130_v32, %v1126_v33  ;;  %v533_v20 = vrot.slane %v531_v6, 7  ;;  %v307_v27 = vsel %vm3854_vm5, 0, %v306_v25  ;;  %v196_v59 = vld [vmem:[%s3875_s28 + $0x68] sm:$0xf] }
  0x8f   : > { %v1122_v4 = vrot.slane %v1121_v61, 4  ;;  %v723_v15 = vld [vmem:[#allocation2 + $0x8c] sm:$0x1]  ;;  %v4389_v37 = vrot.slane %v539_v9, 7  ;;  %308 = vst [vmem:[#allocation2 + $0x98] sm:$0x1] %v307_v27 }
  0x90   : > { %v529_v29 = vrot.slane %v4340_v46, 4  ;;  %v257_v63 = vsel %vm3846_vm3, 0, %v256_v5  ;;  %v1112_v50 = vrot.slane %v1110_v55, 5  ;;  %v4394_v48 = vld [vmem:[#allocation2 + $0x90] sm:$0xf]  ;;  %v724_v51 = vsel %vm3846_vm3, %v512_v18, %v723_v15 }
  0x91   : > { %v4398_v32 = vrot.slane %v1131_v36, 4  ;;  %v536_v25 = vor.u32 %v534_v24, %v533_v20  ;;  %v197_v6 = vld [vmem:[%s3875_s28 + $0x6c] sm:$0xf]  ;;  %258 = vst [vmem:[#allocation2 + $0xa8] sm:$0x1] %v257_v63  ;;  %v4403_v61 = vsel %vm3930_vm11, %v1122_v4, %v1126_v33  ;;  %v1139_v46 = vshrl.u32 %v4394_v48, 16 }
  0x92   : > { %6018 = vst [vmem:[#allocation29_spill] sm:$0xff] %v4403_v61  ;;  %v1142_v9 = vshll.u32 %v4394_v48, 16  ;;  %839 = vst.msk [vmem:[#allocation3 + $0x60] sm:$0xf] %vm202_vm0, %v4394_v48  ;;  %v537_v5 = vrot.slane %v533_v20, 4  ;;  %1278 = vrot.lane.b32.xlu0 %v4403_v61, %s3764_s29  ;;  %v4413_v15 = vsel %vm3930_vm11, %v1108_v58, %v1112_v50  ;;  %v544_v4 = vor.u32 %v542_v56, %v4389_v37 }
  0x93   : > { %725 = vst [vmem:[#allocation2 + $0x8c] sm:$0x1] %v724_v51  ;;  %v309_v18 = vld [vmem:[#allocation2 + $0xa4] sm:$0x1]  ;;  %6019 = vst [vmem:[#allocation30_spill] sm:$0xff] %v4413_v15  ;;  %v548_v33 = vshrl.u32 %v196_v59, 16  ;;  %1276 = vrot.lane.b32.xlu1 %v4413_v15, %s3764_s29 }
  0x94   : > { %v551_v24 = vshll.u32 %v196_v59, 16  ;;  %v259_v55 = vld [vmem:[#allocation2 + $0xb4] sm:$0x1]  ;;  %v1141_v36 = vrot.slane %v1139_v46, 4  ;;  %v1144_v27 = vrot.slane %v1142_v9, 5  ;;  %v556_v63 = vshrl.u32 %v197_v6, 16 }
  0x95   : > { %v733_v20 = vld [vmem:[#allocation2 + $0x9c] sm:$0xf]  ;;  %v559_v51 = vshll.u32 %v197_v6, 16  ;;  %v198_v47 = vld [vmem:[%s3875_s28 + $0x70] sm:$0xf]  ;;  %v545_v58 = vsel %vm3906_vm10, %v537_v5, %v544_v4  ;;  %v550_v50 = vrot.slane %v548_v33, 7 }
  0x96   : > { %v4419_v61 = vld [vmem:[#allocation2 + $0x94] sm:$0xf]  ;;  %v734_v56 = vsel %vm3899_vm9, %v536_v25, %v733_v20  ;;  %v310_v59 = vsel %vm3854_vm5, 0, %v309_v18  ;;  %v1145_v15 = vor.u32 %v1144_v27, %v1141_v36  ;;  %736 = vst.msk [vmem:[#allocation2 + $0xa0] sm:$0xf] %vm202_vm0, %v545_v58  ;;  %v4433_v9 = vrot.slane %v556_v63, 7 }
  0x97   : > { %v199_v49 = vld [vmem:[%s3875_s28 + $0x74] sm:$0xf]  ;;  %v1148_v46 = vshll.u32 %v4419_v61, 16  ;;  %840 = vst.msk [vmem:[#allocation3 + $0x64] sm:$0xf] %vm202_vm0, %v4419_v61  ;;  %v1152_v6 = vshrl.u32 %v4419_v61, 16  ;;  %v553_v4 = vor.u32 %v551_v24, %v550_v50 }
  0x98   : > { %735 = vst [vmem:[#allocation2 + $0x9c] sm:$0xf] %v734_v56  ;;  %311 = vst [vmem:[#allocation2 + $0xa4] sm:$0x1] %v310_v59  ;;  %v312_v25 = vld [vmem:[#allocation2 + $0xb0] sm:$0x1]  ;;  %v561_v59 = vor.u32 %v559_v51, %v4433_v9 }
  0x99   : > { %v730_v5 = vld [vmem:[#allocation2 + $0x98] sm:$0x1]  ;;  %v554_v33 = vrot.slane %v550_v50, 4  ;;  %v546_v18 = vrot.slane %v4389_v37, 4  ;;  %v260_v36 = vsel %vm3846_vm3, 0, %v259_v55  ;;  %v1146_v27 = vrot.slane %v1145_v15, 4 }
  0x9a   : > { %v1150_v20 = vrot.slane %v1148_v46, 5  ;;  %v731_v56 = vsel %vm3846_vm3, %v529_v29, %v730_v5  ;;  %v1154_v58 = vrot.slane %v1152_v6, 4  ;;  %v740_v23 = vld [vmem:[#allocation2 + $0xa8] sm:$0xf]  ;;  %261 = vst [vmem:[#allocation2 + $0xb4] sm:$0x1] %v260_v36 }
  0x9b   : > { %v4440_v63 = vld [vmem:[#allocation2 + $0x8c] sm:$0x1]  ;;  %732 = vst [vmem:[#allocation2 + $0x98] sm:$0x1] %v731_v56  ;;  %v741_v24 = vsel %vm3899_vm9, %v553_v4, %v740_v23  ;;  %v565_v37 = vshrl.u32 %v198_v47, 16  ;;  %v568_v50 = vshll.u32 %v198_v47, 16  ;;  %v562_v51 = vsel %vm3906_vm10, %v554_v33, %v561_v59 }
  0x9c   : > { %v4447_v15 = vsel %vm3930_vm11, %v1146_v27, %v1150_v20  ;;  %v1134_v55 = vshll.u32 %v4440_v63, 16  ;;  %v1155_v29 = vor.u32 %v1154_v58, %v1150_v20  ;;  %742 = vst [vmem:[#allocation2 + $0xa8] sm:$0xf] %v741_v24  ;;  %v573_v46 = vshrl.u32 %v199_v49, 16  ;;  %743 = vst.msk [vmem:[#allocation2 + $0xac] sm:$0xf] %vm202_vm0, %v562_v51 }
  0x9d   : > { %6020 = vst [vmem:[#allocation31_spill] sm:$0xff] %v4447_v15  ;;  %1282 = vrot.lane.b32.xlu0 %v4447_v15, %s3764_s29  ;;  %v567_v6 = vrot.slane %v565_v37, 7  ;;  %v576_v5 = vshll.u32 %v199_v49, 16  ;;  %v313_v23 = vsel %vm3854_vm5, 0, %v312_v25  ;;  %v4461_v20 = vld [vmem:[#allocation2 + $0xa0] sm:$0xf] }
  0x9e   : > { %v1136_v47 = vrot.slane %v1134_v55, 5  ;;  %v1156_v4 = vrot.slane %v1155_v29, 4  ;;  %v4457_v36 = vrot.slane %v573_v46, 7  ;;  %314 = vst [vmem:[#allocation2 + $0xb0] sm:$0x1] %v313_v23  ;;  %v1172_v59 = vshll.u32 %v4461_v20, 16 }
  0x9f   : > { %v4459_v27 = vld [vmem:[#allocation2 + $0x9c] sm:$0xf]  ;;  %v737_v56 = vld [vmem:[#allocation2 + $0xa4] sm:$0x1]  ;;  %v570_v58 = vor.u32 %v568_v50, %v567_v6  ;;  %842 = vst.msk [vmem:[#allocation3 + $0x6c] sm:$0xf] %vm202_vm0, %v4461_v20 }
  0xa0   : > { %v4466_v49 = vsel %vm3930_vm11, %v4398_v32, %v1136_v47  ;;  %v1163_v25 = vshrl.u32 %v4459_v27, 16  ;;  %v1166_v33 = vshll.u32 %v4459_v27, 16  ;;  %841 = vst.msk [vmem:[#allocation3 + $0x68] sm:$0xf] %vm202_vm0, %v4459_v27  ;;  %v738_v24 = vsel %vm3846_vm3, %v546_v18, %v737_v56 }
  0xa1   : > { %6021 = vst [vmem:[#allocation32_spill] sm:$0xff] %v4466_v49  ;;  %1280 = vrot.lane.b32.xlu1 %v4466_v49, %s3764_s29  ;;  %v1176_v32 = vshrl.u32 %v4461_v20, 16  ;;  %v571_v37 = vrot.slane %v567_v6, 4  ;;  %v578_v50 = vor.u32 %v576_v5, %v4457_v36  ;;  %v747_v55 = vld [vmem:[#allocation2 + $0xb4] sm:$0xf]  ;;  %v1174_v51 = vrot.slane %v1172_v59, 5 }
  0xa2   : > { %v1165_v29 = vrot.slane %v1163_v25, 4  ;;  %v1168_v46 = vrot.slane %v1166_v33, 5  ;;  %v4481_v23 = vld [vmem:[#allocation2 + $0x98] sm:$0x1]  ;;  %739 = vst [vmem:[#allocation2 + $0xa4] sm:$0x1] %v738_v24  ;;  %v748_v47 = vsel %vm3899_vm9, %v570_v58, %v747_v55 }
  0xa3   : > { %v1158_v15 = vshll.u32 %v4481_v23, 16  ;;  %v4486_v49 = vld [vmem:[#allocation2 + $0xa8] sm:$0xf]  ;;  %v1178_v18 = vrot.slane %v1176_v32, 4  ;;  %v579_v6 = vsel %vm3906_vm10, %v571_v37, %v578_v50  ;;  %749 = vst [vmem:[#allocation2 + $0xb4] sm:$0xf] %v748_v47 }
  0xa4   : > { %v563_v5 = vrot.slane %v4433_v9, 4  ;;  %v1169_v56 = vor.u32 %v1168_v46, %v1165_v29  ;;  %v1187_v25 = vshrl.u32 %v4486_v49, 16  ;;  %v1190_v33 = vshll.u32 %v4486_v49, 16  ;;  %843 = vst.msk [vmem:[#allocation3 + $0x70] sm:$0xf] %vm202_vm0, %v4486_v49 }
  0xa5   : > { %750 = vst.msk [vmem:[#allocation2 + $0xb8] sm:$0xf] %vm202_vm0, %v579_v6  ;;  %v1160_v58 = vrot.slane %v1158_v15, 5  ;;  %v4496_v59 = vld [vmem:[#allocation2 + $0xac] sm:$0xf]  ;;  %v1179_v24 = vor.u32 %v1178_v18, %v1174_v51  ;;  %vm1411_vm12 = vcmask 1042432  }
  0xa6   : > { %v744_v32 = vld [vmem:[#allocation2 + $0xb0] sm:$0x1]  ;;  %v1170_v55 = vrot.slane %v1169_v56, 4  ;;  %v1189_v37 = vrot.slane %v1187_v25, 4  ;;  %v1192_v50 = vrot.slane %v1190_v33, 5  ;;  %v1196_v9 = vshll.u32 %v4496_v59, 16 }
  0xa7   : > { %844 = vst.msk [vmem:[#allocation3 + $0x74] sm:$0xf] %vm202_vm0, %v4496_v59  ;;  %v315_v29 = vld [vmem:[#allocation2 + $0xbc] sm:$0x1]  ;;  %v4503_v46 = vsel %vm3930_vm11, %v1156_v4, %v1160_v58  ;;  %v745_v15 = vsel %vm3846_vm3, %v563_v5, %v744_v32  ;;  %v1200_v47 = vshrl.u32 %v4496_v59, 16  ;;  %v1180_v58 = vrot.slane %v1179_v24, 4 }
  0xa8   : > { %6022 = vst [vmem:[#allocation33_spill] sm:$0xff] %v4503_v46  ;;  %v4510_v18 = vsel %vm3930_vm11, %v1170_v55, %v1174_v51  ;;  %1284 = vrot.lane.b32.xlu1 %v4503_v46, %s3764_s29  ;;  %v1193_v6 = vor.u32 %v1192_v50, %v1189_v37  ;;  %v1198_v56 = vrot.slane %v1196_v9, 5  ;;  %746 = vst [vmem:[#allocation2 + $0xb0] sm:$0x1] %v745_v15  ;;  %v316_v5 = vsel %vm3854_vm5, 0, %v315_v29 }
  0xa9   : > { %6023 = vst [vmem:[#allocation34_spill] sm:$0xff] %v4510_v18  ;;  %1286 = vrot.lane.b32.xlu0 %v4510_v18, %s3764_s29  ;;  %v4516_v4 = vld [vmem:[#allocation2 + $0xa4] sm:$0x1]  ;;  %v1202_v25 = vrot.slane %v1200_v47, 4  ;;  %317 = vst [vmem:[#allocation2 + $0xbc] sm:$0x1] %v316_v5 }
  0xaa   : > { %v1194_v33 = vrot.slane %v1193_v6, 4  ;;  %v1182_v51 = vshll.u32 %v4516_v4, 16  ;;  %v4521_v32 = vld [vmem:[#allocation2 + $0xb4] sm:$0xf]  ;;  %vm1412_vm13 = vcmask 1046532   ;;  %v1437_v45 = vrot.slane %v4005_v26, 5 }
  0xab   : > { %v1211_v37 = vshrl.u32 %v4521_v32, 16  ;;  %v1214_v50 = vshll.u32 %v4521_v32, 16  ;;  %845 = vst.msk [vmem:[#allocation3 + $0x78] sm:$0xf] %vm202_vm0, %v4521_v32  ;;  %v1203_v15 = vor.u32 %v1202_v25, %v1198_v56  ;;  %vm4552_vm14 = vmor %vm1411_vm12, %vm1412_vm13  ;;  %vm1330_vm15 = vcmask 44056  }
  0xac   : > { %v4523_v55 = vld [vmem:[#allocation2 + $0xb8] sm:$0xf]  ;;  %v4531_v9 = vsel %vm3930_vm11, %v1194_v33, %v1198_v56  ;;  %v1184_v29 = vrot.slane %v1182_v51, 5  ;;  %v580_v33 = vrot.slane %v4457_v36, 4  ;;  %v1472_v46 = vrot.slane %v4236_v28, 5 }
  0xad   : > { %6024 = vst [vmem:[#allocation35_spill] sm:$0xff] %v4531_v9  ;;  %v1220_v24 = vshll.u32 %v4523_v55, 16  ;;  %846 = vst.msk [vmem:[#allocation3 + $0x7c] sm:$0xf] %vm202_vm0, %v4523_v55  ;;  %1290 = vrot.lane.b32.xlu0 %v4531_v9, %s3764_s29  ;;  %v1213_v47 = vrot.slane %v1211_v37, 4  ;;  %v1216_v6 = vrot.slane %v1214_v50, 5 }
  0xae   : > { %v4540_v5 = vsel %vm3930_vm11, %v1180_v58, %v1184_v29  ;;  %v1224_v56 = vshrl.u32 %v4523_v55, 16  ;;  %v1204_v25 = vrot.slane %v1203_v15, 4  ;;  %v3380_v58 = vrot.slane %v3914_v62, 9 }
  0xaf   : > { %6025 = vst [vmem:[#allocation36_spill] sm:$0xff] %v4540_v5  ;;  %1288 = vrot.lane.b32.xlu1 %v4540_v5, %s3764_s29  ;;  %v1217_v51 = vor.u32 %v1216_v6, %v1213_v47  ;;  %v1222_v18 = vrot.slane %v1220_v24, 5  ;;  %v4545_v2 = vld [vmem:[#allocation2 + $0xb0] sm:$0x1]  ;;  %v1416_v29 = vrot.slane %v3879_v19, 5  ;;  %v1423_v6 = vrot.slane %v3961_v43, 5 }
  0xb0   : > { %v1206_v37 = vshll.u32 %v4545_v2, 16  ;;  %v751_v9 = vld [vmem:[#allocation2 + $0xbc] sm:$0x1]  ;;  %v1226_v47 = vrot.slane %v1224_v56, 4  ;;  %vm1622_vm1 = vcmask 68656   ;;  %vm1753_vm2 = vcmask 93256  }
  0xb1   : > { %v1218_v50 = vrot.slane %v1217_v51, 4  ;;  %v752_v24 = vsel %vm3846_vm3, %v580_v33, %v751_v9  ;;  %v1417_v62 = vsel %vm4552_vm14, %v3380_v58, %v1416_v29  ;;  %v3381_v9 = vrot.slane %v3956_v38, 9  ;;  %v1237_v33 = vpop.permute.xlu0 %1236 }
  0xb2   : > { %v1208_v36 = vrot.slane %v1206_v37, 5  ;;  %753 = vst [vmem:[#allocation2 + $0xbc] sm:$0x1] %v752_v24  ;;  %v1227_v51 = vor.u32 %v1226_v47, %v1222_v18  ;;  %v1430_v37 = vrot.slane %v3981_v57, 5  ;;  %v3695_v24 = vld [vmem:[#allocation2 + $0x8] sm:$0x1] }
  0xb3   : > { %v4560_v15 = vsel %vm3930_vm11, %v1218_v50, %v1222_v18  ;;  %v4577_v56 = vsel %vm4552_vm14, %v3381_v9, %v1423_v6  ;;  %v1418_v18 = vrot.slane %v1416_v29, 4  ;;  %v1419_v47 = vrot.slane %v3695_v24, 5  ;;  %v3696_v24 = vld [vmem:[#allocation2 + $0x14] sm:$0x1]  ;;  %1332 = vst.msk [vmem:[#allocation3 + $0x4] sm:$0xf] %vm1330_vm15, %v1237_v33 }
  0xb4   : > { %6028 = vst [vmem:[#allocation37_spill] sm:$0xff] %v4560_v15  ;;  %1294 = vrot.lane.b32.xlu0 %v4560_v15, %s3764_s29  ;;  %v4566_v19 = vsel %vm3930_vm11, %v1204_v25, %v1208_v36  ;;  %v3382_v25 = vrot.slane %v3976_v52, 9  ;;  %v1228_v58 = vrot.slane %v1227_v51, 4  ;;  %v1426_v39 = vrot.slane %v3696_v24, 5 }
  0xb5   : > { %6029 = vst [vmem:[#allocation38_spill] sm:$0xff] %v4566_v19  ;;  %1292 = vrot.lane.b32.xlu1 %v4566_v19, %s3764_s29  ;;  %v3383_v19 = vrot.slane %v3994_v14, 9  ;;  %v1420_v29 = vsel %vm4552_vm14, %v1418_v18, %v1419_v47  ;;  %vm2680_vm4 = vcmask 1044480   ;;  %vm2681_vm6 = vcmask 1045504  }
  0xb6   : > { %v4588_v9 = vsel %vm4552_vm14, %v3382_v25, %v1430_v37  ;;  %v1239_v25 = vpop.permute.xlu1 %1238  ;;  %vm1906_vm7 = vcmask 117856   ;;  %vm2174_vm8 = vcmask 167056  }
  0xb7   : > { %v4604_v1 = vsel %vm4552_vm14, %v3383_v19, %v1437_v45  ;;  %1333 = vst.msk [vmem:[#allocation3 + $0x8] sm:$0xf] %vm1330_vm15, %v1239_v25  ;;  %v1432_v19 = vrot.slane %v1430_v37, 4  ;;  %v3698_v25 = vld [vmem:[#allocation2 + $0x2c] sm:$0x1] }
  0xb8   : > { %1526 = vrot.lane.b32.xlu0 %v1417_v62, %s3765_s30  ;;  %v1235_v62 = vpop.permute.xlu0 %1234  ;;  %6031 = vst [vmem:[#allocation40_spill] sm:$0xff] %v4604_v1 }
  0xb9   : > { %v4581_v50 = vld [vmem:[#allocation2 + $0xbc] sm:$0x1]  ;;  %1331 = vst.msk [vmem:[#allocation3] sm:$0xf] %vm1330_vm15, %v1235_v62  ;;  %v3385_v62 = vrot.slane %v4096_v42, 9 }
  0xba   : > { %v1230_v36 = vshll.u32 %v4581_v50, 16  ;;  %v1241_v47 = vpop.permute.xlu1 %1240 }
  0xbb   : > { %1334 = vst.msk [vmem:[#allocation3 + $0xc] sm:$0xf] %vm1330_vm15, %v1241_v47  ;;  %v3386_v47 = vrot.slane %v4138_v60, 9 }
  0xbc   : > { %1530 = vrot.lane.b32.xlu0 %v4577_v56, %s3765_s30  ;;  %v1232_v15 = vrot.slane %v1230_v36, 5  ;;  %v1425_v36 = vrot.slane %v1423_v6, 4  ;;  %v1243_v11 = vpop.permute.xlu0 %1242  ;;  %v3697_v6 = vld [vmem:[#allocation2 + $0x20] sm:$0x1] }
  0xbd   : > { %1335 = vst.msk [vmem:[#allocation3 + $0x10] sm:$0xf] %vm1330_vm15, %v1243_v11  ;;  %v1433_v18 = vrot.slane %v3697_v6, 5  ;;  %v1451_v11 = vrot.slane %v4106_v16, 5 }
  0xbe   : > { %v4594_v51 = vsel %vm3930_vm11, %v1228_v58, %v1232_v15  ;;  %v3384_v15 = vrot.slane %v4064_v21, 9  ;;  %v1444_v58 = vrot.slane %v4066_v22, 5  ;;  %v4617_v24 = vsel %vm4552_vm14, %v1425_v36, %v1426_v39  ;;  %v1245_v36 = vpop.permute.xlu1 %1244 }
  0xbf   : > { %6030 = vst [vmem:[#allocation39_spill] sm:$0xff] %v4594_v51  ;;  %1296 = vrot.lane.b32.xlu1 %v4594_v51, %s3764_s29  ;;  %v4630_v37 = vsel %vm4552_vm14, %v1432_v19, %v1433_v18  ;;  %v1439_v39 = vrot.slane %v1437_v45, 4  ;;  %v4637_v6 = vsel %vm4552_vm14, %v3385_v62, %v1451_v11  ;;  %v1458_v51 = vrot.slane %v4129_v54, 5  ;;  %1336 = vst.msk [vmem:[#allocation3 + $0x14] sm:$0xf] %vm1330_vm15, %v1245_v36  ;;  %s3311_s29 = sshll.u32 %s5571_s27, 4  ;;  %s5853_s29 = int_to_ptr.vmem [resolvable:$true] %s3311_s29 }
  0xc0   : > { %1534 = vrot.lane.b32.xlu0 %v4588_v9, %s3765_s30  ;;  %v4621_v33 = vsel %vm4552_vm14, %v3384_v15, %v1444_v58  ;;  %v1440_v15 = vrot.slane %v3698_v25, 5  ;;  %6033 = vst [vmem:[#allocation42_spill] sm:$0xff] %v4637_v6  ;;  %v1446_v45 = vrot.slane %v1444_v58, 4  ;;  %v3699_v19 = vld [vmem:[#allocation2 + $0x38] sm:$0x1]  ;;  %v3387_v25 = vrot.slane %v4182_v3, 9 }
  0xc1   : > { %6032 = vst [vmem:[#allocation41_spill] sm:$0xff] %v4621_v33  ;;  %v1447_v18 = vrot.slane %v3699_v19, 5  ;;  %v4652_v62 = vsel %vm4552_vm14, %v3386_v47, %v1458_v51  ;;  %v1465_v36 = vrot.slane %v4164_v30, 5  ;;  %v3700_v19 = vld [vmem:[#allocation2 + $0x44] sm:$0x1] }
  0xc2   : > { %6034 = vst [vmem:[#allocation43_spill] sm:$0xff] %v4652_v62 }
  0xc3   : > { %1528 = vrot.lane.b32.xlu1 %v1420_v29, %s3765_s30  ;;  %v1247_v29 = vpop.permute.xlu0 %1246  ;;  %v4660_v58 = vsel %vm4552_vm14, %v1446_v45, %v1447_v18  ;;  %v4666_v47 = vsel %vm4552_vm14, %v3387_v25, %v1465_v36  ;;  %v1461_v45 = vrot.slane %v4201_v53, 5 }
  0xc4   : > { %1538 = vrot.lane.b32.xlu0 %v4604_v1, %s3765_s30  ;;  %1337 = vst.msk [vmem:[#allocation3 + $0x18] sm:$0xf] %vm1330_vm15, %v1247_v29  ;;  %v4648_v29 = vsel %vm4552_vm14, %v1439_v39, %v1440_v15  ;;  %v1453_v39 = vrot.slane %v1451_v11, 4  ;;  %v1249_v15 = vpop.permute.xlu1 %1248  ;;  %6035 = vst [vmem:[#allocation44_spill] sm:$0xff] %v4666_v47  ;;  %v1460_v11 = vrot.slane %v1458_v51, 4  ;;  %v1468_v51 = vrot.slane %v4257_v44, 5 }
  0xc5   : > { %1338 = vst.msk [vmem:[#allocation3 + $0x1c] sm:$0xf] %vm1330_vm15, %v1249_v15  ;;  %v3389_v15 = vrot.slane %v4275_v40, 9  ;;  %v1475_v44 = vrot.slane %v4303_v41, 5 }
  0xc6   : > { %v4691_v53 = vsel %vm4552_vm14, %v1460_v11, %v1461_v45 }
  0xc7   : > { %1532 = vrot.lane.b32.xlu1 %v4617_v24, %s3765_s30  ;;  %v1251_v1 = vpop.permute.xlu0 %1250  ;;  %6037 = vst [vmem:[#allocation46_spill] sm:$0xff] %v4691_v53 }
  0xc8   : > { %1542 = vrot.lane.b32.xlu0 %v4621_v33, %s3765_s30  ;;  %v3388_v33 = vrot.slane %v4210_v0, 9  ;;  %1339 = vst.msk [vmem:[#allocation3 + $0x20] sm:$0xf] %vm1330_vm15, %v1251_v1  ;;  %v1467_v1 = vrot.slane %v1465_v36, 4  ;;  %v1474_v36 = vrot.slane %v1472_v46, 4 }
  0xca   : > { %v4683_v25 = vsel %vm4552_vm14, %v3388_v33, %v1472_v46  ;;  %v4711_v11 = vsel %vm4552_vm14, %v1467_v1, %v1468_v51  ;;  %v1482_v46 = vrot.slane %v4342_v7, 5  ;;  %v3392_v51 = vrot.slane %v4394_v48, 9 }
  0xcb   : > { %1536 = vrot.lane.b32.xlu1 %v4630_v37, %s3765_s30  ;;  %6036 = vst [vmem:[#allocation45_spill] sm:$0xff] %v4683_v25  ;;  %6038 = vst [vmem:[#allocation47_spill] sm:$0xff] %v4711_v11 }
  0xcc   : > { %1546 = vrot.lane.b32.xlu0 %v4637_v6, %s3765_s30  ;;  %v1454_v6 = vrot.slane %v3700_v19, 5  ;;  %v1479_v19 = vrot.slane %v4277_v13, 5 }
  0xce   : > { %v4679_v18 = vsel %vm4552_vm14, %v1453_v39, %v1454_v6  ;;  %v4698_v33 = vsel %vm4552_vm14, %v3389_v15, %v1479_v19  ;;  %v3390_v6 = vrot.slane %v4312_v10, 9  ;;  %v1486_v39 = vrot.slane %v4316_v8, 5 }
  0xcf   : > { %1540 = vrot.lane.b32.xlu1 %v4648_v29, %s3765_s30  ;;  %v1493_v15 = vrot.slane %v4351_v34, 5  ;;  %v1481_v41 = vrot.slane %v1479_v19, 4  ;;  %v1489_v19 = vrot.slane %v4382_v12, 5 }
  0xd0   : > { %1550 = vrot.lane.b32.xlu0 %v4652_v62, %s3765_s30  ;;  %v1253_v62 = vpop.permute.xlu1 %1252  ;;  %v4715_v45 = vsel %vm4552_vm14, %v3390_v6, %v1486_v39  ;;  %v1500_v6 = vrot.slane %v4419_v61, 5 }
  0xd1   : > { %1340 = vst.msk [vmem:[#allocation3 + $0x24] sm:$0xf] %vm1330_vm15, %v1253_v62  ;;  %v4727_v62 = vsel %vm4552_vm14, %v1474_v36, %v1475_v44  ;;  %v4740_v7 = vsel %vm4552_vm14, %v1481_v41, %v1482_v46  ;;  %v3393_v44 = vrot.slane %v4459_v27, 9  ;;  %v1496_v41 = vrot.slane %v4440_v63, 5 }
  0xd2   : > { %6039 = vst [vmem:[#allocation48_spill] sm:$0xff] %v4727_v62  ;;  %v4747_v36 = vsel %vm4552_vm14, %v3392_v51, %v1500_v6  ;;  %v3394_v46 = vrot.slane %v4486_v49, 9  ;;  %v1514_v51 = vrot.slane %v4496_v59, 5 }
  0xd3   : > { %1544 = vrot.lane.b32.xlu1 %v4660_v58, %s3765_s30 }
  0xd4   : > { %1554 = vrot.lane.b32.xlu0 %v4666_v47, %s3765_s30  ;;  %v1255_v47 = vpop.permute.xlu0 %1254 }
  0xd5   : > { %1341 = vst.msk [vmem:[#allocation3 + $0x28] sm:$0xf] %vm1330_vm15, %v1255_v47  ;;  %v3391_v47 = vrot.slane %v4349_v17, 9 }
  0xd7   : > { %1548 = vrot.lane.b32.xlu1 %v4679_v18, %s3765_s30  ;;  %v4731_v1 = vsel %vm4552_vm14, %v3391_v47, %v1493_v15  ;;  %v1495_v47 = vrot.slane %v1493_v15, 4  ;;  %v1502_v15 = vrot.slane %v1500_v6, 4 }
  0xd8   : > { %1558 = vrot.lane.b32.xlu0 %v4683_v25, %s3765_s30  ;;  %v1257_v25 = vpop.permute.xlu1 %1256 }
  0xd9   : > { %1342 = vst.msk [vmem:[#allocation3 + $0x2c] sm:$0xf] %vm1330_vm15, %v1257_v25  ;;  %v1488_v25 = vrot.slane %v1486_v39, 4  ;;  %v4772_v63 = vsel %vm4552_vm14, %v1495_v47, %v1496_v41  ;;  %v1510_v47 = vrot.slane %v4516_v4, 5  ;;  %v1517_v4 = vrot.slane %v4545_v2, 5 }
  0xdb   : > { %1552 = vrot.lane.b32.xlu1 %v4691_v53, %s3765_s30  ;;  %v4758_v12 = vsel %vm4552_vm14, %v1488_v25, %v1489_v19  ;;  %v1503_v25 = vrot.slane %v4481_v23, 5  ;;  %v4779_v19 = vsel %vm4552_vm14, %v3394_v46, %v1514_v51 }
  0xdc   : > { %1562 = vrot.lane.b32.xlu0 %v4698_v33, %s3765_s30 }
  0xdd   : > { %v4790_v23 = vsel %vm4552_vm14, %v1502_v15, %v1503_v25 }
  0xdf   : > { %1556 = vrot.lane.b32.xlu1 %v4711_v11, %s3765_s30  ;;  %v1259_v11 = vpop.permute.xlu0 %1258 }
  0xe0   : > { %1566 = vrot.lane.b32.xlu0 %v4715_v45, %s3765_s30  ;;  %1343 = vst.msk [vmem:[#allocation3 + $0x30] sm:$0xf] %vm1330_vm15, %v1259_v11  ;;  %v1507_v11 = vrot.slane %v4461_v20, 5  ;;  %v1261_v53 = vpop.permute.xlu1 %1260 }
  0xe1   : > { %1344 = vst.msk [vmem:[#allocation3 + $0x34] sm:$0xf] %vm1330_vm15, %v1261_v53  ;;  %v1521_v53 = vrot.slane %v4523_v55, 5 }
  0xe2   : > { %v4762_v39 = vsel %vm4552_vm14, %v3393_v44, %v1507_v11  ;;  %v1509_v6 = vrot.slane %v1507_v11, 4  ;;  %v1516_v11 = vrot.slane %v1514_v51, 4 }
  0xe3   : > { %1560 = vrot.lane.b32.xlu1 %v4727_v62, %s3765_s30  ;;  %v1263_v62 = vpop.permute.xlu0 %1262 }
  0xe4   : > { %1570 = vrot.lane.b32.xlu0 %v4731_v1, %s3765_s30  ;;  %1345 = vst.msk [vmem:[#allocation3 + $0x38] sm:$0xf] %vm1330_vm15, %v1263_v62  ;;  %v3395_v62 = vrot.slane %v4521_v32, 9  ;;  %v4804_v15 = vsel %vm4552_vm14, %v1509_v6, %v1510_v47  ;;  %v4813_v25 = vsel %vm4552_vm14, %v1516_v11, %v1517_v4 }
  0xe6   : > { %v4795_v41 = vsel %vm4552_vm14, %v3395_v62, %v1521_v53  ;;  %v1523_v62 = vrot.slane %v1521_v53, 4 }
  0xe7   : > { %1564 = vrot.lane.b32.xlu1 %v4740_v7, %s3765_s30  ;;  %v1267_v44 = vpop.permute.xlu0 %1266 }
  0xe8   : > { %1574 = vrot.lane.b32.xlu0 %v4747_v36, %s3765_s30  ;;  %1347 = vst.msk [vmem:[#allocation3 + $0x40] sm:$0xf] %vm1330_vm15, %v1267_v44  ;;  %v1524_v44 = vrot.slane %v4581_v50, 5 }
  0xea   : > { %v4824_v2 = vsel %vm4552_vm14, %v1523_v62, %v1524_v44 }
  0xeb   : > { %1568 = vrot.lane.b32.xlu1 %v4758_v12, %s3765_s30 }
  0xec   : > { %1578 = vrot.lane.b32.xlu0 %v4762_v39, %s3765_s30  ;;  %v1265_v46 = vpop.permute.xlu1 %1264 }
  0xed   : > { %1346 = vst.msk [vmem:[#allocation3 + $0x3c] sm:$0xf] %vm1330_vm15, %v1265_v46 }
  0xef   : > { %1572 = vrot.lane.b32.xlu1 %v4772_v63, %s3765_s30 }
  0xf0   : > { %1582 = vrot.lane.b32.xlu0 %v4779_v19, %s3765_s30 }
  0xf3   : > { %1576 = vrot.lane.b32.xlu1 %v4790_v23, %s3765_s30 }
  0xf4   : > { %1586 = vrot.lane.b32.xlu0 %v4795_v41, %s3765_s30 }
  0xf5   : > { %v1269_v46 = vpop.permute.xlu1 %1268 }
  0xf6   : > { %v1271_v6 = vpop.permute.xlu0 %1270  ;;  %1348 = vst.msk [vmem:[#allocation3 + $0x44] sm:$0xf] %vm1330_vm15, %v1269_v46 }
  0xf7   : > { %1580 = vrot.lane.b32.xlu1 %v4804_v15, %s3765_s30  ;;  %1349 = vst.msk [vmem:[#allocation3 + $0x48] sm:$0xf] %vm1330_vm15, %v1271_v6 }
  0xf8   : > { %1657 = vrot.lane.b32.xlu0 %v3956_v38, %s3766_s4 }
  0xfb   : > { %1584 = vrot.lane.b32.xlu1 %v4813_v25, %s3765_s30 }
  0xfc   : > { %1661 = vrot.lane.b32.xlu0 %v3976_v52, %s3766_s4  ;;  %v1275_v38 = vpop.permute.xlu0 %1274 }
  0xfd   : > { %1351 = vst.msk [vmem:[#allocation3 + $0x50] sm:$0xf] %vm1330_vm15, %v1275_v38 }
  0xfe   : > { %v1273_v50 = vpop.permute.xlu1 %1272 }
  0xff   : > { %1588 = vrot.lane.b32.xlu1 %v4824_v2, %s3765_s30  ;;  %1350 = vst.msk [vmem:[#allocation3 + $0x4c] sm:$0xf] %vm1330_vm15, %v1273_v50 }
 0x100   : > { %1665 = vrot.lane.b32.xlu0 %v3994_v14, %s3766_s4 }
 0x103   : > { %1659 = vrot.lane.b32.xlu1 %v3961_v43, %s3766_s4 }
 0x104   : > { %1669 = vrot.lane.b32.xlu0 %v4064_v21, %s3766_s4  ;;  %v1279_v51 = vpop.permute.xlu0 %1278 }
 0x105   : > { %1353 = vst.msk [vmem:[#allocation3 + $0x58] sm:$0xf] %vm1330_vm15, %v1279_v51  ;;  %v1277_v53 = vpop.permute.xlu1 %1276 }
 0x106   : > { %1352 = vst.msk [vmem:[#allocation3 + $0x54] sm:$0xf] %vm1330_vm15, %v1277_v53 }
 0x107   : > { %1663 = vrot.lane.b32.xlu1 %v3981_v57, %s3766_s4 }
 0x108   : > { %1673 = vrot.lane.b32.xlu0 %v4096_v42, %s3766_s4 }
 0x10b   : > { %1667 = vrot.lane.b32.xlu1 %v4005_v26, %s3766_s4 }
 0x10c   : > { %1677 = vrot.lane.b32.xlu0 %v4138_v60, %s3766_s4 }
 0x10f   : > { %v1283_v43 = vpop.permute.xlu0 %1282  ;;  %1671 = vrot.lane.b32.xlu1 %v4066_v22, %s3766_s4 }
 0x110   : > { %1681 = vrot.lane.b32.xlu0 %v4182_v3, %s3766_s4  ;;  %1355 = vst.msk [vmem:[#allocation3 + $0x60] sm:$0xf] %vm1330_vm15, %v1283_v43 }
 0x113   : > { %v1281_v47 = vpop.permute.xlu1 %1280  ;;  %1675 = vrot.lane.b32.xlu1 %v4106_v16, %s3766_s4 }
 0x114   : > { %1685 = vrot.lane.b32.xlu0 %v4210_v0, %s3766_s4  ;;  %1354 = vst.msk [vmem:[#allocation3 + $0x5c] sm:$0xf] %vm1330_vm15, %v1281_v47 }
 0x117   : > { %1679 = vrot.lane.b32.xlu1 %v4129_v54, %s3766_s4 }
 0x118   : > { %1689 = vrot.lane.b32.xlu0 %v4275_v40, %s3766_s4 }
 0x11a   : > { %v1285_v11 = vpop.permute.xlu1 %1284 }
 0x11b   : > { %v1287_v4 = vpop.permute.xlu0 %1286  ;;  %1356 = vst.msk [vmem:[#allocation3 + $0x64] sm:$0xf] %vm1330_vm15, %v1285_v11  ;;  %1683 = vrot.lane.b32.xlu1 %v4164_v30, %s3766_s4  ;;  %v6041_v11 = vld [vmem:[#allocation14_spill] sm:$0xff] }
 0x11c   : > { %1693 = vrot.lane.b32.xlu0 %v4312_v10, %s3766_s4  ;;  %1357 = vst.msk [vmem:[#allocation3 + $0x68] sm:$0xf] %vm1330_vm15, %v1287_v4 }
 0x11f   : > { %v1291_v62 = vpop.permute.xlu0 %1290  ;;  %1687 = vrot.lane.b32.xlu1 %v4236_v28, %s3766_s4 }
 0x120   : > { %1697 = vrot.lane.b32.xlu0 %v4349_v17, %s3766_s4  ;;  %1359 = vst.msk [vmem:[#allocation3 + $0x70] sm:$0xf] %vm1330_vm15, %v1291_v62 }
 0x121   : > { %v1289_v44 = vpop.permute.xlu1 %1288 }
 0x122   : > { %1358 = vst.msk [vmem:[#allocation3 + $0x6c] sm:$0xf] %vm1330_vm15, %v1289_v44  ;;  %v6042_v44 = vld [vmem:[#allocation27_spill] sm:$0xff] }
 0x123   : > { %1691 = vrot.lane.b32.xlu1 %v4277_v13, %s3766_s4 }
 0x124   : > { %1701 = vrot.lane.b32.xlu0 %v4394_v48, %s3766_s4 }
 0x126   : > { %v1295_v46 = vpop.permute.xlu0 %1294 }
 0x127   : > { %1361 = vst.msk [vmem:[#allocation3 + $0x78] sm:$0xf] %vm1330_vm15, %v1295_v46  ;;  %v1293_v6 = vpop.permute.xlu1 %1292  ;;  %1695 = vrot.lane.b32.xlu1 %v4316_v8, %s3766_s4  ;;  %v6043_v46 = vld [vmem:[#allocation30_spill] sm:$0xff] }
 0x128   : > { %1360 = vst.msk [vmem:[#allocation3 + $0x74] sm:$0xf] %vm1330_vm15, %v1293_v6  ;;  %1705 = vrot.lane.b32.xlu0 %v4459_v27, %s3766_s4 }
 0x12a   : > { %v1527_v38 = vpop.permute.xlu0 %1526 }
 0x12b   : > { %1623 = vst.msk [vmem:[#allocation3] sm:$0xf] %vm1622_vm1, %v1527_v38  ;;  %1699 = vrot.lane.b32.xlu1 %v4351_v34, %s3766_s4 }
 0x12c   : > { %1709 = vrot.lane.b32.xlu0 %v4486_v49, %s3766_s4 }
 0x12e   : > { %v1531_v50 = vpop.permute.xlu0 %1530 }
 0x12f   : > { %1625 = vst.msk [vmem:[#allocation3 + $0x8] sm:$0xf] %vm1622_vm1, %v1531_v50  ;;  %1703 = vrot.lane.b32.xlu1 %v4419_v61, %s3766_s4  ;;  %v6044_v50 = vld [vmem:[#allocation13_spill] sm:$0xff] }
 0x130   : > { %1812 = vrot.lane.b32.xlu0 %v4011_v31, %s3767_s5  ;;  %v6040_v31 = vld [vmem:[#allocation12_spill] sm:$0xff] }
 0x131   : > { %v1297_v51 = vpop.permute.xlu1 %1296 }
 0x132   : > { %v1535_v53 = vpop.permute.xlu0 %1534  ;;  %1362 = vst.msk [vmem:[#allocation3 + $0x7c] sm:$0xf] %vm1330_vm15, %v1297_v51 }
 0x133   : > { %1627 = vst.msk [vmem:[#allocation3 + $0x10] sm:$0xf] %vm1622_vm1, %v1535_v53  ;;  %1707 = vrot.lane.b32.xlu1 %v4461_v20, %s3766_s4 }
 0x134   : > { %1844 = vrot.lane.b32.xlu0 %v4376_v35, %s3767_s5 }
 0x135   : > { %v1529_v43 = vpop.permute.xlu1 %1528 }
 0x136   : > { %v1539_v47 = vpop.permute.xlu0 %1538  ;;  %1624 = vst.msk [vmem:[#allocation3 + $0x4] sm:$0xf] %vm1622_vm1, %v1529_v43  ;;  %v6045_v43 = vld [vmem:[#allocation28_spill] sm:$0xff] }
 0x137   : > { %1629 = vst.msk [vmem:[#allocation3 + $0x18] sm:$0xf] %vm1622_vm1, %v1539_v47  ;;  %1810 = vrot.lane.b32.xlu1 %v6040_v31, %s3767_s5 }
 0x138   : > { %1816 = vrot.lane.b32.xlu0 %v6041_v11, %s3767_s5 }
 0x139   : > { %v1533_v4 = vpop.permute.xlu1 %1532 }
 0x13a   : > { %v1543_v62 = vpop.permute.xlu0 %1542  ;;  %1626 = vst.msk [vmem:[#allocation3 + $0xc] sm:$0xf] %vm1622_vm1, %v1533_v4 }
 0x13b   : > { %1631 = vst.msk [vmem:[#allocation3 + $0x20] sm:$0xf] %vm1622_vm1, %v1543_v62  ;;  %1842 = vrot.lane.b32.xlu1 %v6042_v44, %s3767_s5 }
 0x13c   : > { %1848 = vrot.lane.b32.xlu0 %v6043_v46, %s3767_s5 }
 0x13d   : > { %v1537_v6 = vpop.permute.xlu1 %1536 }
 0x13e   : > { %v1547_v38 = vpop.permute.xlu0 %1546  ;;  %1628 = vst.msk [vmem:[#allocation3 + $0x14] sm:$0xf] %vm1622_vm1, %v1537_v6 }
 0x13f   : > { %1633 = vst.msk [vmem:[#allocation3 + $0x28] sm:$0xf] %vm1622_vm1, %v1547_v38  ;;  %1814 = vrot.lane.b32.xlu1 %v6044_v50, %s3767_s5 }
 0x140   : > { %1949 = vrot.lane.b32.xlu0 %v4617_v24, %s3768_s6 }
 0x141   : > { %v1541_v51 = vpop.permute.xlu1 %1540 }
 0x142   : > { %v1551_v53 = vpop.permute.xlu0 %1550  ;;  %1630 = vst.msk [vmem:[#allocation3 + $0x1c] sm:$0xf] %vm1622_vm1, %v1541_v51 }
 0x143   : > { %1635 = vst.msk [vmem:[#allocation3 + $0x30] sm:$0xf] %vm1622_vm1, %v1551_v53  ;;  %1846 = vrot.lane.b32.xlu1 %v6045_v43, %s3767_s5 }
 0x144   : > { %1981 = vrot.lane.b32.xlu0 %v4740_v7, %s3768_s6 }
 0x145   : > { %v1545_v47 = vpop.permute.xlu1 %1544 }
 0x146   : > { %v1555_v31 = vpop.permute.xlu0 %1554  ;;  %1632 = vst.msk [vmem:[#allocation3 + $0x24] sm:$0xf] %vm1622_vm1, %v1545_v47 }
 0x147   : > { %1637 = vst.msk [vmem:[#allocation3 + $0x38] sm:$0xf] %vm1622_vm1, %v1555_v31  ;;  %1947 = vrot.lane.b32.xlu1 %v4577_v56, %s3768_s6 }
 0x148   : > { %1953 = vrot.lane.b32.xlu0 %v4630_v37, %s3768_s6 }
 0x149   : > { %v1549_v24 = vpop.permute.xlu1 %1548 }
 0x14a   : > { %v1559_v4 = vpop.permute.xlu0 %1558  ;;  %1634 = vst.msk [vmem:[#allocation3 + $0x2c] sm:$0xf] %vm1622_vm1, %v1549_v24 }
 0x14b   : > { %1639 = vst.msk [vmem:[#allocation3 + $0x40] sm:$0xf] %vm1622_vm1, %v1559_v4  ;;  %1979 = vrot.lane.b32.xlu1 %v4698_v33, %s3768_s6 }
 0x14c   : > { %1985 = vrot.lane.b32.xlu0 %v4758_v12, %s3768_s6 }
 0x14d   : > { %v1553_v62 = vpop.permute.xlu1 %1552 }
 0x14e   : > { %v1563_v6 = vpop.permute.xlu0 %1562  ;;  %1636 = vst.msk [vmem:[#allocation3 + $0x34] sm:$0xf] %vm1622_vm1, %v1553_v62  ;;  %v3772_v62 = vmov 65535  }
 0x14f   : > { %1641 = vst.msk [vmem:[#allocation3 + $0x48] sm:$0xf] %vm1622_vm1, %v1563_v6  ;;  %1951 = vrot.lane.b32.xlu1 %v4588_v9, %s3768_s6  ;;  %v2682_v6 = vsel %vm2680_vm4, 4294967295, %v3772_v62 }
 0x150   : > { %2080 = vrot.lane.b32.xlu0 %v3981_v57, %s3769_s7 }
 0x151   : > { %v1557_v56 = vpop.permute.xlu1 %1556 }
 0x152   : > { %v1567_v38 = vpop.permute.xlu0 %1566  ;;  %1638 = vst.msk [vmem:[#allocation3 + $0x3c] sm:$0xf] %vm1622_vm1, %v1557_v56  ;;  %v2683_v56 = vsel %vm2681_vm6, %v2682_v6, 0 }
 0x153   : > { %1643 = vst.msk [vmem:[#allocation3 + $0x50] sm:$0xf] %vm1622_vm1, %v1567_v38  ;;  %1983 = vrot.lane.b32.xlu1 %v4715_v45, %s3768_s6 }
 0x154   : > { %2112 = vrot.lane.b32.xlu0 %v4316_v8, %s3769_s7 }
 0x155   : > { %v1561_v51 = vpop.permute.xlu1 %1560 }
 0x156   : > { %v1571_v53 = vpop.permute.xlu0 %1570  ;;  %1640 = vst.msk [vmem:[#allocation3 + $0x44] sm:$0xf] %vm1622_vm1, %v1561_v51 }
 0x157   : > { %1645 = vst.msk [vmem:[#allocation3 + $0x58] sm:$0xf] %vm1622_vm1, %v1571_v53  ;;  %2078 = vrot.lane.b32.xlu1 %v3976_v52, %s3769_s7 }
 0x158   : > { %2084 = vrot.lane.b32.xlu0 %v4005_v26, %s3769_s7 }
 0x159   : > { %v1565_v57 = vpop.permute.xlu1 %1564 }
 0x15a   : > { %v1575_v47 = vpop.permute.xlu0 %1574  ;;  %1642 = vst.msk [vmem:[#allocation3 + $0x4c] sm:$0xf] %vm1622_vm1, %v1565_v57  ;;  %v6049_v57 = vld [vmem:[#allocation29_spill] sm:$0xff] }
 0x15b   : > { %1647 = vst.msk [vmem:[#allocation3 + $0x60] sm:$0xf] %vm1622_vm1, %v1575_v47  ;;  %2110 = vrot.lane.b32.xlu1 %v4312_v10, %s3769_s7 }
 0x15c   : > { %2116 = vrot.lane.b32.xlu0 %v4351_v34, %s3769_s7 }
 0x15d   : > { %v1569_v8 = vpop.permute.xlu1 %1568 }
 0x15e   : > { %v1579_v31 = vpop.permute.xlu0 %1578  ;;  %1644 = vst.msk [vmem:[#allocation3 + $0x54] sm:$0xf] %vm1622_vm1, %v1569_v8  ;;  %v3615_v8 = vld [vmem:[%s5900_s1] sm:$0xff]  }
 0x15f   : > { %1649 = vst.msk [vmem:[#allocation3 + $0x68] sm:$0xf] %vm1622_vm1, %v1579_v31  ;;  %2082 = vrot.lane.b32.xlu1 %v3994_v14, %s3769_s7  ;;  %v6046_v14 = vld [vmem:[#allocation16_spill] sm:$0xff] }
 0x160   : > { %2233 = vrot.lane.b32.xlu0 %v6041_v11, %s3770_s8 }
 0x161   : > { %v1573_v52 = vpop.permute.xlu1 %1572 }
 0x162   : > { %v1583_v26 = vpop.permute.xlu0 %1582  ;;  %1646 = vst.msk [vmem:[#allocation3 + $0x5c] sm:$0xf] %vm1622_vm1, %v1573_v52 }
 0x163   : > { %1651 = vst.msk [vmem:[#allocation3 + $0x70] sm:$0xf] %vm1622_vm1, %v1583_v26  ;;  %2114 = vrot.lane.b32.xlu1 %v4349_v17, %s3769_s7  ;;  %v6047_v17 = vld [vmem:[#allocation32_spill] sm:$0xff] }
 0x164   : > { %2265 = vrot.lane.b32.xlu0 %v6043_v46, %s3770_s8  ;;  %v6050_v26 = vld [vmem:[#allocation40_spill] sm:$0xff] }
 0x165   : > { %v1577_v10 = vpop.permute.xlu1 %1576 }
 0x166   : > { %v1587_v34 = vpop.permute.xlu0 %1586  ;;  %1648 = vst.msk [vmem:[#allocation3 + $0x64] sm:$0xf] %vm1622_vm1, %v1577_v10 }
 0x167   : > { %1653 = vst.msk [vmem:[#allocation3 + $0x78] sm:$0xf] %vm1622_vm1, %v1587_v34  ;;  %2231 = vrot.lane.b32.xlu1 %v6044_v50, %s3770_s8  ;;  %v6048_v50 = vld [vmem:[#allocation15_spill] sm:$0xff] }
 0x168   : > { %2237 = vrot.lane.b32.xlu0 %v6046_v14, %s3770_s8 }
 0x169   : > { %v1581_v11 = vpop.permute.xlu1 %1580 }
 0x16a   : > { %v1658_v24 = vpop.permute.xlu0 %1657  ;;  %1650 = vst.msk [vmem:[#allocation3 + $0x6c] sm:$0xf] %vm1622_vm1, %v1581_v11 }
 0x16b   : > { %1754 = vst.msk [vmem:[#allocation3] sm:$0xf] %vm1753_vm2, %v1658_v24  ;;  %2263 = vrot.lane.b32.xlu1 %v6045_v43, %s3770_s8  ;;  %v3613_v43 = vld [vmem:[%s5900_s1 + $0x8] sm:$0x3f]  }
 0x16c   : > { %2269 = vrot.lane.b32.xlu0 %v6047_v17, %s3770_s8  ;;  %v2685_v53 = vand.u32 %v3613_v43, %v2683_v56  ;;  %v6054_v56 = vld [vmem:[#allocation31_spill] sm:$0xff] }
 0x16d   : > { %v1585_v46 = vpop.permute.xlu1 %1584 }
 0x16e   : > { %v1662_v4 = vpop.permute.xlu0 %1661  ;;  %1652 = vst.msk [vmem:[#allocation3 + $0x74] sm:$0xf] %vm1622_vm1, %v1585_v46  ;;  %3522 = vmatprep.subr.bf16.mxu0 %v2685_v53  ;;  %3558 = vmatprep.subr.bf16.mxu1 %v2685_v53 }
 0x16f   : > { %1756 = vst.msk [vmem:[#allocation3 + $0x8] sm:$0xf] %vm1753_vm2, %v1662_v4  ;;  %2235 = vrot.lane.b32.xlu1 %v6048_v50, %s3770_s8  ;;  %3523 = vmatpush3.bf16.msra.mxu0 %v2685_v53 }
 0x170   : > { %2370 = vrot.lane.b32.xlu0 %v4630_v37, %s3771_s9  ;;  %3560 = vmatpush3.bf16.msra.mxu1 %v2685_v53 }
 0x171   : > { %v1589_v38 = vpop.permute.xlu1 %1588  ;;  %3524 = vmatprep.subr.bf16.mxu0 %v3615_v8  ;;  %3559 = vmatprep.subr.bf16.mxu1 %v3615_v8 }
 0x172   : > { %v1666_v51 = vpop.permute.xlu0 %1665  ;;  %1654 = vst.msk [vmem:[#allocation3 + $0x7c] sm:$0xf] %vm1622_vm1, %v1589_v38 }
 0x173   : > { %1758 = vst.msk [vmem:[#allocation3 + $0x10] sm:$0xf] %vm1753_vm2, %v1666_v51  ;;  %2267 = vrot.lane.b32.xlu1 %v6049_v57, %s3770_s8  ;;  %3525 = vmatpush3.bf16.msra.mxu0 %v3615_v8 }
 0x174   : > { %2402 = vrot.lane.b32.xlu0 %v4758_v12, %s3771_s9  ;;  %3561 = vmatpush3.bf16.msra.mxu1 %v3615_v8 }
 0x175   : > { %v1660_v37 = vpop.permute.xlu1 %1659 }
 0x176   : > { %v1670_v47 = vpop.permute.xlu0 %1669  ;;  %1755 = vst.msk [vmem:[#allocation3 + $0x4] sm:$0xf] %vm1753_vm2, %v1660_v37 }
 0x177   : > { %1760 = vst.msk [vmem:[#allocation3 + $0x18] sm:$0xf] %vm1753_vm2, %v1670_v47  ;;  %2368 = vrot.lane.b32.xlu1 %v4588_v9, %s3771_s9 }
 0x178   : > { %2374 = vrot.lane.b32.xlu0 %v4648_v29, %s3771_s9 }
 0x179   : > { %v1664_v12 = vpop.permute.xlu1 %1663 }
 0x17a   : > { %v1674_v31 = vpop.permute.xlu0 %1673  ;;  %1757 = vst.msk [vmem:[#allocation3 + $0xc] sm:$0xf] %vm1753_vm2, %v1664_v12  ;;  %v6056_v12 = vld [vmem:[#allocation41_spill] sm:$0xff] }
 0x17b   : > { %1762 = vst.msk [vmem:[#allocation3 + $0x20] sm:$0xf] %vm1753_vm2, %v1674_v31  ;;  %2400 = vrot.lane.b32.xlu1 %v4715_v45, %s3771_s9  ;;  %v201_v31 = vld [vmem:[%s3875_s28 + $0x7c] sm:$0xf] }
 0x17c   : > { %2406 = vrot.lane.b32.xlu0 %v4772_v63, %s3771_s9 }
 0x17d   : > { %v1668_v9 = vpop.permute.xlu1 %1667 }
 0x17e   : > { %v1678_v52 = vpop.permute.xlu0 %1677  ;;  %1759 = vst.msk [vmem:[#allocation3 + $0x14] sm:$0xf] %vm1753_vm2, %v1668_v9 }
 0x17f   : > { %1764 = vst.msk [vmem:[#allocation3 + $0x28] sm:$0xf] %vm1753_vm2, %v1678_v52  ;;  %2372 = vrot.lane.b32.xlu1 %v6050_v26, %s3771_s9  ;;  %v590_v52 = vshrl.u32 %v201_v31, 16 }
 0x180   : > { %1820 = vrot.lane.b32.xlu0 %v6046_v14, %s3767_s5  ;;  %v6051_v14 = vld [vmem:[#allocation19_spill] sm:$0xff] }
 0x181   : > { %v1672_v10 = vpop.permute.xlu1 %1671 }
 0x182   : > { %v1682_v34 = vpop.permute.xlu0 %1681  ;;  %1761 = vst.msk [vmem:[#allocation3 + $0x1c] sm:$0xf] %vm1753_vm2, %v1672_v10 }
 0x183   : > { %1766 = vst.msk [vmem:[#allocation3 + $0x30] sm:$0xf] %vm1753_vm2, %v1682_v34  ;;  %2404 = vrot.lane.b32.xlu1 %v4731_v1, %s3771_s9 }
 0x184   : > { %1852 = vrot.lane.b32.xlu0 %v6047_v17, %s3767_s5  ;;  %v6052_v17 = vld [vmem:[#allocation33_spill] sm:$0xff] }
 0x185   : > { %v1676_v45 = vpop.permute.xlu1 %1675 }
 0x186   : > { %v1686_v11 = vpop.permute.xlu0 %1685  ;;  %1763 = vst.msk [vmem:[#allocation3 + $0x24] sm:$0xf] %vm1753_vm2, %v1676_v45 }
 0x187   : > { %1768 = vst.msk [vmem:[#allocation3 + $0x38] sm:$0xf] %vm1753_vm2, %v1686_v11  ;;  %1818 = vrot.lane.b32.xlu1 %v6048_v50, %s3767_s5  ;;  %v6053_v50 = vld [vmem:[#allocation17_spill] sm:$0xff]  ;;  %v592_v11 = vrot.slane %v590_v52, 7  ;;  %v6060_v52 = vld [vmem:[#allocation20_spill] sm:$0xff] }
 0x188   : > { %1824 = vrot.lane.b32.xlu0 %v6051_v14, %s3767_s5 }
 0x189   : > { %v1680_v24 = vpop.permute.xlu1 %1679 }
 0x18a   : > { %v1690_v46 = vpop.permute.xlu0 %1689  ;;  %1765 = vst.msk [vmem:[#allocation3 + $0x2c] sm:$0xf] %vm1753_vm2, %v1680_v24  ;;  %v593_v24 = vshll.u32 %v201_v31, 16 }
 0x18b   : > { %1770 = vst.msk [vmem:[#allocation3 + $0x40] sm:$0xf] %vm1753_vm2, %v1690_v46  ;;  %1850 = vrot.lane.b32.xlu1 %v6049_v57, %s3767_s5 }
 0x18c   : > { %1856 = vrot.lane.b32.xlu0 %v6052_v17, %s3767_s5 }
 0x18d   : > { %v1684_v4 = vpop.permute.xlu1 %1683 }
 0x18e   : > { %v1694_v43 = vpop.permute.xlu0 %1693  ;;  %1767 = vst.msk [vmem:[#allocation3 + $0x34] sm:$0xf] %vm1753_vm2, %v1684_v4  ;;  %v595_v4 = vor.u32 %v593_v24, %v592_v11 }
 0x18f   : > { %1772 = vst.msk [vmem:[#allocation3 + $0x48] sm:$0xf] %vm1753_vm2, %v1694_v43  ;;  %1822 = vrot.lane.b32.xlu1 %v6053_v50, %s3767_s5 }
 0x190   : > { %1957 = vrot.lane.b32.xlu0 %v4648_v29, %s3768_s6 }
 0x191   : > { %v1688_v62 = vpop.permute.xlu1 %1687 }
 0x192   : > { %v1698_v6 = vpop.permute.xlu0 %1697  ;;  %1769 = vst.msk [vmem:[#allocation3 + $0x3c] sm:$0xf] %vm1753_vm2, %v1688_v62 }
 0x193   : > { %1774 = vst.msk [vmem:[#allocation3 + $0x50] sm:$0xf] %vm1753_vm2, %v1698_v6  ;;  %1854 = vrot.lane.b32.xlu1 %v6054_v56, %s3767_s5 }
 0x194   : > { %1989 = vrot.lane.b32.xlu0 %v4772_v63, %s3768_s6  ;;  %v262_v63 = vld [vmem:[#allocation2 + $0xc0] sm:$0x1] }
 0x195   : > { %v1692_v38 = vpop.permute.xlu1 %1691  ;;  %v263_v8 = vsel %vm3846_vm3, 0, %v262_v63  ;;  %v6068_v63 = vld [vmem:[#allocation38_spill] sm:$0xff] }
 0x196   : > { %v1702_v51 = vpop.permute.xlu0 %1701  ;;  %1771 = vst.msk [vmem:[#allocation3 + $0x44] sm:$0xf] %vm1753_vm2, %v1692_v38  ;;  %264 = vst [vmem:[#allocation2 + $0xc0] sm:$0x1] %v263_v8  ;;  %v265_v38 = vld [vmem:[#allocation2 + $0xcc] sm:$0x1] }
 0x197   : > { %1776 = vst.msk [vmem:[#allocation3 + $0x58] sm:$0xf] %vm1753_vm2, %v1702_v51  ;;  %1955 = vrot.lane.b32.xlu1 %v6050_v26, %s3768_s6 }
 0x198   : > { %1961 = vrot.lane.b32.xlu0 %v4660_v58, %s3768_s6 }
 0x199   : > { %v1696_v29 = vpop.permute.xlu1 %1695 }
 0x19a   : > { %v1706_v53 = vpop.permute.xlu0 %1705  ;;  %1773 = vst.msk [vmem:[#allocation3 + $0x4c] sm:$0xf] %vm1753_vm2, %v1696_v29  ;;  %v6065_v29 = vld [vmem:[#allocation21_spill] sm:$0xff] }
 0x19b   : > { %1778 = vst.msk [vmem:[#allocation3 + $0x60] sm:$0xf] %vm1753_vm2, %v1706_v53  ;;  %1987 = vrot.lane.b32.xlu1 %v4731_v1, %s3768_s6  ;;  %v200_v1 = vld [vmem:[%s3875_s28 + $0x78] sm:$0xf]  ;;  %s3503_s28 = sshll.u32 %s3817_s16, 11  ;;  %s5859_s16 = scalar_lea.sflag [#allocation5], %s161_s25 }
 0x19c   : > { %1993 = vrot.lane.b32.xlu0 %v4790_v23, %s3768_s6  ;;  %v582_v9 = vshrl.u32 %v200_v1, 16  ;;  %v585_v45 = vshll.u32 %v200_v1, 16  ;;  %v597_v1 = vrot.slane %v592_v11, 4 }
 0x19d   : > { %v1700_v57 = vpop.permute.xlu1 %1699  ;;  %v754_v6 = vld [vmem:[#allocation2 + $0xc0] sm:$0xf] }
 0x19e   : > { %v1710_v37 = vpop.permute.xlu0 %1709  ;;  %1775 = vst.msk [vmem:[#allocation3 + $0x54] sm:$0xf] %vm1753_vm2, %v1700_v57  ;;  %v584_v34 = vrot.slane %v582_v9, 7 }
 0x19f   : > { %1780 = vst.msk [vmem:[#allocation3 + $0x68] sm:$0xf] %vm1753_vm2, %v1710_v37  ;;  %1959 = vrot.lane.b32.xlu1 %v6056_v12, %s3768_s6 }
 0x1a0   : > { %2088 = vrot.lane.b32.xlu0 %v4066_v22, %s3769_s7  ;;  %v587_v22 = vor.u32 %v585_v45, %v584_v34  ;;  %v588_v46 = vrot.slane %v584_v34, 4 }
 0x1a1   : > { %v1704_v26 = vpop.permute.xlu1 %1703 }
 0x1a2   : > { %v1813_v10 = vpop.permute.xlu0 %1812  ;;  %1777 = vst.msk [vmem:[#allocation3 + $0x5c] sm:$0xf] %vm1753_vm2, %v1704_v26  ;;  %v755_v51 = vsel %vm3899_vm9, %v587_v22, %v754_v6  ;;  %v596_v53 = vsel %vm3906_vm10, %v588_v46, %v595_v4  ;;  %vm2327_vm9 = vcmask 191656   ;;  %vm3264_vm10 = vcmask 519168  }
 0x1a3   : > { %1908 = vst.msk [vmem:[#allocation3 + $0x4] sm:$0xf] %vm1906_vm7, %v1813_v10  ;;  %1991 = vrot.lane.b32.xlu1 %v4747_v36, %s3768_s6  ;;  %756 = vst [vmem:[#allocation2 + $0xc0] sm:$0xf] %v755_v51  ;;  %v266_v51 = vsel %vm3846_vm3, 0, %v265_v38  ;;  %v6074_v38 = vld [vmem:[#allocation39_spill] sm:$0xff] }
 0x1a4   : > { %2120 = vrot.lane.b32.xlu0 %v4419_v61, %s3769_s7  ;;  %757 = vst.msk [vmem:[#allocation2 + $0xc4] sm:$0xf] %vm202_vm0, %v596_v53  ;;  %v318_v61 = vld [vmem:[#allocation2 + $0xc8] sm:$0x1]  ;;  %vm2043_vm0 = vcmask 142456  }
 0x1a5   : > { %v1708_v43 = vpop.permute.xlu1 %1707  ;;  %v319_v57 = vsel %vm3854_vm5, 0, %v318_v61  ;;  %267 = vst [vmem:[#allocation2 + $0xcc] sm:$0x1] %v266_v51  ;;  %v6075_v51 = vld [vmem:[#allocation44_spill] sm:$0xff] }
 0x1a6   : > { %v1845_v62 = vpop.permute.xlu0 %1844  ;;  %1779 = vst.msk [vmem:[#allocation3 + $0x64] sm:$0xf] %vm1753_vm2, %v1708_v43  ;;  %320 = vst [vmem:[#allocation2 + $0xc8] sm:$0x1] %v319_v57  ;;  %v6066_v57 = vld [vmem:[#allocation35_spill] sm:$0xff] }
 0x1a7   : > { %1924 = vst.msk [vmem:[#allocation3 + $0x44] sm:$0xf] %vm1906_vm7, %v1845_v62  ;;  %2086 = vrot.lane.b32.xlu1 %v4064_v21, %s3769_s7 }
 0x1a8   : > { %2092 = vrot.lane.b32.xlu0 %v4106_v16, %s3769_s7 }
 0x1a9   : > { %v1811_v37 = vpop.permute.xlu1 %1810 }
 0x1aa   : > { %v1817_v8 = vpop.permute.xlu0 %1816  ;;  %1907 = vst.msk [vmem:[#allocation3] sm:$0xf] %vm1906_vm7, %v1811_v37 }
 0x1ab   : > { %1910 = vst.msk [vmem:[#allocation3 + $0xc] sm:$0xf] %vm1906_vm7, %v1817_v8  ;;  %2118 = vrot.lane.b32.xlu1 %v4394_v48, %s3769_s7  ;;  %v321_v8 = vld [vmem:[#allocation2 + $0xd4] sm:$0x1] }
 0x1ac   : > { %2124 = vrot.lane.b32.xlu0 %v4461_v20, %s3769_s7 }
 0x1ad   : > { %v1843_v21 = vpop.permute.xlu1 %1842  ;;  %v758_v31 = vld [vmem:[#allocation2 + $0xc8] sm:$0x1] }
 0x1ae   : > { %v1849_v16 = vpop.permute.xlu0 %1848  ;;  %1923 = vst.msk [vmem:[#allocation3 + $0x40] sm:$0xf] %vm1906_vm7, %v1843_v21  ;;  %v759_v20 = vsel %vm3846_vm3, %v597_v1, %v758_v31  ;;  %vm2464_vm3 = vcmask 216256   ;;  %v322_v1 = vsel %vm3854_vm5, 0, %v321_v8  ;;  %v6067_v31 = vld [vmem:[#allocation23_spill] sm:$0xff]  ;;  %vm2631_vm5 = vcmask 220160  }
 0x1af   : > { %1926 = vst.msk [vmem:[#allocation3 + $0x4c] sm:$0xf] %vm1906_vm7, %v1849_v16  ;;  %2090 = vrot.lane.b32.xlu1 %v4096_v42, %s3769_s7  ;;  %760 = vst [vmem:[#allocation2 + $0xc8] sm:$0x1] %v759_v20  ;;  %v6069_v20 = vld [vmem:[#allocation43_spill] sm:$0xff] }
 0x1b0   : > { %2241 = vrot.lane.b32.xlu0 %v6051_v14, %s3770_s8  ;;  %323 = vst [vmem:[#allocation2 + $0xd4] sm:$0x1] %v322_v1 }
 0x1b1   : > { %v1815_v9 = vpop.permute.xlu1 %1814 }
 0x1b2   : > { %v1950_v48 = vpop.permute.xlu0 %1949  ;;  %1909 = vst.msk [vmem:[#allocation3 + $0x8] sm:$0xf] %vm1906_vm7, %v1815_v9 }
 0x1b3   : > { %2045 = vst.msk [vmem:[#allocation3 + $0x4] sm:$0xf] %vm2043_vm0, %v1950_v48  ;;  %2122 = vrot.lane.b32.xlu1 %v4459_v27, %s3769_s7  ;;  %v6061_v27 = vld [vmem:[#allocation36_spill] sm:$0xff] }
 0x1b4   : > { %2273 = vrot.lane.b32.xlu0 %v6052_v17, %s3770_s8 }
 0x1b5   : > { %v1847_v42 = vpop.permute.xlu1 %1846 }
 0x1b6   : > { %v1982_v14 = vpop.permute.xlu0 %1981  ;;  %1925 = vst.msk [vmem:[#allocation3 + $0x48] sm:$0xf] %vm1906_vm7, %v1847_v42 }
 0x1b7   : > { %2061 = vst.msk [vmem:[#allocation3 + $0x44] sm:$0xf] %vm2043_vm0, %v1982_v14  ;;  %2239 = vrot.lane.b32.xlu1 %v6053_v50, %s3770_s8  ;;  %v6062_v50 = vld [vmem:[#allocation18_spill] sm:$0xff] }
 0x1b8   : > { %2245 = vrot.lane.b32.xlu0 %v6060_v52, %s3770_s8 }
 0x1b9   : > { %v1948_v26 = vpop.permute.xlu1 %1947 }
 0x1ba   : > { %v1954_v10 = vpop.permute.xlu0 %1953  ;;  %2044 = vst.msk [vmem:[#allocation3] sm:$0xf] %vm2043_vm0, %v1948_v26 }
 0x1bb   : > { %2047 = vst.msk [vmem:[#allocation3 + $0xc] sm:$0xf] %vm2043_vm0, %v1954_v10  ;;  %2271 = vrot.lane.b32.xlu1 %v6054_v56, %s3770_s8  ;;  %v6063_v56 = vld [vmem:[#allocation34_spill] sm:$0xff] }
 0x1bc   : > { %2277 = vrot.lane.b32.xlu0 %v6061_v27, %s3770_s8 }
 0x1bd   : > { %v1980_v17 = vpop.permute.xlu1 %1979 }
 0x1be   : > { %v1986_v34 = vpop.permute.xlu0 %1985  ;;  %2060 = vst.msk [vmem:[#allocation3 + $0x40] sm:$0xf] %vm2043_vm0, %v1980_v17 }
 0x1bf   : > { %2063 = vst.msk [vmem:[#allocation3 + $0x4c] sm:$0xf] %vm2043_vm0, %v1986_v34  ;;  %2243 = vrot.lane.b32.xlu1 %v6062_v50, %s3770_s8 }
 0x1c0   : > { %2378 = vrot.lane.b32.xlu0 %v4660_v58, %s3771_s9 }
 0x1c1   : > { %v1952_v45 = vpop.permute.xlu1 %1951 }
 0x1c2   : > { %v2081_v11 = vpop.permute.xlu0 %2080  ;;  %2046 = vst.msk [vmem:[#allocation3 + $0x8] sm:$0xf] %vm2043_vm0, %v1952_v45 }
 0x1c3   : > { %2176 = vst.msk [vmem:[#allocation3 + $0x4] sm:$0xf] %vm2174_vm8, %v2081_v11  ;;  %2275 = vrot.lane.b32.xlu1 %v6063_v56, %s3770_s8 }
 0x1c4   : > { %2410 = vrot.lane.b32.xlu0 %v4790_v23, %s3771_s9 }
 0x1c5   : > { %v1984_v24 = vpop.permute.xlu1 %1983 }
 0x1c6   : > { %v2113_v22 = vpop.permute.xlu0 %2112  ;;  %2062 = vst.msk [vmem:[#allocation3 + $0x48] sm:$0xf] %vm2043_vm0, %v1984_v24 }
 0x1c7   : > { %2192 = vst.msk [vmem:[#allocation3 + $0x44] sm:$0xf] %vm2174_vm8, %v2113_v22  ;;  %2376 = vrot.lane.b32.xlu1 %v6056_v12, %s3771_s9  ;;  %v6064_v12 = vld [vmem:[#allocation42_spill] sm:$0xff] }
 0x1c8   : > { %2382 = vrot.lane.b32.xlu0 %v4679_v18, %s3771_s9 }
 0x1c9   : > { %v2079_v58 = vpop.permute.xlu1 %2078 }
 0x1ca   : > { %v2085_v46 = vpop.permute.xlu0 %2084  ;;  %2175 = vst.msk [vmem:[#allocation3] sm:$0xf] %vm2174_vm8, %v2079_v58 }
 0x1cb   : > { %2178 = vst.msk [vmem:[#allocation3 + $0xc] sm:$0xf] %vm2174_vm8, %v2085_v46  ;;  %2408 = vrot.lane.b32.xlu1 %v4747_v36, %s3771_s9 }
 0x1cc   : > { %2414 = vrot.lane.b32.xlu0 %v4804_v15, %s3771_s9 }
 0x1cd   : > { %v2111_v23 = vpop.permute.xlu1 %2110 }
 0x1ce   : > { %v2117_v4 = vpop.permute.xlu0 %2116  ;;  %2191 = vst.msk [vmem:[#allocation3 + $0x40] sm:$0xf] %vm2174_vm8, %v2111_v23 }
 0x1cf   : > { %2194 = vst.msk [vmem:[#allocation3 + $0x4c] sm:$0xf] %vm2174_vm8, %v2117_v4  ;;  %2380 = vrot.lane.b32.xlu1 %v6064_v12, %s3771_s9 }
 0x1d0   : > { %1826 = vrot.lane.b32.xlu0 %v6062_v50, %s3767_s5 }
 0x1d1   : > { %v2083_v43 = vpop.permute.xlu1 %2082 }
 0x1d2   : > { %v2234_v62 = vpop.permute.xlu0 %2233  ;;  %2177 = vst.msk [vmem:[#allocation3 + $0x8] sm:$0xf] %vm2174_vm8, %v2083_v43 }
 0x1d3   : > { %2329 = vst.msk [vmem:[#allocation3 + $0x4] sm:$0xf] %vm2327_vm9, %v2234_v62  ;;  %2412 = vrot.lane.b32.xlu1 %v4762_v39, %s3771_s9  ;;  %v6073_v62 = vld [vmem:[#allocation25_spill] sm:$0xff] }
 0x1d4   : > { %1858 = vrot.lane.b32.xlu0 %v6063_v56, %s3767_s5 }
 0x1d5   : > { %v2115_v36 = vpop.permute.xlu1 %2114 }
 0x1d6   : > { %v2266_v6 = vpop.permute.xlu0 %2265  ;;  %2193 = vst.msk [vmem:[#allocation3 + $0x48] sm:$0xf] %vm2174_vm8, %v2115_v36 }
 0x1d7   : > { %2345 = vst.msk [vmem:[#allocation3 + $0x44] sm:$0xf] %vm2327_vm9, %v2266_v6  ;;  %1711 = vrot.lane.b32.xlu1 %v4496_v59, %s3766_s4 }
 0x1d8   : > { %1830 = vrot.lane.b32.xlu0 %v6065_v29, %s3767_s5 }
 0x1d9   : > { %v2232_v53 = vpop.permute.xlu1 %2231 }
 0x1da   : > { %v2238_v61 = vpop.permute.xlu0 %2237  ;;  %2328 = vst.msk [vmem:[#allocation3] sm:$0xf] %vm2327_vm9, %v2232_v53 }
 0x1db   : > { %2331 = vst.msk [vmem:[#allocation3 + $0xc] sm:$0xf] %vm2327_vm9, %v2238_v61  ;;  %1828 = vrot.lane.b32.xlu1 %v6060_v52, %s3767_s5 }
 0x1dc   : > { %1862 = vrot.lane.b32.xlu0 %v6066_v57, %s3767_s5 }
 0x1dd   : > { %v2264_v47 = vpop.permute.xlu1 %2263 }
 0x1de   : > { %v2270_v37 = vpop.permute.xlu0 %2269  ;;  %2344 = vst.msk [vmem:[#allocation3 + $0x40] sm:$0xf] %vm2327_vm9, %v2264_v47 }
 0x1df   : > { %2347 = vst.msk [vmem:[#allocation3 + $0x4c] sm:$0xf] %vm2327_vm9, %v2270_v37  ;;  %1860 = vrot.lane.b32.xlu1 %v6061_v27, %s3767_s5 }
 0x1e0   : > { %1963 = vrot.lane.b32.xlu0 %v6064_v12, %s3768_s6 }
 0x1e1   : > { %v2236_v21 = vpop.permute.xlu1 %2235 }
 0x1e2   : > { %v2371_v16 = vpop.permute.xlu0 %2370  ;;  %2330 = vst.msk [vmem:[#allocation3 + $0x8] sm:$0xf] %vm2327_vm9, %v2236_v21 }
 0x1e3   : > { %2466 = vst.msk [vmem:[#allocation3 + $0x4] sm:$0xf] %vm2464_vm3, %v2371_v16  ;;  %1832 = vrot.lane.b32.xlu1 %v6067_v31, %s3767_s5  ;;  %v6076_v16 = vld [vmem:[#allocation47_spill] sm:$0xff] }
 0x1e4   : > { %1995 = vrot.lane.b32.xlu0 %v4762_v39, %s3768_s6 }
 0x1e5   : > { %v2268_v9 = vpop.permute.xlu1 %2267 }
 0x1e6   : > { %v2403_v48 = vpop.permute.xlu0 %2402  ;;  %2346 = vst.msk [vmem:[#allocation3 + $0x48] sm:$0xf] %vm2327_vm9, %v2268_v9 }
 0x1e7   : > { %2482 = vst.msk [vmem:[#allocation3 + $0x44] sm:$0xf] %vm2464_vm3, %v2403_v48  ;;  %1864 = vrot.lane.b32.xlu1 %v6068_v63, %s3767_s5 }
 0x1e8   : > { %1967 = vrot.lane.b32.xlu0 %v6069_v20, %s3768_s6 }
 0x1e9   : > { %v2369_v42 = vpop.permute.xlu1 %2368 }
 0x1ea   : > { %v2375_v14 = vpop.permute.xlu0 %2374  ;;  %2465 = vst.msk [vmem:[#allocation3] sm:$0xf] %vm2464_vm3, %v2369_v42 }
 0x1eb   : > { %2468 = vst.msk [vmem:[#allocation3 + $0xc] sm:$0xf] %vm2464_vm3, %v2375_v14  ;;  %1965 = vrot.lane.b32.xlu1 %v4679_v18, %s3768_s6  ;;  %v6070_v18 = vld [vmem:[#allocation46_spill] sm:$0xff] }
 0x1ec   : > { %1999 = vrot.lane.b32.xlu0 %v4779_v19, %s3768_s6 }
 0x1ed   : > { %v2401_v39 = vpop.permute.xlu1 %2400 }
 0x1ee   : > { %v2407_v52 = vpop.permute.xlu0 %2406  ;;  %2481 = vst.msk [vmem:[#allocation3 + $0x40] sm:$0xf] %vm2464_vm3, %v2401_v39 }
 0x1ef   : > { %2484 = vst.msk [vmem:[#allocation3 + $0x4c] sm:$0xf] %vm2464_vm3, %v2407_v52  ;;  %1997 = vrot.lane.b32.xlu1 %v4804_v15, %s3768_s6 }
 0x1f0   : > { %2094 = vrot.lane.b32.xlu0 %v4138_v60, %s3769_s7 }
 0x1f1   : > { %v2373_v26 = vpop.permute.xlu1 %2372  ;;  %v3614_v10 = vld [vmem:[#allocation3] sm:$0xff]  }
 0x1f2   : > { %v1821_v27 = vpop.permute.xlu0 %1820  ;;  %2467 = vst.msk [vmem:[#allocation3 + $0x8] sm:$0xf] %vm2464_vm3, %v2373_v26  ;;  %3526 = vmatprep.mubr.msk.bf16.mxu0 %vm2631_vm5, %v3614_v10 }
 0x1f3   : > { %1912 = vst.msk [vmem:[#allocation3 + $0x14] sm:$0xf] %vm1906_vm7, %v1821_v27  ;;  %1969 = vrot.lane.b32.xlu1 %v6070_v18, %s3768_s6 }
 0x1f4   : > { %2126 = vrot.lane.b32.xlu0 %v4486_v49, %s3769_s7 }
 0x1f5   : > { %v2405_v15 = vpop.permute.xlu1 %2404  ;;  %v3616_v17 = vld [vmem:[#allocation3 + $0x40] sm:$0xff]  }
 0x1f6   : > { %v1853_v34 = vpop.permute.xlu0 %1852  ;;  %2483 = vst.msk [vmem:[#allocation3 + $0x48] sm:$0xf] %vm2464_vm3, %v2405_v15  ;;  %3542 = vmatprep.mubr.msk.bf16.mxu1 %vm2631_vm5, %v3616_v17 }
 0x1f7   : > { %1928 = vst.msk [vmem:[#allocation3 + $0x54] sm:$0xf] %vm1906_vm7, %v1853_v34  ;;  %2001 = vrot.lane.b32.xlu1 %v4813_v25, %s3768_s6 }
 0x1f8   : > { %2098 = vrot.lane.b32.xlu0 %v4182_v3, %s3769_s7 }
 0x1f9   : > { %v1819_v60 = vpop.permute.xlu1 %1818  ;;  %v3617_v50 = vld [vmem:[#allocation3 + $0x8] sm:$0xff]  }
 0x1fa   : > { %v1825_v45 = vpop.permute.xlu0 %1824  ;;  %1911 = vst.msk [vmem:[#allocation3 + $0x10] sm:$0xf] %vm1906_vm7, %v1819_v60  ;;  %3527 = vmatmul.mubr.msk.bf16.vlgmr.msra.gmra.mxu0 %vm2631_vm5, %v3617_v50  ;;  %v811_v60 = vld [vmem:[#allocation2 + $0xc8] sm:$0x1] }
 0x1fb   : > { %1914 = vst.msk [vmem:[#allocation3 + $0x1c] sm:$0xf] %vm1906_vm7, %v1825_v45  ;;  %2096 = vrot.lane.b32.xlu1 %v4129_v54, %s3769_s7  ;;  %v1806_v45 = vshll.u32 %v811_v60, 16 }
 0x1fc   : > { %2130 = vrot.lane.b32.xlu0 %v4521_v32, %s3769_s7 }
 0x1fd   : > { %v1851_v49 = vpop.permute.xlu1 %1850  ;;  %v3618_v11 = vld [vmem:[#allocation3 + $0x48] sm:$0xff]  }
 0x1fe   : > { %v1857_v56 = vpop.permute.xlu0 %1856  ;;  %1927 = vst.msk [vmem:[#allocation3 + $0x50] sm:$0xf] %vm1906_vm7, %v1851_v49  ;;  %3543 = vmatmul.mubr.msk.bf16.vlgmr.msra.gmra.mxu1 %vm2631_vm5, %v3618_v11 }
 0x1ff   : > { %1930 = vst.msk [vmem:[#allocation3 + $0x5c] sm:$0xf] %vm1906_vm7, %v1857_v56  ;;  %2128 = vrot.lane.b32.xlu1 %v4496_v59, %s3769_s7  ;;  %v6071_v59 = vld [vmem:[#allocation22_spill] sm:$0xff] }
 0x200   : > { %2247 = vrot.lane.b32.xlu0 %v6065_v29, %s3770_s8 }
 0x201   : > { %v1823_v54 = vpop.permute.xlu1 %1822 }
 0x202   : > { %v1958_v3 = vpop.permute.xlu0 %1957  ;;  %1913 = vst.msk [vmem:[#allocation3 + $0x18] sm:$0xf] %vm1906_vm7, %v1823_v54  ;;  %v1808_v54 = vrot.slane %v1806_v45, 5 }
 0x203   : > { %2049 = vst.msk [vmem:[#allocation3 + $0x14] sm:$0xf] %vm2043_vm0, %v1958_v3  ;;  %2100 = vrot.lane.b32.xlu1 %v4164_v30, %s3769_s7  ;;  %v6072_v30 = vld [vmem:[#allocation37_spill] sm:$0xff] }
 0x204   : > { %2279 = vrot.lane.b32.xlu0 %v6066_v57, %s3770_s8  ;;  %v5279_v57 = vld [vmem:[#allocation2 + $0xc0] sm:$0xf] }
 0x205   : > { %v1855_v24 = vpop.permute.xlu1 %1854  ;;  %v1787_v8 = vshrl.u32 %v5279_v57, 16  ;;  %v1790_v21 = vshll.u32 %v5279_v57, 16 }
 0x206   : > { %v1990_v22 = vpop.permute.xlu0 %1989  ;;  %1929 = vst.msk [vmem:[#allocation3 + $0x58] sm:$0xf] %vm1906_vm7, %v1855_v24 }
 0x207   : > { %2065 = vst.msk [vmem:[#allocation3 + $0x54] sm:$0xf] %vm2043_vm0, %v1990_v22  ;;  %2132 = vrot.lane.b32.xlu1 %v4523_v55, %s3769_s7  ;;  %v1789_v1 = vrot.slane %v1787_v8, 4  ;;  %v6079_v22 = vld [vmem:[#allocation26_spill] sm:$0xff] }
 0x208   : > { %2251 = vrot.lane.b32.xlu0 %v6071_v59, %s3770_s8 }
 0x209   : > { %v1956_v58 = vpop.permute.xlu1 %1955 }
 0x20a   : > { %v1962_v46 = vpop.permute.xlu0 %1961  ;;  %2048 = vst.msk [vmem:[#allocation3 + $0x10] sm:$0xf] %vm2043_vm0, %v1956_v58 }
 0x20b   : > { %2051 = vst.msk [vmem:[#allocation3 + $0x1c] sm:$0xf] %vm2043_vm0, %v1962_v46  ;;  %2249 = vrot.lane.b32.xlu1 %v6067_v31, %s3770_s8  ;;  %v1792_v31 = vrot.slane %v1790_v21, 5  ;;  %v5381_v21 = vld [vmem:[#allocation2 + $0xcc] sm:$0xf] }
 0x20c   : > { %2283 = vrot.lane.b32.xlu0 %v6072_v30, %s3770_s8 }
 0x20d   : > { %v1988_v23 = vpop.permute.xlu1 %1987 }
 0x20e   : > { %v1994_v4 = vpop.permute.xlu0 %1993  ;;  %2064 = vst.msk [vmem:[#allocation3 + $0x50] sm:$0xf] %vm2043_vm0, %v1988_v23 }
 0x20f   : > { %2067 = vst.msk [vmem:[#allocation3 + $0x5c] sm:$0xf] %vm2043_vm0, %v1994_v4  ;;  %2281 = vrot.lane.b32.xlu1 %v6068_v63, %s3770_s8  ;;  %v1793_v63 = vor.u32 %v1792_v31, %v1789_v1  ;;  %v6080_v4 = vld [vmem:[#allocation45_spill] sm:$0xff] }
 0x210   : > { %2384 = vrot.lane.b32.xlu0 %v6069_v20, %s3771_s9  ;;  %v5296_v20 = vld [vmem:[#allocation2 + $0xc4] sm:$0xf] }
 0x211   : > { %v1960_v12 = vpop.permute.xlu1 %1959  ;;  %v1796_v42 = vshll.u32 %v5296_v20, 16  ;;  %v1800_v14 = vshrl.u32 %v5296_v20, 16  ;;  %v1794_v26 = vrot.slane %v1793_v63, 4  ;;  %v1942_v23 = vrot.slane %v5296_v20, 5 }
 0x212   : > { %v2089_v43 = vpop.permute.xlu0 %2088  ;;  %2050 = vst.msk [vmem:[#allocation3 + $0x18] sm:$0xf] %vm2043_vm0, %v1960_v12 }
 0x213   : > { %2180 = vst.msk [vmem:[#allocation3 + $0x14] sm:$0xf] %vm2174_vm8, %v2089_v43  ;;  %2253 = vrot.lane.b32.xlu1 %v6073_v62, %s3770_s8  ;;  %v1798_v10 = vrot.slane %v1796_v42, 5  ;;  %v1802_v27 = vrot.slane %v1800_v14, 4  ;;  %v813_v42 = vld [vmem:[#allocation2 + $0xd0] sm:$0xf] }
 0x214   : > { %2416 = vrot.lane.b32.xlu0 %v4779_v19, %s3771_s9  ;;  %v2217_v14 = vshll.u32 %v813_v42, 16 }
 0x215   : > { %v1992_v36 = vpop.permute.xlu1 %1991  ;;  %v5313_v34 = vsel %vm3930_vm11, %v1794_v26, %v1798_v10  ;;  %v1803_v50 = vor.u32 %v1802_v27, %v1798_v10 }
 0x216   : > { %v2121_v6 = vpop.permute.xlu0 %2120  ;;  %2066 = vst.msk [vmem:[#allocation3 + $0x58] sm:$0xf] %vm2043_vm0, %v1992_v36  ;;  %v2219_v10 = vrot.slane %v2217_v14, 5 }
 0x217   : > { %2196 = vst.msk [vmem:[#allocation3 + $0x54] sm:$0xf] %vm2174_vm8, %v2121_v6  ;;  %2285 = vrot.lane.b32.xlu1 %v6074_v38, %s3770_s8  ;;  %v1804_v56 = vrot.slane %v1803_v50, 4 }
 0x218   : > { %2388 = vrot.lane.b32.xlu0 %v6075_v51, %s3771_s9 }
 0x219   : > { %v2087_v29 = vpop.permute.xlu1 %2086 }
 0x21a   : > { %v2093_v53 = vpop.permute.xlu0 %2092  ;;  %2179 = vst.msk [vmem:[#allocation3 + $0x10] sm:$0xf] %vm2174_vm8, %v2087_v29  ;;  %v1945_v29 = vrot.slane %v811_v60, 5 }
 0x21b   : > { %2182 = vst.msk [vmem:[#allocation3 + $0x1c] sm:$0xf] %vm2174_vm8, %v2093_v53  ;;  %2386 = vrot.lane.b32.xlu1 %v6070_v18, %s3771_s9 }
 0x21c   : > { %2420 = vrot.lane.b32.xlu0 %v4795_v41, %s3771_s9 }
 0x21d   : > { %v2119_v19 = vpop.permute.xlu1 %2118 }
 0x21e   : > { %v2125_v61 = vpop.permute.xlu0 %2124  ;;  %2195 = vst.msk [vmem:[#allocation3 + $0x50] sm:$0xf] %vm2174_vm8, %v2119_v19 }
 0x21f   : > { %2198 = vst.msk [vmem:[#allocation3 + $0x5c] sm:$0xf] %vm2174_vm8, %v2125_v61  ;;  %2418 = vrot.lane.b32.xlu1 %v4813_v25, %s3771_s9 }
 0x220   : > { %1713 = vrot.lane.b32.xlu0 %v4521_v32, %s3766_s4 }
 0x221   : > { %v2091_v47 = vpop.permute.xlu1 %2090 }
 0x222   : > { %v2242_v37 = vpop.permute.xlu0 %2241  ;;  %2181 = vst.msk [vmem:[#allocation3 + $0x18] sm:$0xf] %vm2174_vm8, %v2091_v47  ;;  %v6081_v47 = vld [vmem:[#allocation48_spill] sm:$0xff] }
 0x223   : > { %2333 = vst.msk [vmem:[#allocation3 + $0x14] sm:$0xf] %vm2327_vm9, %v2242_v37  ;;  %2390 = vrot.lane.b32.xlu1 %v6076_v16, %s3771_s9 }
 0x224   : > { %1717 = vrot.lane.b32.xlu0 %v5279_v57, %s3766_s4 }
 0x225   : > { %v2123_v25 = vpop.permute.xlu1 %2122 }
 0x226   : > { %v2274_v32 = vpop.permute.xlu0 %2273  ;;  %2197 = vst.msk [vmem:[#allocation3 + $0x58] sm:$0xf] %vm2174_vm8, %v2123_v25 }
 0x227   : > { %2349 = vst.msk [vmem:[#allocation3 + $0x54] sm:$0xf] %vm2327_vm9, %v2274_v32  ;;  %2422 = vrot.lane.b32.xlu1 %v4824_v2, %s3771_s9  ;;  %v2211_v32 = vshll.u32 %v5381_v21, 16 }
 0x228   : > { %1834 = vrot.lane.b32.xlu0 %v6071_v59, %s3767_s5  ;;  %v5333_v59 = vsel %vm3930_vm11, %v1804_v56, %v1808_v54 }
 0x229   : > { %v2240_v9 = vpop.permute.xlu1 %2239  ;;  %v2213_v31 = vrot.slane %v2211_v32, 5 }
 0x22a   : > { %v2246_v48 = vpop.permute.xlu0 %2245  ;;  %2332 = vst.msk [vmem:[#allocation3 + $0x10] sm:$0xf] %vm2327_vm9, %v2240_v9 }
 0x22b   : > { %2335 = vst.msk [vmem:[#allocation3 + $0x1c] sm:$0xf] %vm2327_vm9, %v2246_v48  ;;  %1715 = vrot.lane.b32.xlu1 %v4523_v55, %s3766_s4  ;;  %v6077_v55 = vld [vmem:[#allocation24_spill] sm:$0xff] }
 0x22c   : > { %1866 = vrot.lane.b32.xlu0 %v6072_v30, %s3767_s5  ;;  %v3396_v30 = vrot.slane %v5279_v57, 9 }
 0x22d   : > { %v2272_v39 = vpop.permute.xlu1 %2271 }
 0x22e   : > { %v2278_v52 = vpop.permute.xlu0 %2277  ;;  %2348 = vst.msk [vmem:[#allocation3 + $0x50] sm:$0xf] %vm2327_vm9, %v2272_v39  ;;  %v2221_v39 = vshrl.u32 %v813_v42, 16 }
 0x22f   : > { %2351 = vst.msk [vmem:[#allocation3 + $0x5c] sm:$0xf] %vm2327_vm9, %v2278_v52  ;;  %1719 = vrot.lane.b32.xlu1 %v5296_v20, %s3766_s4 }
 0x230   : > { %1838 = vrot.lane.b32.xlu0 %v6077_v55, %s3767_s5 }
 0x231   : > { %v2244_v18 = vpop.permute.xlu1 %2243 }
 0x232   : > { %v2379_v15 = vpop.permute.xlu0 %2378  ;;  %2334 = vst.msk [vmem:[#allocation3 + $0x18] sm:$0xf] %vm2327_vm9, %v2244_v18 }
 0x233   : > { %2470 = vst.msk [vmem:[#allocation3 + $0x14] sm:$0xf] %vm2464_vm3, %v2379_v15  ;;  %1836 = vrot.lane.b32.xlu1 %v6073_v62, %s3767_s5  ;;  %v814_v15 = vld [vmem:[#allocation2 + $0xd4] sm:$0x1] }
 0x234   : > { %1870 = vrot.lane.b32.xlu0 %v5313_v34, %s3767_s5  ;;  %v2227_v60 = vshll.u32 %v814_v15, 16 }
 0x235   : > { %v2276_v49 = vpop.permute.xlu1 %2275 }
 0x236   : > { %v2411_v11 = vpop.permute.xlu0 %2410  ;;  %2350 = vst.msk [vmem:[#allocation3 + $0x58] sm:$0xf] %vm2327_vm9, %v2276_v49  ;;  %v2229_v49 = vrot.slane %v2227_v60, 5 }
 0x237   : > { %2486 = vst.msk [vmem:[#allocation3 + $0x54] sm:$0xf] %vm2464_vm3, %v2411_v11  ;;  %1868 = vrot.lane.b32.xlu1 %v6074_v38, %s3767_s5 }
 0x238   : > { %1971 = vrot.lane.b32.xlu0 %v6075_v51, %s3768_s6  ;;  %v1944_v51 = vrot.slane %v1942_v23, 4 }
 0x239   : > { %v2377_v3 = vpop.permute.xlu1 %2376 }
 0x23a   : > { %v2383_v24 = vpop.permute.xlu0 %2382  ;;  %2469 = vst.msk [vmem:[#allocation3 + $0x10] sm:$0xf] %vm2464_vm3, %v2377_v3  ;;  %v3397_v3 = vrot.slane %v5381_v21, 9 }
 0x23b   : > { %2472 = vst.msk [vmem:[#allocation3 + $0x1c] sm:$0xf] %vm2464_vm3, %v2383_v24  ;;  %1840 = vrot.lane.b32.xlu1 %v6079_v22, %s3767_s5 }
 0x23c   : > { %2003 = vrot.lane.b32.xlu0 %v4795_v41, %s3768_s6  ;;  %v5347_v41 = vsel %vm4552_vm14, %v3396_v30, %v1942_v23  ;;  %v2366_v23 = vrot.slane %v814_v15, 5 }
 0x23d   : > { %v2409_v58 = vpop.permute.xlu1 %2408 }
 0x23e   : > { %v2415_v46 = vpop.permute.xlu0 %2414  ;;  %2485 = vst.msk [vmem:[#allocation3 + $0x50] sm:$0xf] %vm2464_vm3, %v2409_v58 }
 0x23f   : > { %2488 = vst.msk [vmem:[#allocation3 + $0x5c] sm:$0xf] %vm2464_vm3, %v2415_v46  ;;  %1872 = vrot.lane.b32.xlu1 %v5333_v59, %s3767_s5  ;;  %s5851_s5 = scalar_lea.hbm %s5902_s3, %s3503_s28 }
 0x240   : > { %1975 = vrot.lane.b32.xlu0 %v6080_v4, %s3768_s6 }
 0x241   : > { %v2381_v12 = vpop.permute.xlu1 %2380  ;;  %v3619_v43 = vld [vmem:[#allocation3 + $0x10] sm:$0xff]  }
 0x242   : > { %v1827_v62 = vpop.permute.xlu0 %1826  ;;  %2471 = vst.msk [vmem:[#allocation3 + $0x18] sm:$0xf] %vm2464_vm3, %v2381_v12  ;;  %3530 = vmatprep.mubr.msk.bf16.mxu0 %vm2631_vm5, %v3619_v43 }
 0x243   : > { %1915 = vst.msk [vmem:[#allocation3 + $0x20] sm:$0xf] %vm1906_vm7, %v1827_v62  ;;  %1973 = vrot.lane.b32.xlu1 %v6076_v16, %s3768_s6 }
 0x244   : > { %2007 = vrot.lane.b32.xlu0 %v5347_v41, %s3768_s6 }
 0x245   : > { %v2413_v36 = vpop.permute.xlu1 %2412  ;;  %v3620_v6 = vld [vmem:[#allocation3 + $0x50] sm:$0xff]  }
 0x246   : > { %v1859_v38 = vpop.permute.xlu0 %1858  ;;  %2487 = vst.msk [vmem:[#allocation3 + $0x58] sm:$0xf] %vm2464_vm3, %v2413_v36  ;;  %3546 = vmatprep.mubr.msk.bf16.mxu1 %vm2631_vm5, %v3620_v6 }
 0x247   : > { %1931 = vst.msk [vmem:[#allocation3 + $0x60] sm:$0xf] %vm1906_vm7, %v1859_v38  ;;  %2005 = vrot.lane.b32.xlu1 %v4824_v2, %s3768_s6  ;;  %v5370_v2 = vsel %vm4552_vm14, %v1944_v51, %v1945_v29 }
 0x248   : > { %2102 = vrot.lane.b32.xlu0 %v4210_v0, %s3769_s7 }
 0x249   : > { %v1712_v53 = vpop.permute.xlu1 %1711  ;;  %v3621_v19 = vld [vmem:[#allocation3 + $0x18] sm:$0xff]  }
 0x24a   : > { %v1831_v61 = vpop.permute.xlu0 %1830  ;;  %1781 = vst.msk [vmem:[#allocation3 + $0x6c] sm:$0xf] %vm1753_vm2, %v1712_v53  ;;  %3531 = vmatmul.mubr.msk.bf16.gmra.mxu0 %vm2631_vm5, %v3621_v19 }
 0x24b   : > { %1917 = vst.msk [vmem:[#allocation3 + $0x28] sm:$0xf] %vm1906_vm7, %v1831_v61  ;;  %1977 = vrot.lane.b32.xlu1 %v6081_v47, %s3768_s6 }
 0x24c   : > { %2134 = vrot.lane.b32.xlu0 %v5279_v57, %s3769_s7  ;;  %v2208_v57 = vshrl.u32 %v5381_v21, 16 }
 0x24d   : > { %v1829_v0 = vpop.permute.xlu1 %1828  ;;  %v3622_v37 = vld [vmem:[#allocation3 + $0x58] sm:$0xff]  }
 0x24e   : > { %v1863_v8 = vpop.permute.xlu0 %1862  ;;  %1916 = vst.msk [vmem:[#allocation3 + $0x24] sm:$0xf] %vm1906_vm7, %v1829_v0  ;;  %3547 = vmatmul.mubr.msk.bf16.gmra.mxu1 %vm2631_vm5, %v3622_v37 }
 0x24f   : > { %1933 = vst.msk [vmem:[#allocation3 + $0x68] sm:$0xf] %vm1906_vm7, %v1863_v8  ;;  %2009 = vrot.lane.b32.xlu1 %v5370_v2, %s3768_s6  ;;  %s3701_s6 = scalar_lea.vmem %s5853_s29, 2048 }
 0x250   : > { %2106 = vrot.lane.b32.xlu0 %v4275_v40, %s3769_s7  ;;  %v2210_v40 = vrot.slane %v2208_v57, 4  ;;  %p3702_p11 = scmp.ne.s32.totalorder %s5853_s29, %s3701_s6 }
 0x251   : > { %v1861_v16 = vpop.permute.xlu1 %1860 }
 0x252   : > { %v1964_v25 = vpop.permute.xlu0 %1963  ;;  %1932 = vst.msk [vmem:[#allocation3 + $0x64] sm:$0xf] %vm1906_vm7, %v1861_v16  ;;  %p3703_p12 = pnand %p3702_p11, %p3834_p5 }
 0x253   : > { %2052 = vst.msk [vmem:[#allocation3 + $0x20] sm:$0xf] %vm2043_vm0, %v1964_v25  ;;  %2104 = vrot.lane.b32.xlu1 %v4236_v28, %s3769_s7  ;;  %v2214_v28 = vor.u32 %v2213_v31, %v2210_v40 }
 0x254   : > { %2138 = vrot.lane.b32.xlu0 %v5381_v21, %s3769_s7  ;;  %p3704_p13 = pneg %p3703_p12 }
 0x255   : > { %v1833_v1 = vpop.permute.xlu1 %1832  ;;  %v2215_v26 = vrot.slane %v2214_v28, 4 }
 0x256   : > { %v1996_v9 = vpop.permute.xlu0 %1995  ;;  %1918 = vst.msk [vmem:[#allocation3 + $0x2c] sm:$0xf] %vm1906_vm7, %v1833_v1 }
 0x257   : > { %2068 = vst.msk [vmem:[#allocation3 + $0x60] sm:$0xf] %vm2043_vm0, %v1996_v9  ;;  %2136 = vrot.lane.b32.xlu1 %v5296_v20, %s3769_s7  ;;  %v2220_v18 = vsel %vm3930_vm11, %v2215_v26, %v2219_v10 }
 0x258   : > { %2255 = vrot.lane.b32.xlu0 %v6077_v55, %s3770_s8  ;;  %v2223_v55 = vrot.slane %v2221_v39, 4 }
 0x259   : > { %v1865_v48 = vpop.permute.xlu1 %1864 }
 0x25a   : > { %v1968_v63 = vpop.permute.xlu0 %1967  ;;  %1934 = vst.msk [vmem:[#allocation3 + $0x6c] sm:$0xf] %vm1906_vm7, %v1865_v48 }
 0x25b   : > { %2054 = vst.msk [vmem:[#allocation3 + $0x28] sm:$0xf] %vm2043_vm0, %v1968_v63  ;;  %2108 = vrot.lane.b32.xlu1 %v4277_v13, %s3769_s7 }
 0x25c   : > { %2287 = vrot.lane.b32.xlu0 %v5313_v34, %s3770_s8  ;;  %v2224_v34 = vor.u32 %v2223_v55, %v2219_v10  ;;  %v5490_v10 = vld [vmem:[%s5901_s2] ss:$0 sm:$0xff] }
 0x25d   : > { %v1966_v20 = vpop.permute.xlu1 %1965 }
 0x25e   : > { %v2000_v52 = vpop.permute.xlu0 %1999  ;;  %2053 = vst.msk [vmem:[#allocation3 + $0x24] sm:$0xf] %vm2043_vm0, %v1966_v20  ;;  %v2225_v45 = vrot.slane %v2224_v34, 4 }
 0x25f   : > { %2070 = vst.msk [vmem:[#allocation3 + $0x68] sm:$0xf] %vm2043_vm0, %v2000_v52  ;;  %2140 = vrot.lane.b32.xlu1 %v813_v42, %s3769_s7  ;;  %s3773_s7 = smov [#allocation4]  }
 0x260   : > { %2259 = vrot.lane.b32.xlu0 %v6042_v44, %s3770_s8  ;;  %v2230_v54 = vsel %vm3930_vm11, %v2225_v45, %v2229_v49 }
 0x261   : > { %v1998_v13 = vpop.permute.xlu1 %1997 }
 0x262   : > { %v2095_v27 = vpop.permute.xlu0 %2094  ;;  %2069 = vst.msk [vmem:[#allocation3 + $0x64] sm:$0xf] %vm2043_vm0, %v1998_v13 }
 0x263   : > { %2183 = vst.msk [vmem:[#allocation3 + $0x20] sm:$0xf] %vm2174_vm8, %v2095_v27  ;;  %2257 = vrot.lane.b32.xlu1 %v6079_v22, %s3770_s8 }
 0x264   : > { %2291 = vrot.lane.b32.xlu0 %v2220_v18, %s3770_s8 }
 0x265   : > { %v1970_v50 = vpop.permute.xlu1 %1969 }
 0x266   : > { %2055 = vst.msk [vmem:[#allocation3 + $0x2c] sm:$0xf] %vm2043_vm0, %v1970_v50  ;;  %v2127_v44 = vpop.permute.xlu0 %2126 }
 0x267   : > { %2289 = vrot.lane.b32.xlu1 %v5333_v59, %s3770_s8  ;;  %2199 = vst.msk [vmem:[#allocation3 + $0x60] sm:$0xf] %vm2174_vm8, %v2127_v44  ;;  %v2363_v59 = vrot.slane %v813_v42, 5 }
 0x268   : > { %2392 = vrot.lane.b32.xlu0 %v6080_v4, %s3771_s9 }
 0x269   : > { %v2002_v11 = vpop.permute.xlu1 %2001  ;;  %v2364_v17 = vsel %vm4552_vm14, %v3397_v3, %v2363_v59 }
 0x26a   : > { %2071 = vst.msk [vmem:[#allocation3 + $0x6c] sm:$0xf] %vm2043_vm0, %v2002_v11  ;;  %v2099_v56 = vpop.permute.xlu0 %2098 }
 0x26b   : > { %2261 = vrot.lane.b32.xlu1 %v4376_v35, %s3770_s8  ;;  %2185 = vst.msk [vmem:[#allocation3 + $0x28] sm:$0xf] %vm2174_vm8, %v2099_v56 }
 0x26c   : > { %2424 = vrot.lane.b32.xlu0 %v5347_v41, %s3771_s9 }
 0x26d   : > { %v2097_v24 = vpop.permute.xlu1 %2096 }
 0x26e   : > { %2184 = vst.msk [vmem:[#allocation3 + $0x24] sm:$0xf] %vm2174_vm8, %v2097_v24  ;;  %v2131_v22 = vpop.permute.xlu0 %2130 }
 0x26f   : > { %2293 = vrot.lane.b32.xlu1 %v2230_v54, %s3770_s8  ;;  %2201 = vst.msk [vmem:[#allocation3 + $0x68] sm:$0xf] %vm2174_vm8, %v2131_v22  ;;  %s3705_s8 = sshll.u32 %s3773_s7, 4  ;;  %s3706_s8 = int_to_ptr.vmem [resolvable:$false] %s3705_s8 }
 0x270   : > { %2396 = vrot.lane.b32.xlu0 %v4698_v33, %s3771_s9  ;;  %v2365_v33 = vrot.slane %v2363_v59, 4  ;;  %p3708_p0 = scmp.lt.s32.totalorder %s5853_s29, %s3706_s8 }
 0x271   : > { %v2129_v35 = vpop.permute.xlu1 %2128 }
 0x272   : > { %2200 = vst.msk [vmem:[#allocation3 + $0x64] sm:$0xf] %vm2174_vm8, %v2129_v35  ;;  %v2248_v58 = vpop.permute.xlu0 %2247  ;;  %v2367_v43 = vsel %vm4552_vm14, %v2365_v33, %v2366_v23 }
 0x273   : > { %2394 = vrot.lane.b32.xlu1 %v6081_v47, %s3771_s9  ;;  %2336 = vst.msk [vmem:[#allocation3 + $0x20] sm:$0xf] %vm2327_vm9, %v2248_v58 }
 0x274   : > { %2428 = vrot.lane.b32.xlu0 %v2364_v17, %s3771_s9 }
 0x275   : > { %v2101_v46 = vpop.permute.xlu1 %2100 }
 0x276   : > { %2186 = vst.msk [vmem:[#allocation3 + $0x2c] sm:$0xf] %vm2174_vm8, %v2101_v46  ;;  %v2280_v30 = vpop.permute.xlu0 %2279 }
 0x277   : > { %2426 = vrot.lane.b32.xlu1 %v5370_v2, %s3771_s9  ;;  %2352 = vst.msk [vmem:[#allocation3 + $0x60] sm:$0xf] %vm2327_vm9, %v2280_v30 }
 0x279   : > { %v2133_v4 = vpop.permute.xlu1 %2132 }
 0x27a   : > { %2202 = vst.msk [vmem:[#allocation3 + $0x6c] sm:$0xf] %vm2174_vm8, %v2133_v4  ;;  %v2252_v12 = vpop.permute.xlu0 %2251 }
 0x27b   : > { %2398 = vrot.lane.b32.xlu1 %v4740_v7, %s3771_s9  ;;  %2338 = vst.msk [vmem:[#allocation3 + $0x28] sm:$0xf] %vm2327_vm9, %v2252_v12 }
 0x27d   : > { %v2250_v62 = vpop.permute.xlu1 %2249 }
 0x27e   : > { %2337 = vst.msk [vmem:[#allocation3 + $0x24] sm:$0xf] %vm2327_vm9, %v2250_v62  ;;  %v2284_v41 = vpop.permute.xlu0 %2283 }
 0x27f   : > { %2430 = vrot.lane.b32.xlu1 %v2367_v43, %s3771_s9  ;;  %2354 = vst.msk [vmem:[#allocation3 + $0x68] sm:$0xf] %vm2327_vm9, %v2284_v41  ;;  %s3707_s9 = scalar_lea.vmem %s3706_s8, 4096 }
 0x280   : > { %p3709_p1 = scmp.lt.s32.totalorder %s3707_s9, %s3701_s6 }
 0x281   : > { %v2282_v36 = vpop.permute.xlu1 %2281 }
 0x282   : > { %2353 = vst.msk [vmem:[#allocation3 + $0x64] sm:$0xf] %vm2327_vm9, %v2282_v36  ;;  %v2385_v6 = vpop.permute.xlu0 %2384  ;;  %p3710_p2 = por %p3709_p1, %p3708_p0 }
 0x283   : > { %2473 = vst.msk [vmem:[#allocation3 + $0x20] sm:$0xf] %vm2464_vm3, %v2385_v6 }
 0x284   : > { %p3711_p3 = pnand %p3710_p2, %p3704_p13 }
 0x285   : > { %v2254_v7 = vpop.permute.xlu1 %2253 }
 0x286   : > { %2339 = vst.msk [vmem:[#allocation3 + $0x2c] sm:$0xf] %vm2327_vm9, %v2254_v7  ;;  %v2417_v38 = vpop.permute.xlu0 %2416 }
 0x287   : > { %2489 = vst.msk [vmem:[#allocation3 + $0x60] sm:$0xf] %vm2464_vm3, %v2417_v38 }
 0x289   : > { %v2286_v5 = vpop.permute.xlu1 %2285 }
 0x28a   : > { %2355 = vst.msk [vmem:[#allocation3 + $0x6c] sm:$0xf] %vm2327_vm9, %v2286_v5  ;;  %v2389_v51 = vpop.permute.xlu0 %2388 }
 0x28b   : > { %2475 = vst.msk [vmem:[#allocation3 + $0x28] sm:$0xf] %vm2464_vm3, %v2389_v51 }
 0x28d   : > { %v2387_v29 = vpop.permute.xlu1 %2386 }
 0x28e   : > { %2474 = vst.msk [vmem:[#allocation3 + $0x24] sm:$0xf] %vm2464_vm3, %v2387_v29  ;;  %v2421_v53 = vpop.permute.xlu0 %2420 }
 0x28f   : > { %2491 = vst.msk [vmem:[#allocation3 + $0x68] sm:$0xf] %vm2464_vm3, %v2421_v53 }
 0x291   : > { %v2419_v19 = vpop.permute.xlu1 %2418 }
 0x292   : > { %2490 = vst.msk [vmem:[#allocation3 + $0x64] sm:$0xf] %vm2464_vm3, %v2419_v19  ;;  %v1714_v61 = vpop.permute.xlu0 %1713 }
 0x293   : > { %1782 = vst.msk [vmem:[#allocation3 + $0x70] sm:$0xf] %vm1753_vm2, %v1714_v61 }
 0x295   : > { %v2391_v47 = vpop.permute.xlu1 %2390  ;;  %v3623_v2 = vld [vmem:[#allocation3 + $0x20] sm:$0xff]  }
 0x296   : > { %2476 = vst.msk [vmem:[#allocation3 + $0x2c] sm:$0xf] %vm2464_vm3, %v2391_v47  ;;  %v1718_v0 = vpop.permute.xlu0 %1717  ;;  %3534 = vmatprep.mubr.msk.bf16.mxu0 %vm2631_vm5, %v3623_v2 }
 0x297   : > { %1784 = vst.msk [vmem:[#allocation3 + $0x78] sm:$0xf] %vm1753_vm2, %v1718_v0 }
 0x299   : > { %v2423_v37 = vpop.permute.xlu1 %2422  ;;  %v3624_v8 = vld [vmem:[#allocation3 + $0x60] sm:$0xff]  }
 0x29a   : > { %2492 = vst.msk [vmem:[#allocation3 + $0x6c] sm:$0xf] %vm2464_vm3, %v2423_v37  ;;  %v1835_v21 = vpop.permute.xlu0 %1834  ;;  %3550 = vmatprep.mubr.msk.bf16.mxu1 %vm2631_vm5, %v3624_v8 }
 0x29b   : > { %1919 = vst.msk [vmem:[#allocation3 + $0x30] sm:$0xf] %vm1906_vm7, %v1835_v21 }
 0x29d   : > { %v1716_v16 = vpop.permute.xlu1 %1715  ;;  %v3625_v25 = vld [vmem:[#allocation3 + $0x28] sm:$0xff]  }
 0x29e   : > { %1783 = vst.msk [vmem:[#allocation3 + $0x74] sm:$0xf] %vm1753_vm2, %v1716_v16  ;;  %v1867_v57 = vpop.permute.xlu0 %1866  ;;  %3535 = vmatmul.mubr.msk.bf16.gmra.mxu0 %vm2631_vm5, %v3625_v25 }
 0x29f   : > { %1935 = vst.msk [vmem:[#allocation3 + $0x70] sm:$0xf] %vm1906_vm7, %v1867_v57 }
 0x2a1   : > { %v1720_v32 = vpop.permute.xlu1 %1719  ;;  %v3626_v1 = vld [vmem:[#allocation3 + $0x68] sm:$0xff]  }
 0x2a2   : > { %1785 = vst.msk [vmem:[#allocation3 + $0x7c] sm:$0xf] %vm1753_vm2, %v1720_v32  ;;  %v1839_v40 = vpop.permute.xlu0 %1838  ;;  %3551 = vmatmul.mubr.msk.bf16.gmra.mxu1 %vm2631_vm5, %v3626_v1 }
 0x2a3   : > { %1921 = vst.msk [vmem:[#allocation3 + $0x38] sm:$0xf] %vm1906_vm7, %v1839_v40 }
 0x2a5   : > { %v1837_v31 = vpop.permute.xlu1 %1836 }
 0x2a6   : > { %1920 = vst.msk [vmem:[#allocation3 + $0x34] sm:$0xf] %vm1906_vm7, %v1837_v31  ;;  %v1871_v9 = vpop.permute.xlu0 %1870 }
 0x2a7   : > { %1937 = vst.msk [vmem:[#allocation3 + $0x78] sm:$0xf] %vm1906_vm7, %v1871_v9 }
 0x2a9   : > { %v1869_v48 = vpop.permute.xlu1 %1868 }
 0x2aa   : > { %1936 = vst.msk [vmem:[#allocation3 + $0x74] sm:$0xf] %vm1906_vm7, %v1869_v48  ;;  %v1972_v63 = vpop.permute.xlu0 %1971 }
 0x2ab   : > { %2056 = vst.msk [vmem:[#allocation3 + $0x30] sm:$0xf] %vm2043_vm0, %v1972_v63 }
 0x2ad   : > { %v1841_v28 = vpop.permute.xlu1 %1840 }
 0x2ae   : > { %1922 = vst.msk [vmem:[#allocation3 + $0x3c] sm:$0xf] %vm1906_vm7, %v1841_v28  ;;  %v2004_v42 = vpop.permute.xlu0 %2003 }
 0x2af   : > { %2072 = vst.msk [vmem:[#allocation3 + $0x70] sm:$0xf] %vm2043_vm0, %v2004_v42 }
 0x2b1   : > { %v1873_v14 = vpop.permute.xlu1 %1872 }
 0x2b2   : > { %1938 = vst.msk [vmem:[#allocation3 + $0x7c] sm:$0xf] %vm1906_vm7, %v1873_v14  ;;  %v1976_v39 = vpop.permute.xlu0 %1975 }
 0x2b3   : > { %2058 = vst.msk [vmem:[#allocation3 + $0x38] sm:$0xf] %vm2043_vm0, %v1976_v39 }
 0x2b5   : > { %v1974_v20 = vpop.permute.xlu1 %1973 }
 0x2b6   : > { %2057 = vst.msk [vmem:[#allocation3 + $0x34] sm:$0xf] %vm2043_vm0, %v1974_v20  ;;  %v2008_v52 = vpop.permute.xlu0 %2007 }
 0x2b7   : > { %2074 = vst.msk [vmem:[#allocation3 + $0x78] sm:$0xf] %vm2043_vm0, %v2008_v52 }
 0x2b9   : > { %v2006_v26 = vpop.permute.xlu1 %2005 }
 0x2ba   : > { %2073 = vst.msk [vmem:[#allocation3 + $0x74] sm:$0xf] %vm2043_vm0, %v2006_v26  ;;  %v2103_v55 = vpop.permute.xlu0 %2102  ;;  %v3528_v13 = vpop.f32.mrf.mxu0 }
 0x2bb   : > { %2187 = vst.msk [vmem:[#allocation3 + $0x30] sm:$0xf] %vm2174_vm8, %v2103_v55  ;;  %v5495_v27 = vadd.f32 %v3528_v13, %v5490_v10 }
 0x2bc   : > { %v2721_v15 = vpop.f32.mrf.mxu0 }
 0x2bd   : > { %v1978_v18 = vpop.permute.xlu1 %1977  ;;  %v2850_v34 = vmul.f32 %v5495_v27, %v5495_v27  ;;  %v5501_v60 = vadd.f32 %v5490_v10, %v2721_v15 }
 0x2be   : > { %2059 = vst.msk [vmem:[#allocation3 + $0x3c] sm:$0xf] %vm2043_vm0, %v1978_v18  ;;  %v2135_v50 = vpop.permute.xlu0 %2134  ;;  %v3529_v44 = vpop.f32.mrf.mxu0 }
 0x2bf   : > { %v3544_v45 = vpop.f32.mrf.mxu1  ;;  %2203 = vst.msk [vmem:[#allocation3 + $0x70] sm:$0xf] %vm2174_vm8, %v2135_v50  ;;  %v2882_v49 = vmul.f32 %v2850_v34, %v5495_v27  ;;  %v2848_v11 = vmul.f32 %v5501_v60, %v5501_v60  ;;  %v5508_v56 = vadd.f32 %v3529_v44, %v5490_v10 }
 0x2c0   : > { %v5511_v54 = vadd.f32 %v3544_v45, %v5490_v10  ;;  %v2724_v24 = vpop.f32.mrf.mxu0 }
 0x2c1   : > { %v2010_v3 = vpop.permute.xlu1 %2009  ;;  %v2914_v22 = vmul.f32 0.044715, %v2882_v49  ;;  %v2880_v59 = vmul.f32 %v2848_v11, %v5501_v60  ;;  %v2851_v35 = vmul.f32 %v5508_v56, %v5508_v56  ;;  %v2785_v58 = vpop.f32.mrf.mxu1  ;;  %v5520_v30 = vadd.f32 %v5490_v10, %v2724_v24 }
 0x2c2   : > { %v2866_v17 = vmul.f32 %v5511_v54, %v5511_v54  ;;  %2075 = vst.msk [vmem:[#allocation3 + $0x7c] sm:$0xf] %vm2043_vm0, %v2010_v3  ;;  %v2107_v46 = vpop.permute.xlu0 %2106  ;;  %v5523_v33 = vadd.f32 %v5490_v10, %v2785_v58 }
 0x2c3   : > { %2189 = vst.msk [vmem:[#allocation3 + $0x38] sm:$0xf] %vm2174_vm8, %v2107_v46  ;;  %v2946_v23 = vadd.f32 %v2914_v22, %v5495_v27  ;;  %v2912_v4 = vmul.f32 0.044715, %v2880_v59  ;;  %v2883_v12 = vmul.f32 %v2851_v35, %v5508_v56  ;;  %v3545_v62 = vpop.f32.mrf.mxu1  ;;  %v2849_v41 = vmul.f32 %v5520_v30, %v5520_v30 }
 0x2c4   : > { %v2898_v43 = vmul.f32 %v2866_v17, %v5511_v54  ;;  %v2864_v36 = vmul.f32 %v5523_v33, %v5523_v33  ;;  %v5534_v6 = vadd.f32 %v3545_v62, %v5490_v10 }
 0x2c5   : > { %v2105_v7 = vpop.permute.xlu1 %2104  ;;  %v2978_v38 = vmul.f32 0.7978846, %v2946_v23  ;;  %v2944_v5 = vadd.f32 %v2912_v4, %v5501_v60  ;;  %v2915_v51 = vmul.f32 0.044715, %v2883_v12  ;;  %v2788_v53 = vpop.f32.mrf.mxu1  ;;  %v2881_v61 = vmul.f32 %v2849_v41, %v5520_v30 }
 0x2c6   : > { %v2930_v29 = vmul.f32 0.044715, %v2898_v43  ;;  %2188 = vst.msk [vmem:[#allocation3 + $0x34] sm:$0xf] %vm2174_vm8, %v2105_v7  ;;  %v2139_v19 = vpop.permute.xlu0 %2138  ;;  %v2896_v47 = vmul.f32 %v2864_v36, %v5523_v33  ;;  %v2867_v2 = vmul.f32 %v5534_v6, %v5534_v6  ;;  %v5543_v0 = vadd.f32 %v5490_v10, %v2788_v53 }
 0x2c7   : > { %2205 = vst.msk [vmem:[#allocation3 + $0x78] sm:$0xf] %vm2174_vm8, %v2139_v19  ;;  %3631 = vtanh.f32 %v2978_v38  ;;  %v2976_v37 = vmul.f32 0.7978846, %v2944_v5  ;;  %v2947_v8 = vadd.f32 %v2915_v51, %v5508_v56  ;;  %v2913_v16 = vmul.f32 0.044715, %v2881_v61 }
 0x2c8   : > { %v2962_v21 = vadd.f32 %v2930_v29, %v5511_v54  ;;  %v2928_v25 = vmul.f32 0.044715, %v2896_v47  ;;  %v2899_v57 = vmul.f32 %v2867_v2, %v5534_v6  ;;  %v2865_v32 = vmul.f32 %v5543_v0, %v5543_v0 }
 0x2c9   : > { %v2137_v1 = vpop.permute.xlu1 %2136  ;;  %3633 = vtanh.f32 %v2976_v37  ;;  %v2979_v40 = vmul.f32 0.7978846, %v2947_v8  ;;  %v2945_v48 = vadd.f32 %v2913_v16, %v5520_v30 }
 0x2ca   : > { %v2994_v31 = vmul.f32 0.7978846, %v2962_v21  ;;  %2204 = vst.msk [vmem:[#allocation3 + $0x74] sm:$0xf] %vm2174_vm8, %v2137_v1  ;;  %v2256_v9 = vpop.permute.xlu0 %2255  ;;  %v2960_v63 = vadd.f32 %v2928_v25, %v5523_v33  ;;  %v2931_v28 = vmul.f32 0.044715, %v2899_v57  ;;  %v2897_v42 = vmul.f32 %v2865_v32, %v5543_v0 }
 0x2cb   : > { %2340 = vst.msk [vmem:[#allocation3 + $0x30] sm:$0xf] %vm2327_vm9, %v2256_v9  ;;  %3635 = vtanh.f32 %v2979_v40  ;;  %v2977_v14 = vmul.f32 0.7978846, %v2945_v48 }
 0x2cc   : > { %3637 = vtanh.f32 %v2994_v31  ;;  %v2992_v39 = vmul.f32 0.7978846, %v2960_v63  ;;  %v2963_v20 = vadd.f32 %v2931_v28, %v5534_v6  ;;  %v2929_v26 = vmul.f32 0.044715, %v2897_v42 }
 0x2cd   : > { %v2109_v52 = vpop.permute.xlu1 %2108  ;;  %3639 = vtanh.f32 %v2977_v14 }
 0x2ce   : > { %2190 = vst.msk [vmem:[#allocation3 + $0x3c] sm:$0xf] %vm2174_vm8, %v2109_v52  ;;  %v2288_v55 = vpop.permute.xlu0 %2287  ;;  %v2995_v13 = vmul.f32 0.7978846, %v2963_v20  ;;  %3641 = vtanh.f32 %v2992_v39  ;;  %v2961_v18 = vadd.f32 %v2929_v26, %v5543_v0 }
 0x2cf   : > { %2356 = vst.msk [vmem:[#allocation3 + $0x70] sm:$0xf] %vm2327_vm9, %v2288_v55 }
 0x2d0   : > { %3643 = vtanh.f32 %v2995_v13  ;;  %v2993_v34 = vmul.f32 0.7978846, %v2961_v18 }
 0x2d1   : > { %v2141_v15 = vpop.permute.xlu1 %2140 }
 0x2d2   : > { %2206 = vst.msk [vmem:[#allocation3 + $0x7c] sm:$0xf] %vm2174_vm8, %v2141_v15  ;;  %v2260_v50 = vpop.permute.xlu0 %2259  ;;  %3645 = vtanh.f32 %v2993_v34 }
 0x2d3   : > { %2342 = vst.msk [vmem:[#allocation3 + $0x38] sm:$0xf] %vm2327_vm9, %v2260_v50 }
 0x2d4   : > { %v3632_v44 = vpop.eup %3631 }
 0x2d5   : > { %v2258_v45 = vpop.permute.xlu1 %2257  ;;  %v3042_v49 = vadd.f32 1.0, %v3632_v44 }
 0x2d6   : > { %2341 = vst.msk [vmem:[#allocation3 + $0x34] sm:$0xf] %vm2327_vm9, %v2258_v45  ;;  %v2292_v11 = vpop.permute.xlu0 %2291  ;;  %v3634_v3 = vpop.eup %3633 }
 0x2d7   : > { %2358 = vst.msk [vmem:[#allocation3 + $0x78] sm:$0xf] %vm2327_vm9, %v2292_v11  ;;  %v3074_v24 = vmul.f32 0.5, %v3042_v49  ;;  %v3040_v22 = vadd.f32 1.0, %v3634_v3 }
 0x2d8   : > { %v3636_v59 = vpop.eup %3635 }
 0x2d9   : > { %v2290_v35 = vpop.permute.xlu1 %2289  ;;  %v3638_v17 = vpop.eup %3637  ;;  %v3106_v58 = vmul.f32 %v3074_v24, %v5495_v27  ;;  %v3072_v46 = vmul.f32 0.5, %v3040_v22  ;;  %v3043_v23 = vadd.f32 1.0, %v3636_v59 }
 0x2da   : > { %2357 = vst.msk [vmem:[#allocation3 + $0x74] sm:$0xf] %vm2327_vm9, %v2290_v35  ;;  %v2393_v4 = vpop.permute.xlu0 %2392  ;;  %v3058_v12 = vadd.f32 1.0, %v3638_v17  ;;  %v3640_v43 = vpop.eup %3639 }
 0x2db   : > { %2477 = vst.msk [vmem:[#allocation3 + $0x30] sm:$0xf] %vm2464_vm3, %v2393_v4  ;;  %v3473_v62 = vpack.c.bf16 %v3106_v58, %v3106_v58  ;;  %v3104_v41 = vmul.f32 %v3072_v46, %v5501_v60  ;;  %v3075_v36 = vmul.f32 0.5, %v3043_v23  ;;  %v3642_v7 = vpop.eup %3641  ;;  %v3041_v5 = vadd.f32 1.0, %v3640_v43 }
 0x2dc   : > { %v3090_v38 = vmul.f32 0.5, %v3058_v12  ;;  %v3056_v19 = vadd.f32 1.0, %v3642_v7 }
 0x2dd   : > { %v2262_v51 = vpop.permute.xlu1 %2261  ;;  %v3644_v29 = vpop.eup %3643  ;;  %3267 = vst.msk [vmem:[%s5571_s27 + $0x8] sm:$0xf] %vm3264_vm10, %v3473_v62  ;;  %v3471_v27 = vpack.c.bf16 %v3104_v41, %v3104_v41  ;;  %v3107_v53 = vmul.f32 %v3075_v36, %v5508_v56  ;;  %v3073_v47 = vmul.f32 0.5, %v3041_v5 }
 0x2de   : > { %2343 = vst.msk [vmem:[#allocation3 + $0x3c] sm:$0xf] %vm2327_vm9, %v2262_v51  ;;  %v2425_v60 = vpop.permute.xlu0 %2424  ;;  %v3122_v61 = vmul.f32 %v3090_v38, %v5511_v54  ;;  %v3059_v2 = vadd.f32 1.0, %v3644_v29  ;;  %v3088_v8 = vmul.f32 0.5, %v3056_v19 }
 0x2df   : > { %2493 = vst.msk [vmem:[#allocation3 + $0x70] sm:$0xf] %vm2464_vm3, %v2425_v60  ;;  %v3474_v37 = vpack.c.bf16 %v3107_v53, %v3107_v53  ;;  %v3646_v21 = vpop.eup %3645  ;;  %v3105_v56 = vmul.f32 %v3073_v47, %v5520_v30 }
 0x2e0   : > { %3265 = vst.msk [vmem:[%s5571_s27] sm:$0xf] %vm3264_vm10, %v3471_v27  ;;  %v3489_v16 = vpack.c.bf16 %v3122_v61, %v3122_v61  ;;  %v3091_v25 = vmul.f32 0.5, %v3059_v2  ;;  %v3120_v54 = vmul.f32 %v3088_v8, %v5523_v33  ;;  %v3057_v32 = vadd.f32 1.0, %v3646_v21 }
 0x2e1   : > { %v2294_v57 = vpop.permute.xlu1 %2293  ;;  %3268 = vst.msk [vmem:[%s5571_s27 + $0xc] sm:$0xf] %vm3264_vm10, %v3474_v37  ;;  %v3472_v40 = vpack.c.bf16 %v3105_v56, %v3105_v56 }
 0x2e2   : > { %2359 = vst.msk [vmem:[#allocation3 + $0x7c] sm:$0xf] %vm2327_vm9, %v2294_v57  ;;  %v2397_v1 = vpop.permute.xlu0 %2396  ;;  %v3123_v31 = vmul.f32 %v3091_v25, %v5534_v6  ;;  %v3487_v30 = vpack.c.bf16 %v3120_v54, %v3120_v54  ;;  %v3089_v9 = vmul.f32 0.5, %v3057_v32 }
 0x2e3   : > { %3283 = vst.msk [vmem:[%s5571_s27 + $0x48] sm:$0xf] %vm3264_vm10, %v3489_v16  ;;  %3266 = vst.msk [vmem:[%s5571_s27 + $0x4] sm:$0xf] %vm3264_vm10, %v3472_v40 }
 0x2e4   : > { %2479 = vst.msk [vmem:[#allocation3 + $0x38] sm:$0xf] %vm2464_vm3, %v2397_v1  ;;  %v3490_v48 = vpack.c.bf16 %v3123_v31, %v3123_v31  ;;  %v3121_v33 = vmul.f32 %v3089_v9, %v5543_v0 }
 0x2e5   : > { %v2395_v63 = vpop.permute.xlu1 %2394  ;;  %3281 = vst.msk [vmem:[%s5571_s27 + $0x40] sm:$0xf] %vm3264_vm10, %v3487_v30 }
 0x2e6   : > { %2478 = vst.msk [vmem:[#allocation3 + $0x34] sm:$0xf] %vm2464_vm3, %v2395_v63  ;;  %v2429_v28 = vpop.permute.xlu0 %2428  ;;  %v3488_v6 = vpack.c.bf16 %v3121_v33, %v3121_v33 }
 0x2e7   : > { %3284 = vst.msk [vmem:[%s5571_s27 + $0x4c] sm:$0xf] %vm3264_vm10, %v3490_v48 }
 0x2e8   : > { %2495 = vst.msk [vmem:[#allocation3 + $0x78] sm:$0xf] %vm2464_vm3, %v2429_v28 }
 0x2e9   : > { %v2427_v42 = vpop.permute.xlu1 %2426  ;;  %3282 = vst.msk [vmem:[%s5571_s27 + $0x44] sm:$0xf] %vm3264_vm10, %v3488_v6 }
 0x2ea   : > { %2494 = vst.msk [vmem:[#allocation3 + $0x74] sm:$0xf] %vm2464_vm3, %v2427_v42 }
 0x2ed   : > { %v2399_v14 = vpop.permute.xlu1 %2398  ;;  %v3627_v39 = vld [vmem:[#allocation3 + $0x30] sm:$0xff]  }
 0x2ee   : > { %2480 = vst.msk [vmem:[#allocation3 + $0x3c] sm:$0xf] %vm2464_vm3, %v2399_v14  ;;  %3538 = vmatprep.mubr.msk.bf16.mxu0 %vm2631_vm5, %v3627_v39 }
 0x2f1   : > { %v2431_v0 = vpop.permute.xlu1 %2430  ;;  %v3628_v20 = vld [vmem:[#allocation3 + $0x70] sm:$0xff]  }
 0x2f2   : > { %2496 = vst.msk [vmem:[#allocation3 + $0x7c] sm:$0xf] %vm2464_vm3, %v2431_v0  ;;  %3554 = vmatprep.mubr.msk.bf16.mxu1 %vm2631_vm5, %v3628_v20 }
 0x2f5   : > { %v3629_v52 = vld [vmem:[#allocation3 + $0x38] sm:$0xff]  }
 0x2f6   : > { %3539 = vmatmul.mubr.msk.bf16.gmra.mxu0 %vm2631_vm5, %v3629_v52 }
 0x2f9   : > { %v3630_v26 = vld [vmem:[#allocation3 + $0x78] sm:$0xff]  }
 0x2fa   : > { %3555 = vmatmul.mubr.msk.bf16.gmra.mxu1 %vm2631_vm5, %v3630_v26 }
 0x30a   : > { %v3532_v55 = vpop.f32.mrf.mxu0 }
 0x30b   : > { %v5609_v13 = vadd.f32 %v3532_v55, %v5490_v10 }
 0x30c   : > { %v2737_v18 = vpop.f32.mrf.mxu0 }
 0x30d   : > { %v2854_v15 = vmul.f32 %v5609_v13, %v5609_v13  ;;  %v5614_v34 = vadd.f32 %v5490_v10, %v2737_v18 }
 0x30e   : > { %v3533_v50 = vpop.f32.mrf.mxu0  ;;  %v3548_v44 = vpop.f32.mrf.mxu1 }
 0x30f   : > { %v2886_v45 = vmul.f32 %v2854_v15, %v5609_v13  ;;  %v2852_v49 = vmul.f32 %v5614_v34, %v5614_v34  ;;  %v5620_v11 = vadd.f32 %v3533_v50, %v5490_v10  ;;  %v5623_v3 = vadd.f32 %v3548_v44, %v5490_v10 }
 0x310   : > { %v2740_v24 = vpop.f32.mrf.mxu0  ;;  %v2801_v22 = vpop.f32.mrf.mxu1 }
 0x311   : > { %v2918_v59 = vmul.f32 0.044715, %v2886_v45  ;;  %v2884_v35 = vmul.f32 %v2852_v49, %v5614_v34  ;;  %v2855_v17 = vmul.f32 %v5620_v11, %v5620_v11  ;;  %v2870_v58 = vmul.f32 %v5623_v3, %v5623_v3 }
 0x312   : > { %v5631_v46 = vadd.f32 %v5490_v10, %v2740_v24  ;;  %v5634_v23 = vadd.f32 %v5490_v10, %v2801_v22  ;;  %v3549_v4 = vpop.f32.mrf.mxu1 }
 0x313   : > { %v2950_v12 = vadd.f32 %v2918_v59, %v5609_v13  ;;  %v2916_v43 = vmul.f32 0.044715, %v2884_v35  ;;  %v2887_v62 = vmul.f32 %v2855_v17, %v5620_v11  ;;  %v2902_v41 = vmul.f32 %v2870_v58, %v5623_v3 }
 0x314   : > { %v2853_v36 = vmul.f32 %v5631_v46, %v5631_v46  ;;  %v2868_v7 = vmul.f32 %v5634_v23, %v5634_v23  ;;  %v5644_v38 = vadd.f32 %v3549_v4, %v5490_v10  ;;  %v2804_v5 = vpop.f32.mrf.mxu1 }
 0x315   : > { %v2982_v51 = vmul.f32 0.7978846, %v2950_v12  ;;  %v2948_v29 = vadd.f32 %v2916_v43, %v5614_v34  ;;  %v2919_v27 = vmul.f32 0.044715, %v2887_v62  ;;  %v2934_v53 = vmul.f32 0.044715, %v2902_v41 }
 0x316   : > { %v2885_v19 = vmul.f32 %v2853_v36, %v5631_v46  ;;  %v2900_v60 = vmul.f32 %v2868_v7, %v5634_v23  ;;  %v2871_v61 = vmul.f32 %v5644_v38, %v5644_v38  ;;  %v5652_v47 = vadd.f32 %v5490_v10, %v2804_v5 }
 0x317   : > { %3647 = vtanh.f32 %v2982_v51  ;;  %v2980_v2 = vmul.f32 0.7978846, %v2948_v29  ;;  %v2951_v37 = vadd.f32 %v2919_v27, %v5620_v11  ;;  %v2966_v8 = vadd.f32 %v2934_v53, %v5623_v3 }
 0x318   : > { %v2917_v21 = vmul.f32 0.044715, %v2885_v19  ;;  %v2932_v16 = vmul.f32 0.044715, %v2900_v60  ;;  %v2903_v56 = vmul.f32 %v2871_v61, %v5644_v38  ;;  %v2869_v25 = vmul.f32 %v5652_v47, %v5652_v47 }
 0x319   : > { %3649 = vtanh.f32 %v2980_v2  ;;  %v2983_v57 = vmul.f32 0.7978846, %v2951_v37  ;;  %v2998_v54 = vmul.f32 0.7978846, %v2966_v8 }
 0x31a   : > { %v2949_v32 = vadd.f32 %v2917_v21, %v5631_v46  ;;  %v2964_v1 = vadd.f32 %v2932_v16, %v5634_v23  ;;  %v2935_v40 = vmul.f32 0.044715, %v2903_v56  ;;  %v2901_v31 = vmul.f32 %v2869_v25, %v5652_v47 }
 0x31b   : > { %3651 = vtanh.f32 %v2983_v57 }
 0x31c   : > { %3653 = vtanh.f32 %v2998_v54  ;;  %v2981_v30 = vmul.f32 0.7978846, %v2949_v32  ;;  %v2996_v9 = vmul.f32 0.7978846, %v2964_v1  ;;  %v2967_v48 = vadd.f32 %v2935_v40, %v5644_v38 }
 0x31d   : > { %v2933_v63 = vmul.f32 0.044715, %v2901_v31 }
 0x31e   : > { %3655 = vtanh.f32 %v2981_v30  ;;  %v2999_v33 = vmul.f32 0.7978846, %v2967_v48 }
 0x31f   : > { %3657 = vtanh.f32 %v2996_v9  ;;  %v2965_v28 = vadd.f32 %v2933_v63, %v5652_v47 }
 0x320   : > { %3659 = vtanh.f32 %v2999_v33 }
 0x321   : > { %v2997_v6 = vmul.f32 0.7978846, %v2965_v28 }
 0x323   : > { %3661 = vtanh.f32 %v2997_v6 }
 0x324   : > { %v3648_v42 = vpop.eup %3647 }
 0x325   : > { %v3046_v14 = vadd.f32 1.0, %v3648_v42 }
 0x326   : > { %v3650_v39 = vpop.eup %3649 }
 0x327   : > { %v3078_v0 = vmul.f32 0.5, %v3046_v14  ;;  %v3044_v20 = vadd.f32 1.0, %v3650_v39 }
 0x328   : > { %v3652_v52 = vpop.eup %3651 }
 0x329   : > { %v3654_v26 = vpop.eup %3653  ;;  %v3110_v55 = vmul.f32 %v3078_v0, %v5609_v13  ;;  %v3076_v18 = vmul.f32 0.5, %v3044_v20  ;;  %v3047_v15 = vadd.f32 1.0, %v3652_v52 }
 0x32a   : > { %v3062_v50 = vadd.f32 1.0, %v3654_v26 }
 0x32b   : > { %v3656_v44 = vpop.eup %3655  ;;  %v3477_v45 = vpack.c.bf16 %v3110_v55, %v3110_v55  ;;  %v3108_v49 = vmul.f32 %v3076_v18, %v5614_v34  ;;  %v3079_v24 = vmul.f32 0.5, %v3047_v15 }
 0x32c   : > { %v3658_v22 = vpop.eup %3657  ;;  %v3094_v59 = vmul.f32 0.5, %v3062_v50  ;;  %v3045_v35 = vadd.f32 1.0, %v3656_v44 }
 0x32d   : > { %v3660_v17 = vpop.eup %3659  ;;  %3271 = vst.msk [vmem:[%s5571_s27 + $0x18] sm:$0xf] %vm3264_vm10, %v3477_v45  ;;  %v3475_v58 = vpack.c.bf16 %v3108_v49, %v3108_v49  ;;  %v3111_v13 = vmul.f32 %v3079_v24, %v5620_v11  ;;  %v3060_v4 = vadd.f32 1.0, %v3658_v22 }
 0x32e   : > { %v3126_v12 = vmul.f32 %v3094_v59, %v5623_v3  ;;  %v3077_v43 = vmul.f32 0.5, %v3045_v35  ;;  %v3063_v62 = vadd.f32 1.0, %v3660_v17 }
 0x32f   : > { %3269 = vst.msk [vmem:[%s5571_s27 + $0x10] sm:$0xf] %vm3264_vm10, %v3475_v58  ;;  %v3478_v34 = vpack.c.bf16 %v3111_v13, %v3111_v13  ;;  %v3092_v41 = vmul.f32 0.5, %v3060_v4 }
 0x330   : > { %v3662_v36 = vpop.eup %3661  ;;  %v3493_v7 = vpack.c.bf16 %v3126_v12, %v3126_v12  ;;  %v3109_v5 = vmul.f32 %v3077_v43, %v5631_v46  ;;  %v3095_v51 = vmul.f32 0.5, %v3063_v62 }
 0x331   : > { %3272 = vst.msk [vmem:[%s5571_s27 + $0x1c] sm:$0xf] %vm3264_vm10, %v3478_v34  ;;  %v3124_v11 = vmul.f32 %v3092_v41, %v5634_v23  ;;  %v3061_v3 = vadd.f32 1.0, %v3662_v36 }
 0x332   : > { %3287 = vst.msk [vmem:[%s5571_s27 + $0x58] sm:$0xf] %vm3264_vm10, %v3493_v7  ;;  %v3476_v29 = vpack.c.bf16 %v3109_v5, %v3109_v5  ;;  %v3127_v27 = vmul.f32 %v3095_v51, %v5644_v38 }
 0x333   : > { %v3491_v53 = vpack.c.bf16 %v3124_v11, %v3124_v11  ;;  %v3093_v19 = vmul.f32 0.5, %v3061_v3 }
 0x334   : > { %3270 = vst.msk [vmem:[%s5571_s27 + $0x14] sm:$0xf] %vm3264_vm10, %v3476_v29  ;;  %v3494_v60 = vpack.c.bf16 %v3127_v27, %v3127_v27 }
 0x335   : > { %3285 = vst.msk [vmem:[%s5571_s27 + $0x50] sm:$0xf] %vm3264_vm10, %v3491_v53  ;;  %v3125_v46 = vmul.f32 %v3093_v19, %v5652_v47 }
 0x336   : > { %3288 = vst.msk [vmem:[%s5571_s27 + $0x5c] sm:$0xf] %vm3264_vm10, %v3494_v60 }
 0x337   : > { %v3492_v61 = vpack.c.bf16 %v3125_v46, %v3125_v46 }
 0x339   : > { %3286 = vst.msk [vmem:[%s5571_s27 + $0x54] sm:$0xf] %vm3264_vm10, %v3492_v61 }
 0x35e   : > { %v3536_v23 = vpop.f32.mrf.mxu0 }
 0x35f   : > { %v5689_v2 = vadd.f32 %v3536_v23, %v5490_v10 }
 0x360   : > { %v2753_v37 = vpop.f32.mrf.mxu0 }
 0x361   : > { %v2858_v38 = vmul.f32 %v5689_v2, %v5689_v2  ;;  %v5694_v8 = vadd.f32 %v5490_v10, %v2753_v37 }
 0x362   : > { %v3537_v21 = vpop.f32.mrf.mxu0  ;;  %v3552_v16 = vpop.f32.mrf.mxu1 }
 0x363   : > { %v2890_v47 = vmul.f32 %v2858_v38, %v5689_v2  ;;  %v2856_v56 = vmul.f32 %v5694_v8, %v5694_v8  ;;  %v5700_v25 = vadd.f32 %v3537_v21, %v5490_v10  ;;  %v5703_v57 = vadd.f32 %v3552_v16, %v5490_v10 }
 0x364   : > { %v2756_v54 = vpop.f32.mrf.mxu0  ;;  %v2817_v32 = vpop.f32.mrf.mxu1 }
 0x365   : > { %v2922_v1 = vmul.f32 0.044715, %v2890_v47  ;;  %v2888_v40 = vmul.f32 %v2856_v56, %v5694_v8  ;;  %v2859_v31 = vmul.f32 %v5700_v25, %v5700_v25  ;;  %v2874_v30 = vmul.f32 %v5703_v57, %v5703_v57 }
 0x366   : > { %v5711_v9 = vadd.f32 %v5490_v10, %v2756_v54  ;;  %v5714_v48 = vadd.f32 %v5490_v10, %v2817_v32  ;;  %v3553_v63 = vpop.f32.mrf.mxu1 }
 0x367   : > { %v2954_v33 = vadd.f32 %v2922_v1, %v5689_v2  ;;  %v2920_v28 = vmul.f32 0.044715, %v2888_v40  ;;  %v2891_v6 = vmul.f32 %v2859_v31, %v5700_v25  ;;  %v2906_v42 = vmul.f32 %v2874_v30, %v5703_v57 }
 0x368   : > { %v2857_v14 = vmul.f32 %v5711_v9, %v5711_v9  ;;  %v2872_v39 = vmul.f32 %v5714_v48, %v5714_v48  ;;  %v5724_v0 = vadd.f32 %v3553_v63, %v5490_v10  ;;  %v2820_v20 = vpop.f32.mrf.mxu1 }
 0x369   : > { %v2986_v52 = vmul.f32 0.7978846, %v2954_v33  ;;  %v2952_v26 = vadd.f32 %v2920_v28, %v5694_v8  ;;  %v2923_v55 = vmul.f32 0.044715, %v2891_v6  ;;  %v2938_v18 = vmul.f32 0.044715, %v2906_v42 }
 0x36a   : > { %v2889_v15 = vmul.f32 %v2857_v14, %v5711_v9  ;;  %v2904_v50 = vmul.f32 %v2872_v39, %v5714_v48  ;;  %v2875_v44 = vmul.f32 %v5724_v0, %v5724_v0  ;;  %v5732_v45 = vadd.f32 %v5490_v10, %v2820_v20 }
 0x36b   : > { %3663 = vtanh.f32 %v2986_v52  ;;  %v2984_v49 = vmul.f32 0.7978846, %v2952_v26  ;;  %v2955_v24 = vadd.f32 %v2923_v55, %v5700_v25  ;;  %v2970_v22 = vadd.f32 %v2938_v18, %v5703_v57 }
 0x36c   : > { %v2921_v59 = vmul.f32 0.044715, %v2889_v15  ;;  %v2936_v35 = vmul.f32 0.044715, %v2904_v50  ;;  %v2907_v17 = vmul.f32 %v2875_v44, %v5724_v0  ;;  %v2873_v58 = vmul.f32 %v5732_v45, %v5732_v45 }
 0x36d   : > { %3665 = vtanh.f32 %v2984_v49  ;;  %v2987_v13 = vmul.f32 0.7978846, %v2955_v24  ;;  %v3002_v4 = vmul.f32 0.7978846, %v2970_v22 }
 0x36e   : > { %v2953_v12 = vadd.f32 %v2921_v59, %v5711_v9  ;;  %v2968_v43 = vadd.f32 %v2936_v35, %v5714_v48  ;;  %v2939_v62 = vmul.f32 0.044715, %v2907_v17  ;;  %v2905_v34 = vmul.f32 %v2873_v58, %v5732_v45 }
 0x36f   : > { %3667 = vtanh.f32 %v2987_v13 }
 0x370   : > { %3669 = vtanh.f32 %v3002_v4  ;;  %v2985_v41 = vmul.f32 0.7978846, %v2953_v12  ;;  %v3000_v36 = vmul.f32 0.7978846, %v2968_v43  ;;  %v2971_v7 = vadd.f32 %v2939_v62, %v5724_v0 }
 0x371   : > { %v2937_v5 = vmul.f32 0.044715, %v2905_v34 }
 0x372   : > { %3671 = vtanh.f32 %v2985_v41  ;;  %v3003_v51 = vmul.f32 0.7978846, %v2971_v7 }
 0x373   : > { %3673 = vtanh.f32 %v3000_v36  ;;  %v2969_v11 = vadd.f32 %v2937_v5, %v5732_v45 }
 0x374   : > { %3675 = vtanh.f32 %v3003_v51 }
 0x375   : > { %v3001_v3 = vmul.f32 0.7978846, %v2969_v11 }
 0x377   : > { %3677 = vtanh.f32 %v3001_v3 }
 0x378   : > { %v3664_v29 = vpop.eup %3663 }
 0x379   : > { %v3050_v27 = vadd.f32 1.0, %v3664_v29 }
 0x37a   : > { %v3666_v53 = vpop.eup %3665 }
 0x37b   : > { %v3082_v19 = vmul.f32 0.5, %v3050_v27  ;;  %v3048_v60 = vadd.f32 1.0, %v3666_v53 }
 0x37c   : > { %v3668_v46 = vpop.eup %3667 }
 0x37d   : > { %v3670_v61 = vpop.eup %3669  ;;  %v3114_v23 = vmul.f32 %v3082_v19, %v5689_v2  ;;  %v3080_v37 = vmul.f32 0.5, %v3048_v60  ;;  %v3051_v38 = vadd.f32 1.0, %v3668_v46 }
 0x37e   : > { %v3066_v21 = vadd.f32 1.0, %v3670_v61 }
 0x37f   : > { %v3672_v16 = vpop.eup %3671  ;;  %v3481_v47 = vpack.c.bf16 %v3114_v23, %v3114_v23  ;;  %v3112_v56 = vmul.f32 %v3080_v37, %v5694_v8  ;;  %v3083_v54 = vmul.f32 0.5, %v3051_v38 }
 0x380   : > { %v3674_v32 = vpop.eup %3673  ;;  %v3098_v1 = vmul.f32 0.5, %v3066_v21  ;;  %v3049_v40 = vadd.f32 1.0, %v3672_v16 }
 0x381   : > { %v3676_v31 = vpop.eup %3675  ;;  %3275 = vst.msk [vmem:[%s5571_s27 + $0x28] sm:$0xf] %vm3264_vm10, %v3481_v47  ;;  %v3479_v30 = vpack.c.bf16 %v3112_v56, %v3112_v56  ;;  %v3115_v2 = vmul.f32 %v3083_v54, %v5700_v25  ;;  %v3064_v63 = vadd.f32 1.0, %v3674_v32 }
 0x382   : > { %v3130_v33 = vmul.f32 %v3098_v1, %v5703_v57  ;;  %v3081_v28 = vmul.f32 0.5, %v3049_v40  ;;  %v3067_v6 = vadd.f32 1.0, %v3676_v31 }
 0x383   : > { %3273 = vst.msk [vmem:[%s5571_s27 + $0x20] sm:$0xf] %vm3264_vm10, %v3479_v30  ;;  %v3482_v8 = vpack.c.bf16 %v3115_v2, %v3115_v2  ;;  %v3096_v42 = vmul.f32 0.5, %v3064_v63 }
 0x384   : > { %v3678_v14 = vpop.eup %3677  ;;  %v3497_v39 = vpack.c.bf16 %v3130_v33, %v3130_v33  ;;  %v3113_v20 = vmul.f32 %v3081_v28, %v5711_v9  ;;  %v3099_v52 = vmul.f32 0.5, %v3067_v6 }
 0x385   : > { %3276 = vst.msk [vmem:[%s5571_s27 + $0x2c] sm:$0xf] %vm3264_vm10, %v3482_v8  ;;  %v3128_v25 = vmul.f32 %v3096_v42, %v5714_v48  ;;  %v3065_v57 = vadd.f32 1.0, %v3678_v14 }
 0x386   : > { %3291 = vst.msk [vmem:[%s5571_s27 + $0x68] sm:$0xf] %vm3264_vm10, %v3497_v39  ;;  %v3480_v26 = vpack.c.bf16 %v3113_v20, %v3113_v20  ;;  %v3131_v55 = vmul.f32 %v3099_v52, %v5724_v0 }
 0x387   : > { %v3495_v18 = vpack.c.bf16 %v3128_v25, %v3128_v25  ;;  %v3097_v15 = vmul.f32 0.5, %v3065_v57 }
 0x388   : > { %3274 = vst.msk [vmem:[%s5571_s27 + $0x24] sm:$0xf] %vm3264_vm10, %v3480_v26  ;;  %v3498_v50 = vpack.c.bf16 %v3131_v55, %v3131_v55 }
 0x389   : > { %3289 = vst.msk [vmem:[%s5571_s27 + $0x60] sm:$0xf] %vm3264_vm10, %v3495_v18  ;;  %v3129_v9 = vmul.f32 %v3097_v15, %v5732_v45 }
 0x38a   : > { %3292 = vst.msk [vmem:[%s5571_s27 + $0x6c] sm:$0xf] %vm3264_vm10, %v3498_v50 }
 0x38b   : > { %v3496_v44 = vpack.c.bf16 %v3129_v9, %v3129_v9 }
 0x38d   : > { %3290 = vst.msk [vmem:[%s5571_s27 + $0x64] sm:$0xf] %vm3264_vm10, %v3496_v44 }
 0x3b6   : > { %v3540_v48 = vpop.f32.mrf.mxu0 }
 0x3b7   : > { %v5769_v49 = vadd.f32 %v3540_v48, %v5490_v10 }
 0x3b8   : > { %v2769_v24 = vpop.f32.mrf.mxu0 }
 0x3b9   : > { %v2862_v0 = vmul.f32 %v5769_v49, %v5769_v49  ;;  %v5774_v22 = vadd.f32 %v5490_v10, %v2769_v24 }
 0x3ba   : > { %v3541_v59 = vpop.f32.mrf.mxu0  ;;  %v3556_v35 = vpop.f32.mrf.mxu1 }
 0x3bb   : > { %v2894_v45 = vmul.f32 %v2862_v0, %v5769_v49  ;;  %v2860_v17 = vmul.f32 %v5774_v22, %v5774_v22  ;;  %v5780_v58 = vadd.f32 %v3541_v59, %v5490_v10  ;;  %v5783_v13 = vadd.f32 %v3556_v35, %v5490_v10 }
 0x3bc   : > { %v2772_v4 = vpop.f32.mrf.mxu0  ;;  %v2833_v12 = vpop.f32.mrf.mxu1 }
 0x3bd   : > { %v2926_v43 = vmul.f32 0.044715, %v2894_v45  ;;  %v2892_v62 = vmul.f32 %v2860_v17, %v5774_v22  ;;  %v2863_v34 = vmul.f32 %v5780_v58, %v5780_v58  ;;  %v2878_v41 = vmul.f32 %v5783_v13, %v5783_v13 }
 0x3be   : > { %v5791_v36 = vadd.f32 %v5490_v10, %v2772_v4  ;;  %v5794_v7 = vadd.f32 %v5490_v10, %v2833_v12  ;;  %v3557_v5 = vpop.f32.mrf.mxu1 }
 0x3bf   : > { %v2958_v51 = vadd.f32 %v2926_v43, %v5769_v49  ;;  %v2924_v11 = vmul.f32 0.044715, %v2892_v62  ;;  %v2895_v3 = vmul.f32 %v2863_v34, %v5780_v58  ;;  %v2910_v29 = vmul.f32 %v2878_v41, %v5783_v13 }
 0x3c0   : > { %v2861_v27 = vmul.f32 %v5791_v36, %v5791_v36  ;;  %v2876_v53 = vmul.f32 %v5794_v7, %v5794_v7  ;;  %v5804_v19 = vadd.f32 %v3557_v5, %v5490_v10  ;;  %v2836_v60 = vpop.f32.mrf.mxu1 }
 0x3c1   : > { %v2990_v46 = vmul.f32 0.7978846, %v2958_v51  ;;  %v2956_v61 = vadd.f32 %v2924_v11, %v5774_v22  ;;  %v2927_v23 = vmul.f32 0.044715, %v2895_v3  ;;  %v2942_v37 = vmul.f32 0.044715, %v2910_v29 }
 0x3c2   : > { %v2893_v38 = vmul.f32 %v2861_v27, %v5791_v36  ;;  %v2908_v21 = vmul.f32 %v2876_v53, %v5794_v7  ;;  %v2879_v16 = vmul.f32 %v5804_v19, %v5804_v19  ;;  %v5812_v47 = vadd.f32 %v5490_v10, %v2836_v60 }
 0x3c3   : > { %3679 = vtanh.f32 %v2990_v46  ;;  %v2988_v56 = vmul.f32 0.7978846, %v2956_v61  ;;  %v2959_v54 = vadd.f32 %v2927_v23, %v5780_v58  ;;  %v2974_v32 = vadd.f32 %v2942_v37, %v5783_v13 }
 0x3c4   : > { %v2925_v1 = vmul.f32 0.044715, %v2893_v38  ;;  %v2940_v40 = vmul.f32 0.044715, %v2908_v21  ;;  %v2911_v31 = vmul.f32 %v2879_v16, %v5804_v19  ;;  %v2877_v30 = vmul.f32 %v5812_v47, %v5812_v47 }
 0x3c5   : > { %3681 = vtanh.f32 %v2988_v56  ;;  %v2991_v2 = vmul.f32 0.7978846, %v2959_v54  ;;  %v3006_v63 = vmul.f32 0.7978846, %v2974_v32 }
 0x3c6   : > { %v2957_v33 = vadd.f32 %v2925_v1, %v5791_v36  ;;  %v2972_v10 = vadd.f32 %v2940_v40, %v5794_v7  ;;  %v2943_v28 = vmul.f32 0.044715, %v2911_v31  ;;  %v2909_v6 = vmul.f32 %v2877_v30, %v5812_v47 }
 0x3c7   : > { %3683 = vtanh.f32 %v2991_v2 }
 0x3c8   : > { %3685 = vtanh.f32 %v3006_v63  ;;  %v2989_v8 = vmul.f32 0.7978846, %v2957_v33  ;;  %v3004_v42 = vmul.f32 0.7978846, %v2972_v10  ;;  %v2975_v14 = vadd.f32 %v2943_v28, %v5804_v19 }
 0x3c9   : > { %v2941_v39 = vmul.f32 0.044715, %v2909_v6 }
 0x3ca   : > { %3687 = vtanh.f32 %v2989_v8  ;;  %v3007_v20 = vmul.f32 0.7978846, %v2975_v14 }
 0x3cb   : > { %3689 = vtanh.f32 %v3004_v42  ;;  %v2973_v52 = vadd.f32 %v2941_v39, %v5812_v47 }
 0x3cc   : > { %3691 = vtanh.f32 %v3007_v20 }
 0x3cd   : > { %v3005_v25 = vmul.f32 0.7978846, %v2973_v52 }
 0x3cf   : > { %3693 = vtanh.f32 %v3005_v25 }
 0x3d0   : > { %v3680_v57 = vpop.eup %3679 }
 0x3d1   : > { %v3054_v26 = vadd.f32 1.0, %v3680_v57 }
 0x3d2   : > { %v3682_v55 = vpop.eup %3681 }
 0x3d3   : > { %v3086_v18 = vmul.f32 0.5, %v3054_v26  ;;  %v3052_v15 = vadd.f32 1.0, %v3682_v55 }
 0x3d4   : > { %v3684_v50 = vpop.eup %3683 }
 0x3d5   : > { %v3686_v9 = vpop.eup %3685  ;;  %v3118_v44 = vmul.f32 %v3086_v18, %v5769_v49  ;;  %v3084_v48 = vmul.f32 0.5, %v3052_v15  ;;  %v3055_v24 = vadd.f32 1.0, %v3684_v50 }
 0x3d6   : > { %v3070_v0 = vadd.f32 1.0, %v3686_v9 }
 0x3d7   : > { %v3688_v59 = vpop.eup %3687  ;;  %v3485_v35 = vpack.c.bf16 %v3118_v44, %v3118_v44  ;;  %v3116_v45 = vmul.f32 %v3084_v48, %v5774_v22  ;;  %v3087_v17 = vmul.f32 0.5, %v3055_v24 }
 0x3d8   : > { %v3690_v4 = vpop.eup %3689  ;;  %v3102_v12 = vmul.f32 0.5, %v3070_v0  ;;  %v3053_v43 = vadd.f32 1.0, %v3688_v59 }
 0x3d9   : > { %v3692_v62 = vpop.eup %3691  ;;  %3279 = vst.msk [vmem:[%s5571_s27 + $0x38] sm:$0xf] %vm3264_vm10, %v3485_v35  ;;  %v3483_v34 = vpack.c.bf16 %v3116_v45, %v3116_v45  ;;  %v3119_v49 = vmul.f32 %v3087_v17, %v5780_v58  ;;  %v3068_v41 = vadd.f32 1.0, %v3690_v4 }
 0x3da   : > { %v3134_v5 = vmul.f32 %v3102_v12, %v5783_v13  ;;  %v3085_v51 = vmul.f32 0.5, %v3053_v43  ;;  %v3071_v11 = vadd.f32 1.0, %v3692_v62 }
 0x3db   : > { %3277 = vst.msk [vmem:[%s5571_s27 + $0x30] sm:$0xf] %vm3264_vm10, %v3483_v34  ;;  %v3486_v22 = vpack.c.bf16 %v3119_v49, %v3119_v49  ;;  %v3100_v3 = vmul.f32 0.5, %v3068_v41 }
 0x3dc   : > { %v3694_v29 = vpop.eup %3693  ;;  %v3501_v27 = vpack.c.bf16 %v3134_v5, %v3134_v5  ;;  %v3117_v53 = vmul.f32 %v3085_v51, %v5791_v36  ;;  %v3103_v60 = vmul.f32 0.5, %v3071_v11 }
 0x3dd   : > { %3280 = vst.msk [vmem:[%s5571_s27 + $0x3c] sm:$0xf] %vm3264_vm10, %v3486_v22  ;;  %v3132_v58 = vmul.f32 %v3100_v3, %v5794_v7  ;;  %v3069_v13 = vadd.f32 1.0, %v3694_v29 }
 0x3de   : > { %3295 = vst.msk [vmem:[%s5571_s27 + $0x78] sm:$0xf] %vm3264_vm10, %v3501_v27  ;;  %v3484_v46 = vpack.c.bf16 %v3117_v53, %v3117_v53  ;;  %v3135_v61 = vmul.f32 %v3103_v60, %v5804_v19 }
 0x3df   : > { %v3499_v23 = vpack.c.bf16 %v3132_v58, %v3132_v58  ;;  %v3101_v37 = vmul.f32 0.5, %v3069_v13 }
 0x3e0   : > { %3278 = vst.msk [vmem:[%s5571_s27 + $0x34] sm:$0xf] %vm3264_vm10, %v3484_v46  ;;  %v3502_v36 = vpack.c.bf16 %v3135_v61, %v3135_v61 }
 0x3e1   : > { %3293 = vst.msk [vmem:[%s5571_s27 + $0x70] sm:$0xf] %vm3264_vm10, %v3499_v23  ;;  %v3133_v7 = vmul.f32 %v3101_v37, %v5812_v47 }
 0x3e2   : > { %3296 = vst.msk [vmem:[%s5571_s27 + $0x7c] sm:$0xf] %vm3264_vm10, %v3502_v36 }
 0x3e3   : > { %v3500_v19 = vpack.c.bf16 %v3133_v7, %v3133_v7 }
 0x3e5   : > { %3294 = vst.msk [vmem:[%s5571_s27 + $0x74] sm:$0xf] %vm3264_vm10, %v3500_v19 }
 0x3e6   : > { %3714 = shalt.err (!%p3711_p3)
}
 0x3e7   : > { %s3715_s10 = scalar_lea.hbm %s5851_s5, 2048  ;;  %s3719_s19 = scalar_lea.hbm %s5902_s3, 4096 }
 0x3e8   : > { %p3716_p4 = scmp.ne.s32.totalorder %s5851_s5, %s3715_s10  ;;  %p3720_p9 = scmp.lt.s32.totalorder %s5851_s5, %s5902_s3 }
 0x3e9   : > { %p3721_p10 = scmp.lt.s32.totalorder %s3719_s19, %s3715_s10 }
 0x3ea   : > { %p3717_p7 = pnand %p3716_p4, %p3834_p5 }
 0x3eb   : > { %p3722_p11 = por %p3721_p10, %p3720_p9 }
 0x3ec   : > { %p3718_p8 = pneg %p3717_p7 }
 0x3ee   : > { %p3723_p12 = pnand %p3722_p11, %p3718_p8 }
 0x3f0   : > { %3726 = shalt.err (!%p3723_p12)
}
 0x3f1   : > { %s3774_s25 = smov 64   ;;  %s3775_s26 = smov 4  }
 0x3f2   : > { %3562 = dma.vmem_to_hbm [thread:$0]  (%p3834_p5), %s5853_s29, 2048, %s5851_s5, %s5859_s16, %s3774_s25, %s3774_s25, %s3775_s26  }
 0x3f3 PF: > { %p3568_p13 = scmp.ge.s32.totalorder %s3761_s15, 2  ;;  %s3326_s27 = sand.u32 1, %s3749_s12  }
 0x3f4   : > { %s3327_s28 = scalar_lea.sflag [#allocation5], %s3326_s27 }
 0x3f5   : > { %p3565_p0 = pnand %p3568_p13, %p3838_p6 }
 0x3f7   : > { %p3566_p1 = pneg %p3565_p0 }
 0x3f9   : > { %3744 = dma.done.wait (%p3566_p1), %s3327_s28, 2048  }
 0x3fa   : > { %3746 = vsyncadd (%p3566_p1), %s3327_s28, 4294965248  ;;  %p13_p2 = scmp.ge.s32.totalorder %s3821_s18, 4   ;;  %s6082_s12 = smov %s3753_s13 }
 0x3fb   : > { %s6083_s13 = smov %s3757_s14  ;;  %s6084_s14 = smov %s3832_s21 }
 0x3fc   : > { %s6085_s15 = smov %s3821_s18  ;;  %15 = sbr.rel (!%p13_p2) target bundleno = 3 (0x3), region = 69 }
 0x401   :  { %3332 = vsyncpa [#allocation5], 1 }
 0x402   :  { %3334 = vsyncpa [#allocation5 + $0x1], 1 }

</bundles_post_ra>
